<compile_context>
chip_gen: v5e
topology: v5e:2x2
jax: 0.10.0
libtpu: 0.0.40
codegen_flags: <defaults>
</compile_context>

<pallas_src>
import functools

import jax
import jax.numpy as jnp
import numpy as np
from jax.experimental import pallas as pl
from jax.experimental.pallas import tpu as pltpu

_EPS = 1e-5

_VECTORS = ("g1a", "b1a", "g1b", "b1b", "bd0", "g2a", "b2a", "g2b", "b2b", "bd1")


# ---------------------------------------------------------------------------
# Pallas kernel
# ---------------------------------------------------------------------------
def tcn_kernel(x_ref, p_ref, out_ref, *, N, L, K, C, offs):
    """x_ref: (N*L, Cin) f32; p_ref: (rows, 2*C) f32 packed params; out_ref: (N, C)."""
    NL = N * L
    x = x_ref[...]                                           # (NL, Cin) f32

    dot = functools.partial(jnp.dot, precision=jax.lax.Precision.HIGHEST,
                            preferred_element_type=jnp.float32)

    def wslab(name, rows, width):                            # aligned weight view
        return p_ref[pl.ds(offs[name], rows), pl.ds(0, width)]

    def vec(name):                                           # per-channel vector
        return p_ref[pl.ds(offs[name], 1), pl.ds(0, C)]      # (1, C) f32

    # Hoisted per-row time index and causal masks, shared by all four convs.
    t_idx = jax.lax.broadcasted_iota(jnp.int32, (NL, 1), 0) % L
    shifts = sorted({(K - 1 - k) * d for d in (1, 2) for k in range(K - 1)})
    masks = {s: t_idx >= s for s in shifts}

    def shift_t(v, s):
        # Row t picks row t-s of its own sequence; rows with t < s (including
        # roll wrap-around across sequence boundaries) are zeroed.
        if s == 0:
            return v
        return jnp.where(masks[s], pltpu.roll(v, shift=s, axis=0), 0.0)

    def causal_conv(v, base, dil, width):
        # K accumulated (shift, dot) taps -- no lane-unaligned im2col concat.
        ci = v.shape[-1]
        acc = dot(v, wslab(f"{base}{K - 1}", ci, width))      # shift-0 tap
        for k in range(K - 1):
            acc = acc + dot(shift_t(v, (K - 1 - k) * dil),
                            wslab(f"{base}{k}", ci, width))
        return acc

    def bn_scale_shift(v, gname, bname):
        # Training-mode BatchNorm1d (biased variance), folded to scale/shift.
        inv_n = 1.0 / v.shape[0]
        mean = jnp.sum(v, axis=0, keepdims=True) * inv_n
        var = jnp.sum(v * v, axis=0, keepdims=True) * inv_n - mean * mean
        scale = vec(gname) * jax.lax.rsqrt(jnp.maximum(var, 0.0) + _EPS)
        return scale, vec(bname) - mean * scale

    def bn_relu(v, gname, bname):
        scale, shift = bn_scale_shift(v, gname, bname)
        return jnp.maximum(v * scale + shift, 0.0)

    relu = lambda u: jnp.maximum(u, 0.0)

    def last_rows(v):
        # Rows {n*L + L-1} only: static single-row slices + tiny sublane concat
        # (no 3-D reshape / relayout, no reliance on strided value slicing).
        return jnp.concatenate(
            [v[(n + 1) * L - 1:(n + 1) * L, :] for n in range(N)], axis=0)

    # ---- conv_block1 (dilation 1); first conv fused with downsample0 ----
    f1 = causal_conv(x, "w1a", 1, 2 * C)          # (NL, 2C) = [conv1a_pre | x@wd0]
    res0 = f1[:, C:] + vec("bd0")
    h = bn_relu(f1[:, :C], "g1a", "b1a")
    x0 = bn_relu(causal_conv(h, "w1b", 1, C), "g1b", "b1b")
    out0 = relu(x0 + res0)                        # (NL, C)

    # ---- conv_block2 (dilation 2); first conv fused with downsample1 ----
    f2 = causal_conv(out0, "w2a", 2, 2 * C)       # (NL, 2C) = [conv2a_pre | out0@wd1]
    h2 = bn_relu(f2[:, :C], "g2a", "b2a")
    pre2b = causal_conv(h2, "w2b", 2, C)
    scale2, shift2 = bn_scale_shift(pre2b, "g2b", "b2b")   # stats need full sequence

    # Only the last time step of each sequence reaches the output: normalize,
    # ReLU and the final residual only on those rows.
    x1_last = relu(last_rows(pre2b) * scale2 + shift2)           # (N, C)
    res1_last = last_rows(f2)[:, C:] + vec("bd1")                # (N, C)
    out_ref[...] = relu(x1_last + res1_last)


# ---------------------------------------------------------------------------
# Host-side packing / wrapper
# ---------------------------------------------------------------------------
def pack_params(params, c_out, ksz):
    """Pack all weights/vectors into one f32 (rows, 2*c_out) buffer (single DMA).

    * Every weight slab (one conv tap, possibly fused with a 1x1 downsample)
      starts at a row offset that is a multiple of 8 -> aligned MXU operand views.
    * wd0 / wd1 occupy lanes [c_out, 2*c_out) of the shift-0 tap of w1a / w2a.
    * The 10 per-channel vectors live in lanes [0, c_out) of contiguous rows
      (1-row reads are sub-tile selects regardless of alignment).
    """
    c2 = 2 * c_out
    p32 = {k: np.asarray(v, np.float32) for k, v in params.items()}

    def widen(mat, extra=None):
        out = np.zeros((mat.shape[0], c2), np.float32)
        out[:, :c_out] = mat
        if extra is not None:
            out[:, c_out:] = extra
        return out

    segs = []
    for k in range(ksz):                          # block1 conv a, fused with wd0
        segs.append((f"w1a{k}",
                     widen(p32["w1a"][k], p32["wd0"] if k == ksz - 1 else None)))
    for k in range(ksz):
        segs.append((f"w1b{k}", widen(p32["w1b"][k])))
    for k in range(ksz):                          # block2 conv a, fused with wd1
        segs.append((f"w2a{k}",
                     widen(p32["w2a"][k], p32["wd1"] if k == ksz - 1 else None)))
    for k in range(ksz):
        segs.append((f"w2b{k}", widen(p32["w2b"][k])))

    rows, offsets, row = [], {}, 0
    for name, mat in segs:                        # 8-row-aligned weight slabs
        offsets[name] = row
        pad = (-mat.shape[0]) % 8
        if pad:
            mat = np.concatenate([mat, np.zeros((pad, c2), np.float32)], axis=0)
        rows.append(mat)
        row += mat.shape[0]
    for name in _VECTORS:                         # contiguous 1-row vectors
        offsets[name] = row
        rows.append(widen(p32[name].reshape(1, c_out)))
        row += 1
    return jnp.asarray(np.concatenate(rows, axis=0)), offsets


def make_tcn_forward(offsets, kernel_size):
    ksz = int(kernel_size)

    @jax.jit
    def forward(x_ncl, packed):
        """x_ncl: (N, C_in, L) like PyTorch. Returns (N, out_channels1)."""
        N, Cin, L = x_ncl.shape
        C = packed.shape[1] // 2
        x2 = jnp.transpose(x_ncl, (0, 2, 1)).reshape(N * L, Cin).astype(jnp.float32)
        kernel = functools.partial(tcn_kernel, N=N, L=L, K=ksz, C=C, offs=offsets)
        return pl.pallas_call(
            kernel,
            out_shape=jax.ShapeDtypeStruct((N, C), jnp.float32),
            in_specs=[pl.BlockSpec(memory_space=pltpu.MemorySpace.VMEM),
                      pl.BlockSpec(memory_space=pltpu.MemorySpace.VMEM)],
            out_specs=pl.BlockSpec(memory_space=pltpu.MemorySpace.VMEM),
            compiler_params=pltpu.CompilerParams(
                # Allow XLA to fuse the NCL->NLC transpose/reshape into the
                # kernel's input instead of a separate dispatch (x only).
                allow_input_fusion=[True, False]),
        )(x2, packed)

    return forward


# ---------------------------------------------------------------------------
# Parameter init + pure-numpy float32 reference (PyTorch training semantics)
# ---------------------------------------------------------------------------
def init_params(key, cin, c, k):
    ks = jax.random.split(key, 16)
    nrm = lambda kk, shp, s: (s * jax.random.normal(kk, shp)).astype(jnp.float32)
    return dict(
        # conv weights stored as (K, Cin, Cout) == torch (Cout, Cin, K) transposed
        w1a=nrm(ks[0], (k, cin, c), 0.25),
        g1a=1.0 + nrm(ks[1], (1, c), 0.1),
        b1a=nrm(ks[2], (1, c), 0.1),
        w1b=nrm(ks[3], (k, c, c), 0.1),
        g1b=1.0 + nrm(ks[4], (1, c), 0.1),
        b1b=nrm(ks[5], (1, c), 0.1),
        wd0=nrm(ks[6], (cin, c), 0.25),       # downsample0 1x1 weight (Cin, C)
        bd0=nrm(ks[7], (1, c), 0.1),
        w2a=nrm(ks[8], (k, c, c), 0.1),
        g2a=1.0 + nrm(ks[9], (1, c), 0.1),
        b2a=nrm(ks[10], (1, c), 0.1),
        w2b=nrm(ks[11], (k, c, c), 0.1),
        g2b=1.0 + nrm(ks[12], (1, c), 0.1),
        b2b=nrm(ks[13], (1, c), 0.1),
        wd1=nrm(ks[14], (c, c), 0.1),         # downsample1 1x1 weight (C, C)
        bd1=nrm(ks[15], (1, c), 0.1),
    )


def reference_forward(x_ncl, p):
    """Pure-numpy float32 reference matching PyTorch training-mode semantics."""
    x = np.transpose(np.asarray(x_ncl, np.float32), (0, 2, 1))   # (N, L, Cin)
    N, L, _ = x.shape
    relu = lambda v: np.maximum(v, 0.0)

    def causal_conv(v, w_kio, dil):
        w = np.asarray(w_kio, np.float32)
        Kk, Ci, Co = w.shape
        acc = np.zeros((N, L, Co), np.float32)
        for k in range(Kk):
            s = (Kk - 1 - k) * dil
            if s == 0:
                sh = v
            else:
                sh = np.zeros_like(v)
                sh[:, s:, :] = v[:, :L - s, :]
            acc = acc + (sh.reshape(N * L, Ci) @ w[k]).reshape(N, L, Co)
        return acc

    def conv1x1(v, w_io, b):
        y = v.reshape(N * L, v.shape[-1]) @ np.asarray(w_io, np.float32)
        return y.reshape(N, L, -1) + np.asarray(b, np.float32).reshape(1, 1, -1)

    def bn(v, g, b):
        m = v.mean(axis=(0, 1), keepdims=True)
        var = ((v - m) ** 2).mean(axis=(0, 1), keepdims=True)
        return ((v - m) / np.sqrt(var + _EPS)
                * np.asarray(g, np.float32).reshape(1, 1, -1)
                + np.asarray(b, np.float32).reshape(1, 1, -1))

    h = relu(bn(causal_conv(x, p["w1a"], 1), p["g1a"], p["b1a"]))
    x0 = relu(bn(causal_conv(h, p["w1b"], 1), p["g1b"], p["b1b"]))
    out0 = relu(x0 + conv1x1(x, p["wd0"], p["bd0"]))
    h2 = relu(bn(causal_conv(out0, p["w2a"], 2), p["g2a"], p["b2a"]))
    x1 = relu(bn(causal_conv(h2, p["w2b"], 2), p["g2b"], p["b2b"]))
    out1 = relu(x1 + conv1x1(out0, p["wd1"], p["bd1"]))
    return out1[:, L - 1, :]                                  # (N, C)


# ---------------------------------------------------------------------------
if __name__ == "__main__":
    key = jax.random.PRNGKey(0)
    N, Cin, L = 2, 4, 16          # (N, C_in, L_in)
    K = 3                         # tcn_kernel_size
    C = 32                        # tcn_layers = [16, 32] -> out_channels0/1 = 32
    kp, kx = jax.random.split(key)
    params = init_params(kp, Cin, C, K)
    x = jax.random.normal(kx, (N, Cin, L), jnp.float32)

    packed, offsets = pack_params(params, C, K)
    tcn_forward = make_tcn_forward(offsets, K)

    out = jax.block_until_ready(tcn_forward(x, packed))
    ref = reference_forward(x, params)

    assert out.shape == (N, C), out.shape
    np.testing.assert_allclose(np.asarray(out), ref, rtol=2e-3, atol=2e-3)
    print("KERNEL_OK")
</pallas_src>

<mosaic_0001>
module attributes {stable_mosaic.version = 11 : i64} {
  func.func @tcn_kernel(%arg0: memref<32x4xf32, #tpu.memory_space<vmem>>, %arg1: memref<322x64xf32, #tpu.memory_space<vmem>>, %arg2: memref<2x32xf32, #tpu.memory_space<vmem>>) attributes {dimension_semantics = [], scalar_prefetch = 0 : i64, scratch_operands = 0 : i64, tpu.core_type = #tpu.core_type<tc>} {
    %c0 = arith.constant 0 : index
    %c0_0 = arith.constant 0 : index
    %0 = vector.load %arg0[%c0, %c0_0] : memref<32x4xf32, #tpu.memory_space<vmem>>, vector<32x4xf32>
    %1 = tpu.iota {dimensions = array<i32: 0>} : vector<32x1xi32>
    %c16_i32 = arith.constant 16 : i32
    %c0_i32 = arith.constant 0 : i32
    %2 = arith.cmpi eq, %c16_i32, %c0_i32 : i32
    %c1_i32 = arith.constant 1 : i32
    %3 = arith.select %2, %c1_i32, %c16_i32 : i32
    %4 = vector.broadcast %3 : i32 to vector<32x1xi32>
    %5 = arith.remsi %1, %4 : vector<32x1xi32>
    %c0_i32_1 = arith.constant 0 : i32
    %6 = vector.broadcast %c0_i32_1 : i32 to vector<32x1xi32>
    %7 = arith.cmpi ne, %5, %6 : vector<32x1xi32>
    %c0_i32_2 = arith.constant 0 : i32
    %8 = vector.broadcast %c0_i32_2 : i32 to vector<32x1xi32>
    %9 = arith.cmpi slt, %5, %8 : vector<32x1xi32>
    %c0_i32_3 = arith.constant 0 : i32
    %10 = arith.cmpi slt, %3, %c0_i32_3 : i32
    %11 = vector.broadcast %10 : i1 to vector<32x1xi1>
    %12 = vector.broadcast %11 : vector<32x1xi1> to vector<32x1xi1>
    %13 = arith.xori %9, %12 : vector<32x1xi1>
    %14 = arith.andi %13, %7 : vector<32x1xi1>
    %15 = vector.broadcast %3 : i32 to vector<32x1xi32>
    %16 = arith.addi %5, %15 : vector<32x1xi32>
    %17 = arith.select %14, %16, %5 : vector<32x1xi1>, vector<32x1xi32>
    %c1_i32_4 = arith.constant 1 : i32
    %18 = vector.broadcast %c1_i32_4 : i32 to vector<32x1xi32>
    %19 = arith.cmpi sge, %17, %18 : vector<32x1xi32>
    %c2_i32 = arith.constant 2 : i32
    %20 = vector.broadcast %c2_i32 : i32 to vector<32x1xi32>
    %21 = arith.cmpi sge, %17, %20 : vector<32x1xi32>
    %c4_i32 = arith.constant 4 : i32
    %22 = vector.broadcast %c4_i32 : i32 to vector<32x1xi32>
    %23 = arith.cmpi sge, %17, %22 : vector<32x1xi32>
    %c16 = arith.constant 16 : index
    %c0_5 = arith.constant 0 : index
    %24 = vector.load %arg1[%c16, %c0_5] : memref<322x64xf32, #tpu.memory_space<vmem>>, vector<4x64xf32>
    %cst = arith.constant dense<0.000000e+00> : vector<32x64xf32>
    %25 = tpu.matmul %0, %24, %cst {dimension_numbers = #tpu.dot_dimension_numbers<[1], [0], [0], [1], [0, 0, 1, 1], [], []>, precision = #tpu.contract_precision<fp32>} : vector<32x4xf32>, vector<4x64xf32>, vector<32x64xf32> -> vector<32x64xf32>
    %c2_i32_6 = arith.constant 2 : i32
    %26 = tpu.dynamic_rotate %0 by %c2_i32_6 dim 0 : vector<32x4xf32>, i32 -> vector<32x4xf32>
    %cst_7 = arith.constant 0.000000e+00 : f32
    %27 = vector.shape_cast %21 : vector<32x1xi1> to vector<32x1xi1>
    %28 = vector.broadcast %27 : vector<32x1xi1> to vector<32x4xi1>
    %29 = vector.broadcast %cst_7 : f32 to vector<32x4xf32>
    %30 = arith.select %28, %26, %29 : vector<32x4xi1>, vector<32x4xf32>
    %c0_8 = arith.constant 0 : index
    %c0_9 = arith.constant 0 : index
    %31 = vector.load %arg1[%c0_8, %c0_9] : memref<322x64xf32, #tpu.memory_space<vmem>>, vector<4x64xf32>
    %cst_10 = arith.constant dense<0.000000e+00> : vector<32x64xf32>
    %32 = tpu.matmul %30, %31, %cst_10 {dimension_numbers = #tpu.dot_dimension_numbers<[1], [0], [0], [1], [0, 0, 1, 1], [], []>, precision = #tpu.contract_precision<fp32>} : vector<32x4xf32>, vector<4x64xf32>, vector<32x64xf32> -> vector<32x64xf32>
    %33 = arith.addf %25, %32 : vector<32x64xf32>
    %c1_i32_11 = arith.constant 1 : i32
    %34 = tpu.dynamic_rotate %0 by %c1_i32_11 dim 0 : vector<32x4xf32>, i32 -> vector<32x4xf32>
    %cst_12 = arith.constant 0.000000e+00 : f32
    %35 = vector.shape_cast %19 : vector<32x1xi1> to vector<32x1xi1>
    %36 = vector.broadcast %35 : vector<32x1xi1> to vector<32x4xi1>
    %37 = vector.broadcast %cst_12 : f32 to vector<32x4xf32>
    %38 = arith.select %36, %34, %37 : vector<32x4xi1>, vector<32x4xf32>
    %c8 = arith.constant 8 : index
    %c0_13 = arith.constant 0 : index
    %39 = vector.load %arg1[%c8, %c0_13] : memref<322x64xf32, #tpu.memory_space<vmem>>, vector<4x64xf32>
    %cst_14 = arith.constant dense<0.000000e+00> : vector<32x64xf32>
    %40 = tpu.matmul %38, %39, %cst_14 {dimension_numbers = #tpu.dot_dimension_numbers<[1], [0], [0], [1], [0, 0, 1, 1], [], []>, precision = #tpu.contract_precision<fp32>} : vector<32x4xf32>, vector<4x64xf32>, vector<32x64xf32> -> vector<32x64xf32>
    %41 = arith.addf %33, %40 : vector<32x64xf32>
    %42 = vector.extract_strided_slice %41 {offsets = [0, 32], sizes = [32, 32], strides = [1, 1]} : vector<32x64xf32> to vector<32x32xf32>
    %c316 = arith.constant 316 : index
    %c0_15 = arith.constant 0 : index
    %43 = vector.load %arg1[%c316, %c0_15] : memref<322x64xf32, #tpu.memory_space<vmem>>, vector<1x32xf32>
    %44 = vector.broadcast %43 : vector<1x32xf32> to vector<32x32xf32>
    %45 = arith.addf %42, %44 : vector<32x32xf32>
    %46 = vector.extract_strided_slice %41 {offsets = [0, 0], sizes = [32, 32], strides = [1, 1]} : vector<32x64xf32> to vector<32x32xf32>
    %cst_16 = arith.constant dense<0.000000e+00> : vector<32xf32>
    %47 = vector.multi_reduction <add>, %46, %cst_16 [0] : vector<32x32xf32> to vector<32xf32>
    %48 = vector.shape_cast %47 : vector<32xf32> to vector<1x32xf32>
    %cst_17 = arith.constant 3.125000e-02 : f32
    %49 = vector.broadcast %cst_17 : f32 to vector<1x32xf32>
    %50 = arith.mulf %48, %49 : vector<1x32xf32>
    %51 = arith.mulf %46, %46 : vector<32x32xf32>
    %cst_18 = arith.constant dense<0.000000e+00> : vector<32xf32>
    %52 = vector.multi_reduction <add>, %51, %cst_18 [0] : vector<32x32xf32> to vector<32xf32>
    %53 = vector.shape_cast %52 : vector<32xf32> to vector<1x32xf32>
    %cst_19 = arith.constant 3.125000e-02 : f32
    %54 = vector.broadcast %cst_19 : f32 to vector<1x32xf32>
    %55 = arith.mulf %53, %54 : vector<1x32xf32>
    %56 = arith.mulf %50, %50 : vector<1x32xf32>
    %57 = arith.subf %55, %56 : vector<1x32xf32>
    %c312 = arith.constant 312 : index
    %c0_20 = arith.constant 0 : index
    %58 = vector.load %arg1[%c312, %c0_20] : memref<322x64xf32, #tpu.memory_space<vmem>>, vector<1x32xf32>
    %cst_21 = arith.constant 0.000000e+00 : f32
    %59 = vector.broadcast %cst_21 : f32 to vector<1x32xf32>
    %60 = arith.maximumf %57, %59 : vector<1x32xf32>
    %cst_22 = arith.constant 9.99999974E-6 : f32
    %61 = vector.broadcast %cst_22 : f32 to vector<1x32xf32>
    %62 = arith.addf %60, %61 : vector<1x32xf32>
    %63 = math.rsqrt %62 : vector<1x32xf32>
    %64 = arith.mulf %58, %63 : vector<1x32xf32>
    %c313 = arith.constant 313 : index
    %c0_23 = arith.constant 0 : index
    %65 = vector.load %arg1[%c313, %c0_23] : memref<322x64xf32, #tpu.memory_space<vmem>>, vector<1x32xf32>
    %66 = arith.mulf %50, %64 : vector<1x32xf32>
    %67 = arith.subf %65, %66 : vector<1x32xf32>
    %68 = vector.broadcast %64 : vector<1x32xf32> to vector<32x32xf32>
    %69 = arith.mulf %46, %68 : vector<32x32xf32>
    %70 = vector.broadcast %67 : vector<1x32xf32> to vector<32x32xf32>
    %71 = arith.addf %69, %70 : vector<32x32xf32>
    %cst_24 = arith.constant 0.000000e+00 : f32
    %72 = vector.broadcast %cst_24 : f32 to vector<32x32xf32>
    %73 = arith.maximumf %71, %72 : vector<32x32xf32>
    %c88 = arith.constant 88 : index
    %c0_25 = arith.constant 0 : index
    %74 = vector.load %arg1[%c88, %c0_25] : memref<322x64xf32, #tpu.memory_space<vmem>>, vector<32x32xf32>
    %cst_26 = arith.constant dense<0.000000e+00> : vector<32x32xf32>
    %75 = tpu.matmul %73, %74, %cst_26 {dimension_numbers = #tpu.dot_dimension_numbers<[1], [0], [0], [1], [0, 0, 1, 1], [], []>, precision = #tpu.contract_precision<fp32>} : vector<32x32xf32>, vector<32x32xf32>, vector<32x32xf32> -> vector<32x32xf32>
    %c2_i32_27 = arith.constant 2 : i32
    %76 = tpu.dynamic_rotate %73 by %c2_i32_27 dim 0 : vector<32x32xf32>, i32 -> vector<32x32xf32>
    %cst_28 = arith.constant 0.000000e+00 : f32
    %77 = vector.shape_cast %21 : vector<32x1xi1> to vector<32x1xi1>
    %78 = vector.broadcast %77 : vector<32x1xi1> to vector<32x32xi1>
    %79 = vector.broadcast %cst_28 : f32 to vector<32x32xf32>
    %80 = arith.select %78, %76, %79 : vector<32x32xi1>, vector<32x32xf32>
    %c24 = arith.constant 24 : index
    %c0_29 = arith.constant 0 : index
    %81 = vector.load %arg1[%c24, %c0_29] : memref<322x64xf32, #tpu.memory_space<vmem>>, vector<32x32xf32>
    %cst_30 = arith.constant dense<0.000000e+00> : vector<32x32xf32>
    %82 = tpu.matmul %80, %81, %cst_30 {dimension_numbers = #tpu.dot_dimension_numbers<[1], [0], [0], [1], [0, 0, 1, 1], [], []>, precision = #tpu.contract_precision<fp32>} : vector<32x32xf32>, vector<32x32xf32>, vector<32x32xf32> -> vector<32x32xf32>
    %83 = arith.addf %75, %82 : vector<32x32xf32>
    %c1_i32_31 = arith.constant 1 : i32
    %84 = tpu.dynamic_rotate %73 by %c1_i32_31 dim 0 : vector<32x32xf32>, i32 -> vector<32x32xf32>
    %cst_32 = arith.constant 0.000000e+00 : f32
    %85 = vector.shape_cast %19 : vector<32x1xi1> to vector<32x1xi1>
    %86 = vector.broadcast %85 : vector<32x1xi1> to vector<32x32xi1>
    %87 = vector.broadcast %cst_32 : f32 to vector<32x32xf32>
    %88 = arith.select %86, %84, %87 : vector<32x32xi1>, vector<32x32xf32>
    %c56 = arith.constant 56 : index
    %c0_33 = arith.constant 0 : index
    %89 = vector.load %arg1[%c56, %c0_33] : memref<322x64xf32, #tpu.memory_space<vmem>>, vector<32x32xf32>
    %cst_34 = arith.constant dense<0.000000e+00> : vector<32x32xf32>
    %90 = tpu.matmul %88, %89, %cst_34 {dimension_numbers = #tpu.dot_dimension_numbers<[1], [0], [0], [1], [0, 0, 1, 1], [], []>, precision = #tpu.contract_precision<fp32>} : vector<32x32xf32>, vector<32x32xf32>, vector<32x32xf32> -> vector<32x32xf32>
    %91 = arith.addf %83, %90 : vector<32x32xf32>
    %cst_35 = arith.constant dense<0.000000e+00> : vector<32xf32>
    %92 = vector.multi_reduction <add>, %91, %cst_35 [0] : vector<32x32xf32> to vector<32xf32>
    %93 = vector.shape_cast %92 : vector<32xf32> to vector<1x32xf32>
    %cst_36 = arith.constant 3.125000e-02 : f32
    %94 = vector.broadcast %cst_36 : f32 to vector<1x32xf32>
    %95 = arith.mulf %93, %94 : vector<1x32xf32>
    %96 = arith.mulf %91, %91 : vector<32x32xf32>
    %cst_37 = arith.constant dense<0.000000e+00> : vector<32xf32>
    %97 = vector.multi_reduction <add>, %96, %cst_37 [0] : vector<32x32xf32> to vector<32xf32>
    %98 = vector.shape_cast %97 : vector<32xf32> to vector<1x32xf32>
    %cst_38 = arith.constant 3.125000e-02 : f32
    %99 = vector.broadcast %cst_38 : f32 to vector<1x32xf32>
    %100 = arith.mulf %98, %99 : vector<1x32xf32>
    %101 = arith.mulf %95, %95 : vector<1x32xf32>
    %102 = arith.subf %100, %101 : vector<1x32xf32>
    %c314 = arith.constant 314 : index
    %c0_39 = arith.constant 0 : index
    %103 = vector.load %arg1[%c314, %c0_39] : memref<322x64xf32, #tpu.memory_space<vmem>>, vector<1x32xf32>
    %cst_40 = arith.constant 0.000000e+00 : f32
    %104 = vector.broadcast %cst_40 : f32 to vector<1x32xf32>
    %105 = arith.maximumf %102, %104 : vector<1x32xf32>
    %cst_41 = arith.constant 9.99999974E-6 : f32
    %106 = vector.broadcast %cst_41 : f32 to vector<1x32xf32>
    %107 = arith.addf %105, %106 : vector<1x32xf32>
    %108 = math.rsqrt %107 : vector<1x32xf32>
    %109 = arith.mulf %103, %108 : vector<1x32xf32>
    %c315 = arith.constant 315 : index
    %c0_42 = arith.constant 0 : index
    %110 = vector.load %arg1[%c315, %c0_42] : memref<322x64xf32, #tpu.memory_space<vmem>>, vector<1x32xf32>
    %111 = arith.mulf %95, %109 : vector<1x32xf32>
    %112 = arith.subf %110, %111 : vector<1x32xf32>
    %113 = vector.broadcast %109 : vector<1x32xf32> to vector<32x32xf32>
    %114 = arith.mulf %91, %113 : vector<32x32xf32>
    %115 = vector.broadcast %112 : vector<1x32xf32> to vector<32x32xf32>
    %116 = arith.addf %114, %115 : vector<32x32xf32>
    %cst_43 = arith.constant 0.000000e+00 : f32
    %117 = vector.broadcast %cst_43 : f32 to vector<32x32xf32>
    %118 = arith.maximumf %116, %117 : vector<32x32xf32>
    %119 = arith.addf %118, %45 : vector<32x32xf32>
    %cst_44 = arith.constant 0.000000e+00 : f32
    %120 = vector.broadcast %cst_44 : f32 to vector<32x32xf32>
    %121 = arith.maximumf %119, %120 : vector<32x32xf32>
    %c184 = arith.constant 184 : index
    %c0_45 = arith.constant 0 : index
    %122 = vector.load %arg1[%c184, %c0_45] : memref<322x64xf32, #tpu.memory_space<vmem>>, vector<32x64xf32>
    %cst_46 = arith.constant dense<0.000000e+00> : vector<32x64xf32>
    %123 = tpu.matmul %121, %122, %cst_46 {dimension_numbers = #tpu.dot_dimension_numbers<[1], [0], [0], [1], [0, 0, 1, 1], [], []>, precision = #tpu.contract_precision<fp32>} : vector<32x32xf32>, vector<32x64xf32>, vector<32x64xf32> -> vector<32x64xf32>
    %c4_i32_47 = arith.constant 4 : i32
    %124 = tpu.dynamic_rotate %121 by %c4_i32_47 dim 0 : vector<32x32xf32>, i32 -> vector<32x32xf32>
    %cst_48 = arith.constant 0.000000e+00 : f32
    %125 = vector.shape_cast %23 : vector<32x1xi1> to vector<32x1xi1>
    %126 = vector.broadcast %125 : vector<32x1xi1> to vector<32x32xi1>
    %127 = vector.broadcast %cst_48 : f32 to vector<32x32xf32>
    %128 = arith.select %126, %124, %127 : vector<32x32xi1>, vector<32x32xf32>
    %c120 = arith.constant 120 : index
    %c0_49 = arith.constant 0 : index
    %129 = vector.load %arg1[%c120, %c0_49] : memref<322x64xf32, #tpu.memory_space<vmem>>, vector<32x64xf32>
    %cst_50 = arith.constant dense<0.000000e+00> : vector<32x64xf32>
    %130 = tpu.matmul %128, %129, %cst_50 {dimension_numbers = #tpu.dot_dimension_numbers<[1], [0], [0], [1], [0, 0, 1, 1], [], []>, precision = #tpu.contract_precision<fp32>} : vector<32x32xf32>, vector<32x64xf32>, vector<32x64xf32> -> vector<32x64xf32>
    %131 = arith.addf %123, %130 : vector<32x64xf32>
    %c2_i32_51 = arith.constant 2 : i32
    %132 = tpu.dynamic_rotate %121 by %c2_i32_51 dim 0 : vector<32x32xf32>, i32 -> vector<32x32xf32>
    %cst_52 = arith.constant 0.000000e+00 : f32
    %133 = vector.shape_cast %21 : vector<32x1xi1> to vector<32x1xi1>
    %134 = vector.broadcast %133 : vector<32x1xi1> to vector<32x32xi1>
    %135 = vector.broadcast %cst_52 : f32 to vector<32x32xf32>
    %136 = arith.select %134, %132, %135 : vector<32x32xi1>, vector<32x32xf32>
    %c152 = arith.constant 152 : index
    %c0_53 = arith.constant 0 : index
    %137 = vector.load %arg1[%c152, %c0_53] : memref<322x64xf32, #tpu.memory_space<vmem>>, vector<32x64xf32>
    %cst_54 = arith.constant dense<0.000000e+00> : vector<32x64xf32>
    %138 = tpu.matmul %136, %137, %cst_54 {dimension_numbers = #tpu.dot_dimension_numbers<[1], [0], [0], [1], [0, 0, 1, 1], [], []>, precision = #tpu.contract_precision<fp32>} : vector<32x32xf32>, vector<32x64xf32>, vector<32x64xf32> -> vector<32x64xf32>
    %139 = arith.addf %131, %138 : vector<32x64xf32>
    %140 = vector.extract_strided_slice %139 {offsets = [0, 0], sizes = [32, 32], strides = [1, 1]} : vector<32x64xf32> to vector<32x32xf32>
    %cst_55 = arith.constant dense<0.000000e+00> : vector<32xf32>
    %141 = vector.multi_reduction <add>, %140, %cst_55 [0] : vector<32x32xf32> to vector<32xf32>
    %142 = vector.shape_cast %141 : vector<32xf32> to vector<1x32xf32>
    %cst_56 = arith.constant 3.125000e-02 : f32
    %143 = vector.broadcast %cst_56 : f32 to vector<1x32xf32>
    %144 = arith.mulf %142, %143 : vector<1x32xf32>
    %145 = arith.mulf %140, %140 : vector<32x32xf32>
    %cst_57 = arith.constant dense<0.000000e+00> : vector<32xf32>
    %146 = vector.multi_reduction <add>, %145, %cst_57 [0] : vector<32x32xf32> to vector<32xf32>
    %147 = vector.shape_cast %146 : vector<32xf32> to vector<1x32xf32>
    %cst_58 = arith.constant 3.125000e-02 : f32
    %148 = vector.broadcast %cst_58 : f32 to vector<1x32xf32>
    %149 = arith.mulf %147, %148 : vector<1x32xf32>
    %150 = arith.mulf %144, %144 : vector<1x32xf32>
    %151 = arith.subf %149, %150 : vector<1x32xf32>
    %c317 = arith.constant 317 : index
    %c0_59 = arith.constant 0 : index
    %152 = vector.load %arg1[%c317, %c0_59] : memref<322x64xf32, #tpu.memory_space<vmem>>, vector<1x32xf32>
    %cst_60 = arith.constant 0.000000e+00 : f32
    %153 = vector.broadcast %cst_60 : f32 to vector<1x32xf32>
    %154 = arith.maximumf %151, %153 : vector<1x32xf32>
    %cst_61 = arith.constant 9.99999974E-6 : f32
    %155 = vector.broadcast %cst_61 : f32 to vector<1x32xf32>
    %156 = arith.addf %154, %155 : vector<1x32xf32>
    %157 = math.rsqrt %156 : vector<1x32xf32>
    %158 = arith.mulf %152, %157 : vector<1x32xf32>
    %c318 = arith.constant 318 : index
    %c0_62 = arith.constant 0 : index
    %159 = vector.load %arg1[%c318, %c0_62] : memref<322x64xf32, #tpu.memory_space<vmem>>, vector<1x32xf32>
    %160 = arith.mulf %144, %158 : vector<1x32xf32>
    %161 = arith.subf %159, %160 : vector<1x32xf32>
    %162 = vector.broadcast %158 : vector<1x32xf32> to vector<32x32xf32>
    %163 = arith.mulf %140, %162 : vector<32x32xf32>
    %164 = vector.broadcast %161 : vector<1x32xf32> to vector<32x32xf32>
    %165 = arith.addf %163, %164 : vector<32x32xf32>
    %cst_63 = arith.constant 0.000000e+00 : f32
    %166 = vector.broadcast %cst_63 : f32 to vector<32x32xf32>
    %167 = arith.maximumf %165, %166 : vector<32x32xf32>
    %c280 = arith.constant 280 : index
    %c0_64 = arith.constant 0 : index
    %168 = vector.load %arg1[%c280, %c0_64] : memref<322x64xf32, #tpu.memory_space<vmem>>, vector<32x32xf32>
    %cst_65 = arith.constant dense<0.000000e+00> : vector<32x32xf32>
    %169 = tpu.matmul %167, %168, %cst_65 {dimension_numbers = #tpu.dot_dimension_numbers<[1], [0], [0], [1], [0, 0, 1, 1], [], []>, precision = #tpu.contract_precision<fp32>} : vector<32x32xf32>, vector<32x32xf32>, vector<32x32xf32> -> vector<32x32xf32>
    %c4_i32_66 = arith.constant 4 : i32
    %170 = tpu.dynamic_rotate %167 by %c4_i32_66 dim 0 : vector<32x32xf32>, i32 -> vector<32x32xf32>
    %cst_67 = arith.constant 0.000000e+00 : f32
    %171 = vector.shape_cast %23 : vector<32x1xi1> to vector<32x1xi1>
    %172 = vector.broadcast %171 : vector<32x1xi1> to vector<32x32xi1>
    %173 = vector.broadcast %cst_67 : f32 to vector<32x32xf32>
    %174 = arith.select %172, %170, %173 : vector<32x32xi1>, vector<32x32xf32>
    %c216 = arith.constant 216 : index
    %c0_68 = arith.constant 0 : index
    %175 = vector.load %arg1[%c216, %c0_68] : memref<322x64xf32, #tpu.memory_space<vmem>>, vector<32x32xf32>
    %cst_69 = arith.constant dense<0.000000e+00> : vector<32x32xf32>
    %176 = tpu.matmul %174, %175, %cst_69 {dimension_numbers = #tpu.dot_dimension_numbers<[1], [0], [0], [1], [0, 0, 1, 1], [], []>, precision = #tpu.contract_precision<fp32>} : vector<32x32xf32>, vector<32x32xf32>, vector<32x32xf32> -> vector<32x32xf32>
    %177 = arith.addf %169, %176 : vector<32x32xf32>
    %c2_i32_70 = arith.constant 2 : i32
    %178 = tpu.dynamic_rotate %167 by %c2_i32_70 dim 0 : vector<32x32xf32>, i32 -> vector<32x32xf32>
    %cst_71 = arith.constant 0.000000e+00 : f32
    %179 = vector.shape_cast %21 : vector<32x1xi1> to vector<32x1xi1>
    %180 = vector.broadcast %179 : vector<32x1xi1> to vector<32x32xi1>
    %181 = vector.broadcast %cst_71 : f32 to vector<32x32xf32>
    %182 = arith.select %180, %178, %181 : vector<32x32xi1>, vector<32x32xf32>
    %c248 = arith.constant 248 : index
    %c0_72 = arith.constant 0 : index
    %183 = vector.load %arg1[%c248, %c0_72] : memref<322x64xf32, #tpu.memory_space<vmem>>, vector<32x32xf32>
    %cst_73 = arith.constant dense<0.000000e+00> : vector<32x32xf32>
    %184 = tpu.matmul %182, %183, %cst_73 {dimension_numbers = #tpu.dot_dimension_numbers<[1], [0], [0], [1], [0, 0, 1, 1], [], []>, precision = #tpu.contract_precision<fp32>} : vector<32x32xf32>, vector<32x32xf32>, vector<32x32xf32> -> vector<32x32xf32>
    %185 = arith.addf %177, %184 : vector<32x32xf32>
    %cst_74 = arith.constant dense<0.000000e+00> : vector<32xf32>
    %186 = vector.multi_reduction <add>, %185, %cst_74 [0] : vector<32x32xf32> to vector<32xf32>
    %187 = vector.shape_cast %186 : vector<32xf32> to vector<1x32xf32>
    %cst_75 = arith.constant 3.125000e-02 : f32
    %188 = vector.broadcast %cst_75 : f32 to vector<1x32xf32>
    %189 = arith.mulf %187, %188 : vector<1x32xf32>
    %190 = arith.mulf %185, %185 : vector<32x32xf32>
    %cst_76 = arith.constant dense<0.000000e+00> : vector<32xf32>
    %191 = vector.multi_reduction <add>, %190, %cst_76 [0] : vector<32x32xf32> to vector<32xf32>
    %192 = vector.shape_cast %191 : vector<32xf32> to vector<1x32xf32>
    %cst_77 = arith.constant 3.125000e-02 : f32
    %193 = vector.broadcast %cst_77 : f32 to vector<1x32xf32>
    %194 = arith.mulf %192, %193 : vector<1x32xf32>
    %195 = arith.mulf %189, %189 : vector<1x32xf32>
    %196 = arith.subf %194, %195 : vector<1x32xf32>
    %c319 = arith.constant 319 : index
    %c0_78 = arith.constant 0 : index
    %197 = vector.load %arg1[%c319, %c0_78] : memref<322x64xf32, #tpu.memory_space<vmem>>, vector<1x32xf32>
    %cst_79 = arith.constant 0.000000e+00 : f32
    %198 = vector.broadcast %cst_79 : f32 to vector<1x32xf32>
    %199 = arith.maximumf %196, %198 : vector<1x32xf32>
    %cst_80 = arith.constant 9.99999974E-6 : f32
    %200 = vector.broadcast %cst_80 : f32 to vector<1x32xf32>
    %201 = arith.addf %199, %200 : vector<1x32xf32>
    %202 = math.rsqrt %201 : vector<1x32xf32>
    %203 = arith.mulf %197, %202 : vector<1x32xf32>
    %c320 = arith.constant 320 : index
    %c0_81 = arith.constant 0 : index
    %204 = vector.load %arg1[%c320, %c0_81] : memref<322x64xf32, #tpu.memory_space<vmem>>, vector<1x32xf32>
    %205 = arith.mulf %189, %203 : vector<1x32xf32>
    %206 = arith.subf %204, %205 : vector<1x32xf32>
    %207 = vector.extract_strided_slice %185 {offsets = [15, 0], sizes = [1, 32], strides = [1, 1]} : vector<32x32xf32> to vector<1x32xf32>
    %208 = vector.extract_strided_slice %185 {offsets = [31, 0], sizes = [1, 32], strides = [1, 1]} : vector<32x32xf32> to vector<1x32xf32>
    %209 = tpu.concatenate %207, %208 in 0 : vector<1x32xf32>, vector<1x32xf32> -> vector<2x32xf32>
    %210 = vector.broadcast %203 : vector<1x32xf32> to vector<2x32xf32>
    %211 = arith.mulf %209, %210 : vector<2x32xf32>
    %212 = vector.broadcast %206 : vector<1x32xf32> to vector<2x32xf32>
    %213 = arith.addf %211, %212 : vector<2x32xf32>
    %cst_82 = arith.constant 0.000000e+00 : f32
    %214 = vector.broadcast %cst_82 : f32 to vector<2x32xf32>
    %215 = arith.maximumf %213, %214 : vector<2x32xf32>
    %216 = vector.extract_strided_slice %139 {offsets = [15, 0], sizes = [1, 64], strides = [1, 1]} : vector<32x64xf32> to vector<1x64xf32>
    %217 = vector.extract_strided_slice %139 {offsets = [31, 0], sizes = [1, 64], strides = [1, 1]} : vector<32x64xf32> to vector<1x64xf32>
    %218 = tpu.concatenate %216, %217 in 0 : vector<1x64xf32>, vector<1x64xf32> -> vector<2x64xf32>
    %219 = vector.extract_strided_slice %218 {offsets = [0, 32], sizes = [2, 32], strides = [1, 1]} : vector<2x64xf32> to vector<2x32xf32>
    %c321 = arith.constant 321 : index
    %c0_83 = arith.constant 0 : index
    %220 = vector.load %arg1[%c321, %c0_83] : memref<322x64xf32, #tpu.memory_space<vmem>>, vector<1x32xf32>
    %221 = vector.broadcast %220 : vector<1x32xf32> to vector<2x32xf32>
    %222 = arith.addf %219, %221 : vector<2x32xf32>
    %223 = arith.addf %215, %222 : vector<2x32xf32>
    %cst_84 = arith.constant 0.000000e+00 : f32
    %224 = vector.broadcast %cst_84 : f32 to vector<2x32xf32>
    %225 = arith.maximumf %223, %224 : vector<2x32xf32>
    %c0_85 = arith.constant 0 : index
    %c0_86 = arith.constant 0 : index
    %226 = vector.load %arg2[%c0_85, %c0_86] : memref<2x32xf32, #tpu.memory_space<vmem>>, vector<2x32xf32>
    tpu.vector_store %arg2[%c0_85, %c0_86], %225 {strides = array<i32>} : memref<2x32xf32, #tpu.memory_space<vmem>>, vector<2x32xf32>,
    return
  }
}

</mosaic_0001>

<bundles_post_ra>
// kernel: forward.1
= control target key start
LH: loop header
LB: loop body
LE: loop exit
PB: predicated region body
PF: predicated region fallthrough
CT: control target
= control target key end

     0   :  { %vm117_vm0 = vcmask 1043456   ;;  %v16_v3 = vlaneseq  ;;  %s5168_s0 = inlined_call_operand.vmem [shape: f32[32,4], index: 0, kind: input, shape index: {}]   ;;  %s5169_s1 = inlined_call_operand.vmem [shape: f32[322,64], index: 1, kind: input, shape index: {}]   ;;  %s5170_s2 = inlined_call_operand.hbm [shape: f32[2,32], index: 2, kind: output, shape index: {}]  }
   0x1   :  { %v103_v0 = vld [vmem:[%s5169_s1] sm:$0xf]  ;;  %v4033_v2 = vld [vmem:[%s5168_s0 + $0x18] sm:$0xff]  ;;  %v4041_v7 = vld [vmem:[%s5168_s0 + $0x8] sm:$0xff] }
   0x2   :  { %v4028_v1 = vld [vmem:[%s5168_s0] sm:$0xff]  ;;  %v119_v4 = vsel %vm117_vm0, %v103_v0, 0  ;;  %v85_v6 = vrot.slane %v4033_v2, 6  ;;  %v4046_v8 = vld [vmem:[%s5168_s0 + $0x10] sm:$0xff]  ;;  %v4048_v10 = vshrl.u32 %v16_v3, 7  ;;  %v83_v11 = vrot.slane %v4041_v7, 6 }
   0x3   :  { %v82_v5 = vrot.slane %v4028_v1, 6  ;;  %v136_v9 = vand.u32 4294901760, %v119_v4  ;;  %v84_v12 = vrot.slane %v4046_v8, 6 }
   0x4   :  { %5183 = vst [vmem:[#allocation5_spill] sm:$0xff] %v4048_v10 }
   0x5   :  { %7 = vsyncpa [#allocation3], 0  ;;  %v187_v13 = vsub.f32 %v119_v4, %v136_v9  ;;  %v4053_v14 = vand.u32 15, %v4048_v10  ;;  %vm86_vm1 = vcmp.lt.s32.totalorder %v4048_v10, 2  ;;  %264 = vmatpush.msra.mxu3 %v136_v9  ;;  %137 = vmatpush.msra.mxu0 %v136_v9  ;;  %v19_v15 = vadd.s32 16, %v4048_v10  ;;  %s4004_s24 = smov 32  }
   0x6   :  { %v81_v16 = vld [vmem:[%s5169_s1 + $0x10] sm:$0xf]  ;;  %v90_v17 = vsel %vm86_vm1, %v85_v6, %v82_v5  ;;  %vm104_vm2 = vcmask 31744   ;;  %v89_v18 = vsel %vm86_vm1, %v82_v5, %v83_v11  ;;  %v88_v19 = vsel %vm86_vm1, %v83_v11, %v84_v12  ;;  %s4005_s25 = smov 96   ;;  %s4006_s3 = smov [#allocation2]  }
   0x7   :  { %5184 = vst [vmem:[#allocation6_spill] sm:$0xff] %v4053_v14  ;;  %226 = vmatpush.msra.mxu2 %v187_v13  ;;  %vm73_vm3 = vcmp.ge.s32.totalorder %v4053_v14, 2  ;;  %v188_v20 = vand.u32 4294901760, %v187_v13  ;;  %v109_v21 = vsel %vm104_vm2, %v89_v18, 0  ;;  %v4068_v22 = vand.u32 15, %v19_v15  ;;  %s3954_s4 = sshll.u32 %s4006_s3, 4  ;;  %s3955_s4 = int_to_ptr.vmem [resolvable:$true] %s3954_s4 }
   0x8   :  { %v99_v23 = vsel %vm73_vm3, %v90_v17, 0.0  ;;  %v4072_v24 = vand.u32 4294901760, %v109_v21  ;;  %v373_v25 = vsel %vm117_vm0, %v81_v16, 0  ;;  %v87_v43 = vsel %vm86_vm1, %v84_v12, %v85_v6  ;;  %v635_v17 = vld [vmem:[%s5169_s1 + $0x8] sm:$0xf]  ;;  %s3956_s7 = sshll.u32 %s5170_s2, 4  ;;  %s3957_s7 = int_to_ptr.hbm [resolvable:$true] %s3956_s7 }
   0x9   :  { %5185 = vst [vmem:[#allocation7_spill] sm:$0xff] %v4068_v22  ;;  %v106_v26 = vsel %vm104_vm2, %v99_v23, 0  ;;  %v189_v27 = vsub.f32 %v187_v13, %v188_v20  ;;  %308 = vmatpush.msrb.mxu0 %v188_v20  ;;  %vm75_vm4 = vcmp.ge.s32.totalorder %v4068_v22, 2  ;;  %v390_v30 = vand.u32 4294901760, %v373_v25 }
   0xa   :  { %v4077_v28 = vand.u32 4294901760, %v106_v26  ;;  %v101_v29 = vsel %vm75_vm4, %v88_v19, 0.0  ;;  %v147_v33 = vsub.f32 %v109_v21, %v4072_v24  ;;  %v115_v47 = vsel %vm104_vm2, %v87_v43, 0 }
   0xb   :  { %v190_v31 = vand.u32 4294901760, %v189_v27  ;;  %391 = vmatpush.msrb.mxu2 %v390_v30  ;;  %v441_v34 = vsub.f32 %v373_v25, %v390_v30  ;;  %v112_v35 = vsel %vm104_vm2, %v101_v29, 0  ;;  %v361_v48 = vsel %vm104_vm2, %v4028_v1, 0 }
   0xc   :  { %v139_v32 = vsub.f32 %v106_v26, %v4077_v28  ;;  %v148_v39 = vand.u32 4294901760, %v147_v33  ;;  %v4085_v40 = vand.u32 4294901760, %v112_v35  ;;  %v4094_v51 = vand.u32 4294901760, %v115_v47 }
   0xd   :  { %191 = vmatpush.msra.mxu1 %v190_v31  ;;  %v442_v37 = vand.u32 4294901760, %v441_v34  ;;  %v4096_v52 = vand.u32 4294901760, %v361_v48  ;;  %v364_v56 = vsel %vm104_vm2, %v4041_v7, 0  ;;  %v367_v0 = vsel %vm104_vm2, %v4046_v8, 0 }
   0xe   :  { %229 = vmatmul.f32.vlgmr.msra.gmra.mxu2 %v139_v32  ;;  %v140_v36 = vand.u32 4294901760, %v139_v32  ;;  %193 = vmatmul.f32.vlgmr.msra.gmra.mxu1 %v4077_v28  ;;  %v149_v45 = vsub.f32 %v147_v33, %v148_v39  ;;  %v155_v46 = vsub.f32 %v112_v35, %v4085_v40  ;;  %v163_v54 = vsub.f32 %v115_v47, %v4094_v51 }
   0xf   :  { %342 = vmatpush.msrb.mxu1 %v136_v9  ;;  %v443_v41 = vsub.f32 %v441_v34, %v442_v37  ;;  %562 = vmatpush.msra.mxu2 %v442_v37  ;;  %v4101_v55 = vsub.f32 %v361_v48, %v4096_v52  ;;  %v4106_v60 = vand.u32 4294901760, %v364_v56  ;;  %v408_v6 = vand.u32 4294901760, %v367_v0 }
  0x10   :  { %268 = vmatmul.f32.vlgmr.msra.gmra.mxu3 %v140_v36  ;;  %v141_v38 = vsub.f32 %v139_v32, %v140_v36  ;;  %v150_v49 = vand.u32 4294901760, %v149_v45  ;;  %v156_v50 = vand.u32 4294901760, %v155_v46  ;;  %v164_v58 = vand.u32 4294901760, %v163_v54 }
  0x11   :  { %518 = vmatpush.msra.mxu1 %v390_v30  ;;  %v444_v44 = vand.u32 4294901760, %v443_v41  ;;  %v394_v59 = vand.u32 4294901760, %v4101_v55  ;;  %v401_v63 = vsub.f32 %v364_v56, %v4106_v60  ;;  %v409_v11 = vsub.f32 %v367_v0, %v408_v6 }
  0x12   :  { %v142_v42 = vand.u32 4294901760, %v141_v38  ;;  %v157_v53 = vsub.f32 %v155_v46, %v156_v50  ;;  %v165_v61 = vsub.f32 %v163_v54, %v164_v58  ;;  %v370_v12 = vsel %vm104_vm2, %v4033_v2, 0 }
  0x13   :  { %445 = vmatpush.msrb.mxu3 %v444_v44  ;;  %v395_v62 = vsub.f32 %v4101_v55, %v394_v59  ;;  %v402_v5 = vand.u32 4294901760, %v401_v63  ;;  %v410_v15 = vand.u32 4294901760, %v409_v11  ;;  %v4117_v16 = vand.u32 4294901760, %v370_v12 }
  0x14   :  { %143 = vmatmul.f32.vlgmr.msra.gmra.mxu0 %v142_v42  ;;  %v158_v57 = vand.u32 4294901760, %v157_v53  ;;  %v166_v3 = vand.u32 4294901760, %v165_v61  ;;  %v649_v18 = vsel %vm117_vm0, %v635_v17, 0  ;;  %v617_v32 = vrot.slane %v4033_v2, 7 }
  0x15   :  { %480 = vmatpush.msra.mxu0 %v441_v34  ;;  %596 = vmatpush.msra.mxu3 %v390_v30  ;;  %v396_v4 = vand.u32 4294901760, %v395_v62  ;;  %v403_v9 = vsub.f32 %v401_v63, %v402_v5  ;;  %v411_v19 = vsub.f32 %v409_v11, %v410_v15  ;;  %v417_v20 = vsub.f32 %v370_v12, %v4117_v16 }
  0x16   :  { %234 = vmatmul.f32.gmra.mxu2 %v147_v33  ;;  %197 = vmatmul.f32.gmra.mxu1 %v4072_v24  ;;  %v666_v21 = vand.u32 4294901760, %v649_v18  ;;  %vm618_vm5 = vcmp.lt.s32.totalorder %v4048_v10, 1  ;;  %vm69_vm6 = vcmp.ge.s32.totalorder %v4053_v14, 1  ;;  %v615_v34 = vrot.slane %v4041_v7, 7 }
  0x17   :  { %v404_v13 = vand.u32 4294901760, %v403_v9  ;;  %v412_v25 = vand.u32 4294901760, %v411_v19  ;;  %v418_v26 = vand.u32 4294901760, %v417_v20  ;;  %v616_v37 = vrot.slane %v4046_v8, 7 }
  0x18   :  { %274 = vmatmul.f32.gmra.mxu3 %v148_v39  ;;  %v717_v23 = vsub.f32 %v649_v18, %v666_v21  ;;  %vm71_vm7 = vcmp.ge.s32.totalorder %v4068_v22, 1  ;;  %vm904_vm8 = vcmask 261120  }
  0x19   :  { %v419_v29 = vsub.f32 %v417_v20, %v418_v26  ;;  %v619_v48 = vsel %vm618_vm5, %v616_v37, %v617_v32 }
  0x1a   :  { %v718_v27 = vand.u32 4294901760, %v717_v23 }
  0x1b   :  { %v420_v31 = vand.u32 4294901760, %v419_v29 }
  0x1c   :  { %151 = vmatmul.f32.gmra.mxu0 %v150_v49 }
  0x1e   :  { %239 = vmatmul.f32.gmra.mxu2 %v155_v46  ;;  %201 = vmatmul.f32.gmra.mxu1 %v4085_v40 }
  0x20   :  { %280 = vmatmul.f32.gmra.mxu3 %v156_v50 }
  0x24   :  { %159 = vmatmul.f32.gmra.mxu0 %v158_v57 }
  0x26   :  { %244 = vmatmul.f32.gmra.mxu2 %v163_v54  ;;  %205 = vmatmul.f32.gmra.mxu1 %v4094_v51 }
  0x28   :  { %286 = vmatmul.f32.gmra.mxu3 %v164_v58 }
  0x2c   :  { %167 = vmatmul.f32.gmra.mxu0 %v166_v3 }
  0x2e   :  { %397 = vmatmul.f32.vlgmr.msrb.gmra.mxu2 %v396_v4  ;;  %344 = vmatmul.f32.vlgmr.msrb.gmra.mxu1 %v4077_v28 }
  0x2f   :  { %756 = vmatpush.msrb.mxu2 %v717_v23 }
  0x30   :  { %447 = vmatmul.f32.vlgmr.msrb.gmra.mxu3 %v4096_v52 }
  0x31   :  { %794 = vmatpush.msrb.mxu3 %v666_v21 }
  0x34   :  { %310 = vmatmul.f32.vlgmr.msrb.gmra.mxu0 %v4077_v28  ;;  %v719_v28 = vsub.f32 %v717_v23, %v718_v27 }
  0x35   :  { %667 = vmatpush.msrb.mxu0 %v666_v21 }
  0x36   :  { %405 = vmatmul.f32.gmra.mxu2 %v404_v13  ;;  %348 = vmatmul.f32.gmra.mxu1 %v4072_v24  ;;  %v720_v30 = vand.u32 4294901760, %v719_v28 }
  0x38   :  { %451 = vmatmul.f32.gmra.mxu3 %v4106_v60  ;;  %721 = vmatpush.msrb.mxu1 %v720_v30 }
  0x3c   :  { %314 = vmatmul.f32.gmra.mxu0 %v4072_v24  ;;  %v614_v24 = vrot.slane %v4028_v1, 7 }
  0x3e   :  { %413 = vmatmul.f32.gmra.mxu2 %v412_v25  ;;  %352 = vmatmul.f32.gmra.mxu1 %v4085_v40  ;;  %v622_v33 = vsel %vm618_vm5, %v617_v32, %v614_v24  ;;  %v621_v36 = vsel %vm618_vm5, %v614_v24, %v615_v34 }
  0x3f   :  { %v631_v1 = vsel %vm69_vm6, %v622_v33, 0.0  ;;  %v640_v39 = vsel %vm104_vm2, %v621_v36, 0 }
  0x40   :  { %455 = vmatmul.f32.gmra.mxu3 %v408_v6  ;;  %v637_v2 = vsel %vm104_vm2, %v631_v1, 0  ;;  %v676_v41 = vand.u32 4294901760, %v640_v39 }
  0x41   :  { %v668_v35 = vand.u32 4294901760, %v637_v2 }
  0x42   :  { %v677_v43 = vsub.f32 %v640_v39, %v676_v41 }
  0x43   :  { %v669_v38 = vsub.f32 %v637_v2, %v668_v35 }
  0x44   :  { %318 = vmatmul.f32.gmra.mxu0 %v4085_v40  ;;  %v620_v40 = vsel %vm618_vm5, %v615_v34, %v616_v37  ;;  %v678_v46 = vand.u32 4294901760, %v677_v43 }
  0x45   :  { %v670_v7 = vand.u32 4294901760, %v669_v38  ;;  %v633_v42 = vsel %vm71_vm7, %v620_v40, 0.0 }
  0x46   :  { %421 = vmatmul.f32.gmra.mxu2 %v420_v31  ;;  %356 = vmatmul.f32.gmra.mxu1 %v4094_v51  ;;  %v643_v44 = vsel %vm104_vm2, %v633_v42, 0  ;;  %v679_v49 = vsub.f32 %v677_v43, %v678_v46 }
  0x47   :  { %v671_v8 = vsub.f32 %v669_v38, %v670_v7  ;;  %v684_v47 = vand.u32 4294901760, %v643_v44 }
  0x48   :  { %459 = vmatmul.f32.gmra.mxu3 %v4117_v16 }
  0x49   :  { %v672_v45 = vand.u32 4294901760, %v671_v8  ;;  %v685_v50 = vsub.f32 %v643_v44, %v684_v47 }
  0x4b   :  { %v686_v53 = vand.u32 4294901760, %v685_v50 }
  0x4c   :  { %322 = vmatmul.f32.gmra.mxu0 %v4094_v51  ;;  %v646_v51 = vsel %vm104_vm2, %v619_v48, 0 }
  0x4d   :  { %v692_v54 = vand.u32 4294901760, %v646_v51 }
  0x4e   :  { %564 = vmatmul.f32.vlgmr.msra.gmra.mxu2 %v4096_v52  ;;  %522 = vmatmul.f32.vlgmr.msra.gmra.mxu1 %v394_v59  ;;  %v3968_v59 = vld [vmem:[%s5169_s1 + $0x13c] ss:$0 sm:$0xff] }
  0x4f   :  { %872 = vmatpush.msra.mxu1 %v666_v21  ;;  %v693_v56 = vsub.f32 %v646_v51, %v692_v54  ;;  %897 = vrot.lane.b32.xlu0 %v3968_v59, %s4004_s24 }
  0x50   :  { %598 = vmatmul.f32.vlgmr.msra.gmra.mxu3 %v4096_v52  ;;  %v680_v52 = vand.u32 4294901760, %v679_v49 }
  0x51   :  { %v694_v58 = vand.u32 4294901760, %v693_v56 }
  0x54   :  { %483 = vmatmul.f32.vlgmr.msra.gmra.mxu0 %v4101_v55  ;;  %v687_v55 = vsub.f32 %v685_v50, %v686_v53 }
  0x55   :  { %838 = vmatpush.msra.mxu0 %v718_v27 }
  0x56   :  { %568 = vmatmul.f32.gmra.mxu2 %v4106_v60  ;;  %528 = vmatmul.f32.gmra.mxu1 %v402_v5  ;;  %v688_v57 = vand.u32 4294901760, %v687_v55 }
  0x58   :  { %602 = vmatmul.f32.gmra.mxu3 %v4106_v60  ;;  %v695_v60 = vsub.f32 %v693_v56, %v694_v58 }
  0x5a   :  { %v696_v61 = vand.u32 4294901760, %v695_v60 }
  0x5c   :  { %488 = vmatmul.f32.gmra.mxu0 %v401_v63 }
  0x5e   :  { %572 = vmatmul.f32.gmra.mxu2 %v408_v6  ;;  %534 = vmatmul.f32.gmra.mxu1 %v410_v15 }
  0x60   :  { %606 = vmatmul.f32.gmra.mxu3 %v408_v6 }
  0x64   :  { %493 = vmatmul.f32.gmra.mxu0 %v409_v11 }
  0x66   :  { %576 = vmatmul.f32.gmra.mxu2 %v4117_v16  ;;  %540 = vmatmul.f32.gmra.mxu1 %v418_v26 }
  0x68   :  { %610 = vmatmul.f32.gmra.mxu3 %v4117_v16 }
  0x6c   :  { %498 = vmatmul.f32.gmra.mxu0 %v417_v20 }
  0x6e   :  { %759 = vmatmul.f32.vlgmr.msrb.gmra.mxu2 %v669_v38  ;;  %723 = vmatmul.f32.vlgmr.msrb.gmra.mxu1 %v668_v35 }
  0x70   :  { %798 = vmatmul.f32.vlgmr.msrb.gmra.mxu3 %v670_v7 }
  0x74   :  { %673 = vmatmul.f32.vlgmr.msrb.gmra.mxu0 %v672_v45 }
  0x76   :  { %764 = vmatmul.f32.gmra.mxu2 %v677_v43  ;;  %727 = vmatmul.f32.gmra.mxu1 %v676_v41 }
  0x78   :  { %804 = vmatmul.f32.gmra.mxu3 %v678_v46 }
  0x7c   :  { %681 = vmatmul.f32.gmra.mxu0 %v680_v52 }
  0x7e   :  { %769 = vmatmul.f32.gmra.mxu2 %v685_v50  ;;  %731 = vmatmul.f32.gmra.mxu1 %v684_v47 }
  0x80   :  { %810 = vmatmul.f32.gmra.mxu3 %v686_v53 }
  0x84   :  { %689 = vmatmul.f32.gmra.mxu0 %v688_v57 }
  0x86   :  { %774 = vmatmul.f32.gmra.mxu2 %v693_v56  ;;  %735 = vmatmul.f32.gmra.mxu1 %v692_v54 }
  0x88   :  { %816 = vmatmul.f32.gmra.mxu3 %v694_v58 }
  0x8b   :  { %v194_v62 = vpop.f32.mrf.mxu1 }
  0x8c   :  { %697 = vmatmul.f32.gmra.mxu0 %v696_v61 }
  0x8e   :  { %874 = vmatmul.f32.vlgmr.msra.gmra.mxu1 %v668_v35 }
  0x91   :  { %v144_v63 = vpop.f32.mrf.mxu0  ;;  %v230_v0 = vpop.f32.mrf.mxu2 }
  0x93   :  { %v269_v3 = vpop.f32.mrf.mxu3  ;;  %v198_v4 = vpop.f32.mrf.mxu1 }
  0x94   :  { %840 = vmatmul.f32.vlgmr.msra.gmra.mxu0 %v668_v35 }
  0x96   :  { %878 = vmatmul.f32.gmra.mxu1 %v676_v41 }
  0x99   :  { %v152_v5 = vpop.f32.mrf.mxu0  ;;  %v235_v6 = vpop.f32.mrf.mxu2 }
  0x9a   :  { %v199_v58 = vadd.f32 %v198_v4, %v152_v5 }
  0x9b   :  { %v4167_v9 = vpop.f32.mrf.mxu3  ;;  %v202_v11 = vpop.f32.mrf.mxu1 }
  0x9c   :  { %844 = vmatmul.f32.gmra.mxu0 %v676_v41  ;;  %v236_v22 = vadd.f32 %v235_v6, %v199_v58 }
  0x9e   :  { %882 = vmatmul.f32.gmra.mxu1 %v684_v47 }
  0xa1   :  { %v160_v12 = vpop.f32.mrf.mxu0  ;;  %v240_v13 = vpop.f32.mrf.mxu2 }
  0xa2   :  { %v203_v60 = vadd.f32 %v202_v11, %v160_v12 }
  0xa3   :  { %v281_v15 = vpop.f32.mrf.mxu3  ;;  %v206_v16 = vpop.f32.mrf.mxu1 }
  0xa4   :  { %848 = vmatmul.f32.gmra.mxu0 %v684_v47  ;;  %v195_v47 = vadd.f32 %v194_v62, %v144_v63  ;;  %v241_v10 = vadd.f32 %v240_v13, %v203_v60 }
  0xa6   :  { %886 = vmatmul.f32.gmra.mxu1 %v692_v54  ;;  %v231_v51 = vadd.f32 %v230_v0, %v195_v47 }
  0xa8   :  { %v270_v52 = vadd.f32 %v269_v3, %v231_v51  ;;  %v282_v51 = vadd.f32 %v281_v15, %v241_v10 }
  0xa9   :  { %v168_v17 = vpop.f32.mrf.mxu0  ;;  %v4169_v18 = vpop.f32.mrf.mxu2 }
  0xaa   :  { %v207_v3 = vadd.f32 %v206_v16, %v168_v17 }
  0xab   :  { %v345_v19 = vpop.f32.mrf.mxu1  ;;  %v4171_v20 = vpop.f32.mrf.mxu3 }
  0xac   :  { %852 = vmatmul.f32.gmra.mxu0 %v692_v54  ;;  %v246_v4 = vadd.f32 %v4169_v18, %v207_v3 }
  0xae   :  { %v288_v13 = vadd.f32 %v4171_v20, %v246_v4 }
  0xb1   :  { %v311_v21 = vpop.f32.mrf.mxu0  ;;  %v398_v23 = vpop.f32.mrf.mxu2 }
  0xb2   :  { %v312_v55 = vadd.f32 %v311_v21, %v270_v52 }
  0xb3   :  { %v349_v25 = vpop.f32.mrf.mxu1  ;;  %v448_v26 = vpop.f32.mrf.mxu3 }
  0xb4   :  { %v346_v59 = vadd.f32 %v345_v19, %v312_v55 }
  0xb6   :  { %v399_v14 = vadd.f32 %v398_v23, %v346_v59 }
  0xb8   :  { %v449_v0 = vadd.f32 %v448_v26, %v399_v14 }
  0xb9   :  { %v315_v27 = vpop.f32.mrf.mxu0  ;;  %v406_v29 = vpop.f32.mrf.mxu2 }
  0xbb   :  { %v353_v28 = vpop.f32.mrf.mxu1  ;;  %v4173_v30 = vpop.f32.mrf.mxu3 }
  0xc1   :  { %v319_v31 = vpop.f32.mrf.mxu0  ;;  %v4177_v32 = vpop.f32.mrf.mxu2 }
  0xc3   :  { %v4175_v24 = vpop.f32.mrf.mxu1  ;;  %v4179_v1 = vpop.f32.mrf.mxu3 }
  0xc9   :  { %v323_v33 = vpop.f32.mrf.mxu0  ;;  %v4181_v34 = vpop.f32.mrf.mxu2 }
  0xca   :  { %v324_v16 = vadd.f32 %v323_v33, %v288_v13 }
  0xcb   :  { %v523_v2 = vpop.f32.mrf.mxu1  ;;  %v4185_v37 = vpop.f32.mrf.mxu3 }
  0xd1   :  { %v484_v35 = vpop.f32.mrf.mxu0  ;;  %v565_v39 = vpop.f32.mrf.mxu2 }
  0xd2   :  { %v485_v21 = vadd.f32 %v484_v35, %v449_v0  ;;  %v4215_v35 = vpop.permute.xlu0 %897 }
  0xd3   :  { %v4183_v36 = vpop.f32.mrf.mxu1  ;;  %v599_v7 = vpop.f32.mrf.mxu3 }
  0xd4   :  { %v524_v6 = vadd.f32 %v523_v2, %v485_v21  ;;  %v358_v2 = vadd.f32 %v4175_v24, %v324_v16 }
  0xd6   :  { %v566_v14 = vadd.f32 %v565_v39, %v524_v6 }
  0xd9   :  { %v4187_v38 = vpop.f32.mrf.mxu0  ;;  %v4195_v8 = vpop.f32.mrf.mxu2 }
  0xdb   :  { %v4189_v40 = vpop.f32.mrf.mxu1  ;;  %v4197_v43 = vpop.f32.mrf.mxu3 }
  0xe1   :  { %v4191_v41 = vpop.f32.mrf.mxu0  ;;  %v4201_v46 = vpop.f32.mrf.mxu2 }
  0xe3   :  { %v4193_v42 = vpop.f32.mrf.mxu1  ;;  %v4203_v49 = vpop.f32.mrf.mxu3 }
  0xe4   :  { %5186 = vst [vmem:[#allocation8_spill] sm:$0xff] %v4193_v42 }
  0xe5   :  { %5187 = vst [vmem:[#allocation9_spill] sm:$0xff] %v4203_v49  ;;  %v276_v49 = vadd.f32 %v4167_v9, %v236_v22 }
  0xe9   :  { %v4199_v44 = vpop.f32.mrf.mxu0  ;;  %v4205_v53 = vpop.f32.mrf.mxu2 }
  0xea   :  { %5188 = vst [vmem:[#allocation10_spill] sm:$0xff] %v4205_v53  ;;  %v316_v53 = vadd.f32 %v315_v27, %v276_v49 }
  0xeb   :  { %v724_v45 = vpop.f32.mrf.mxu1  ;;  %v4207_v57 = vpop.f32.mrf.mxu3 }
  0xec   :  { %5189 = vst [vmem:[#allocation11_spill] sm:$0xff] %v4207_v57  ;;  %v320_v57 = vadd.f32 %v319_v31, %v282_v51  ;;  %v350_v11 = vadd.f32 %v349_v25, %v316_v53  ;;  %v600_v31 = vadd.f32 %v599_v7, %v566_v14  ;;  %v423_v7 = vadd.f32 %v4181_v34, %v358_v2 }
  0xee   :  { %v354_v23 = vadd.f32 %v353_v28, %v320_v57  ;;  %v407_v22 = vadd.f32 %v406_v29, %v350_v11 }
  0xf0   :  { %v415_v17 = vadd.f32 %v4177_v32, %v354_v23  ;;  %v453_v18 = vadd.f32 %v4173_v30, %v407_v22 }
  0xf1   :  { %v674_v48 = vpop.f32.mrf.mxu0  ;;  %v760_v62 = vpop.f32.mrf.mxu2 }
  0xf2   :  { %v725_v52 = vadd.f32 %v724_v45, %v674_v48  ;;  %v457_v20 = vadd.f32 %v4179_v1, %v415_v17  ;;  %v490_v29 = vadd.f32 %v4187_v38, %v453_v18 }
  0xf3   :  { %v728_v50 = vpop.f32.mrf.mxu1  ;;  %v799_v47 = vpop.f32.mrf.mxu3  ;;  %v5193_v13 = vld [vmem:[#allocation11_spill] sm:$0xff] }
  0xf4   :  { %v761_v12 = vadd.f32 %v760_v62, %v725_v52  ;;  %v495_v32 = vadd.f32 %v4191_v41, %v457_v20  ;;  %v530_v49 = vadd.f32 %v4183_v36, %v490_v29  ;;  %v461_v41 = vadd.f32 %v4185_v37, %v423_v7 }
  0xf6   :  { %v800_v9 = vadd.f32 %v799_v47, %v761_v12  ;;  %v536_v38 = vadd.f32 %v4189_v40, %v495_v32  ;;  %v570_v55 = vadd.f32 %v4195_v8, %v530_v49  ;;  %v5190_v40 = vld [vmem:[#allocation8_spill] sm:$0xff]  ;;  %v5191_v47 = vld [vmem:[#allocation9_spill] sm:$0xff] }
  0xf8   :  { %v574_v34 = vadd.f32 %v4201_v46, %v536_v38  ;;  %v604_v62 = vadd.f32 %v4197_v43, %v570_v55  ;;  %v5192_v46 = vld [vmem:[#allocation10_spill] sm:$0xff] }
  0xf9   :  { %v682_v54 = vpop.f32.mrf.mxu0  ;;  %v765_v19 = vpop.f32.mrf.mxu2 }
  0xfa   :  { %v729_v26 = vadd.f32 %v728_v50, %v682_v54  ;;  %v608_v51 = vadd.f32 %v5191_v47, %v574_v34 }
  0xfb   :  { %v732_v56 = vpop.f32.mrf.mxu1  ;;  %v805_v10 = vpop.f32.mrf.mxu3 }
  0xfc   :  { %v766_v33 = vadd.f32 %v765_v19, %v729_v26 }
  0xfe   :  { %v806_v50 = vadd.f32 %v805_v10, %v766_v33 }
 0x101   :  { %v690_v61 = vpop.f32.mrf.mxu0  ;;  %v770_v45 = vpop.f32.mrf.mxu2 }
 0x102   :  { %v733_v48 = vadd.f32 %v732_v56, %v690_v61  ;;  %v500_v56 = vadd.f32 %v4199_v44, %v461_v41 }
 0x103   :  { %v736_v63 = vpop.f32.mrf.mxu1  ;;  %v811_v1 = vpop.f32.mrf.mxu3 }
 0x104   :  { %v771_v53 = vadd.f32 %v770_v45, %v733_v48  ;;  %v542_v3 = vadd.f32 %v5190_v40, %v500_v56 }
 0x106   :  { %v812_v58 = vadd.f32 %v811_v1, %v771_v53  ;;  %v578_v4 = vadd.f32 %v5192_v46, %v542_v3  ;;  %v986_v3 = vld [vmem:[%s5169_s1 + $0x18] sm:$0xff] }
 0x108   :  { %v612_v22 = vadd.f32 %v5193_v13, %v578_v4 }
 0x109   :  { %v698_v42 = vpop.f32.mrf.mxu0  ;;  %v775_v60 = vpop.f32.mrf.mxu2 }
 0x10a   :  { %v737_v36 = vadd.f32 %v736_v63, %v698_v42 }
 0x10b   :  { %v875_v5 = vpop.f32.mrf.mxu1  ;;  %v817_v44 = vpop.f32.mrf.mxu3 }
 0x10c   :  { %v776_v37 = vadd.f32 %v775_v60, %v737_v36 }
 0x10e   :  { %v818_v42 = vadd.f32 %v817_v44, %v776_v37 }
 0x111   :  { %v841_v15 = vpop.f32.mrf.mxu0 }
 0x112   :  { %v842_v27 = vadd.f32 %v841_v15, %v800_v9 }
 0x113   :  { %v879_v28 = vpop.f32.mrf.mxu1 }
 0x114   :  { %v876_v25 = vadd.f32 %v875_v5, %v842_v27 }
 0x116   :  { %v4219_v39 = vadd.f32 %v876_v25, %v600_v31 }
 0x118   :  { %v900_v30 = vadd.f32 %v4215_v35, %v4219_v39  ;;  %v919_v6 = vmul.f32 %v4219_v39, %v4219_v39  ;;  %v905_v14 = vsel %vm904_vm8, %v4219_v39, 0.0 }
 0x119   :  { %v845_v24 = vpop.f32.mrf.mxu0 }
 0x11a   :  { %1949 = vrot.lane.b32.xlu0 %v900_v30, %s4005_s25  ;;  %v846_v54 = vadd.f32 %v845_v24, %v806_v50  ;;  %v923_v17 = vsel %vm904_vm8, %v919_v6, 0.0 }
 0x11b   :  { %v883_v57 = vpop.f32.mrf.mxu1 }
 0x11c   :  { %v880_v59 = vadd.f32 %v879_v28, %v846_v54  ;;  %v989_v54 = vld [vmem:[%s5169_s1 + $0x30] sm:$0xff] }
 0x11d   :  { %v1014_v56 = vand.u32 4294901760, %v989_v54 }
 0x11e   :  { %v4235_v21 = vadd.f32 %v880_v59, %v604_v62  ;;  %v987_v59 = vld [vmem:[%s5169_s1 + $0x20] sm:$0xff] }
 0x11f   :  { %1015 = vmatpush.msra.mxu2 %v1014_v56  ;;  %1166 = vmatpush.msrb.mxu1 %v1014_v56  ;;  %v1018_v40 = vand.u32 4294901760, %v987_v59 }
 0x120   :  { %v920_v63 = vmul.f32 %v4235_v21, %v4235_v21  ;;  %v906_v12 = vsel %vm904_vm8, %v4235_v21, 0.0  ;;  %v901_v49 = vadd.f32 %v4215_v35, %v4235_v21 }
 0x121   :  { %v849_v61 = vpop.f32.mrf.mxu0  ;;  %v907_v15 = vadd.f32 %v906_v12, %v905_v14  ;;  %v1080_v44 = vsub.f32 %v987_v59, %v1018_v40 }
 0x122   :  { %v850_v0 = vadd.f32 %v849_v61, %v812_v58  ;;  %v924_v9 = vsel %vm904_vm8, %v920_v63, 0.0  ;;  %v1068_v58 = vsub.f32 %v989_v54, %v1014_v56  ;;  %v971_v54 = vld [vmem:[%s5169_s1 + $0x60] sm:$0xff] }
 0x123   :  { %v887_v11 = vpop.f32.mrf.mxu1  ;;  %v925_v18 = vadd.f32 %v924_v9, %v923_v17 }
 0x124   :  { %v884_v8 = vadd.f32 %v883_v57, %v850_v0  ;;  %v988_v57 = vld [vmem:[%s5169_s1 + $0x28] sm:$0xff]  ;;  %v1069_v62 = vand.u32 4294901760, %v1068_v58  ;;  %1122 = vmatpush.msrb.mxu0 %v1068_v58 }
 0x125   :  { %v1016_v36 = vand.u32 4294901760, %v988_v57 }
 0x126   :  { %v4237_v52 = vadd.f32 %v884_v8, %v608_v51  ;;  %v1070_v51 = vsub.f32 %v1068_v58, %v1069_v62  ;;  %v1020_v8 = vand.u32 4294901760, %v986_v3  ;;  %v970_v58 = vld [vmem:[%s5169_s1 + $0x58] sm:$0xff] }
 0x127   :  { %1017 = vmatpush.msra.mxu2 %v1016_v36  ;;  %v1074_v0 = vsub.f32 %v988_v57, %v1016_v36  ;;  %1168 = vmatpush.msrb.mxu1 %v1016_v36 }
 0x128   :  { %v902_v43 = vadd.f32 %v4215_v35, %v4237_v52  ;;  %v921_v19 = vmul.f32 %v4237_v52, %v4237_v52  ;;  %v908_v16 = vsel %vm904_vm8, %v4237_v52, 0.0  ;;  %v1071_v4 = vand.u32 4294901760, %v1070_v51 }
 0x129   :  { %v853_v5 = vpop.f32.mrf.mxu0  ;;  %v909_v31 = vadd.f32 %v908_v16, %v907_v15  ;;  %v1075_v37 = vand.u32 4294901760, %v1074_v0  ;;  %1125 = vmatpush.msrb.mxu0 %v1074_v0  ;;  %1019 = vmatpush.msra.mxu2 %v1018_v40  ;;  %v1086_v63 = vsub.f32 %v986_v3, %v1020_v8  ;;  %v939_v15 = vld [vmem:[%s5169_s1 + $0x138] sm:$0x1] }
 0x12a   :  { %v854_v23 = vadd.f32 %v853_v5, %v818_v42  ;;  %1953 = vrot.lane.b32.xlu2 %v902_v43, %s4005_s25  ;;  %v926_v26 = vsel %vm904_vm8, %v921_v19, 0.0  ;;  %1170 = vmatpush.msrb.mxu1 %v1018_v40  ;;  %v1081_v43 = vand.u32 4294901760, %v1080_v44 }
 0x12b   :  { %v927_v20 = vadd.f32 %v926_v26, %v925_v18  ;;  %v1076_v42 = vsub.f32 %v1074_v0, %v1075_v37  ;;  %1128 = vmatpush.msrb.mxu0 %v1080_v44  ;;  %1021 = vmatpush.msra.mxu2 %v1020_v8  ;;  %v1087_v6 = vand.u32 4294901760, %v1086_v63 }
 0x12c   :  { %v888_v10 = vadd.f32 %v887_v11, %v854_v23  ;;  %1072 = vmatpush.msra.mxu3 %v1071_v4  ;;  %1172 = vmatpush.msrb.mxu1 %v1020_v8  ;;  %v1082_v12 = vsub.f32 %v1080_v44, %v1081_v43 }
 0x12d   :  { %v1077_v11 = vand.u32 4294901760, %v1076_v42  ;;  %1131 = vmatpush.msrb.mxu0 %v1086_v63  ;;  %1213 = vmatpush.msrb.mxu2 %v1069_v62  ;;  %v1088_v19 = vsub.f32 %v1086_v63, %v1087_v6 }
 0x12e   :  { %v4259_v27 = vadd.f32 %v888_v10, %v612_v22  ;;  %v1083_v23 = vand.u32 4294901760, %v1082_v12 }
 0x12f   :  { %1078 = vmatpush.msra.mxu3 %v1077_v11  ;;  %1217 = vmatpush.msrb.mxu2 %v1075_v37  ;;  %v1089_v13 = vand.u32 4294901760, %v1088_v19 }
 0x130   :  { %v910_v25 = vsel %vm904_vm8, %v4259_v27, 0.0  ;;  %v922_v2 = vmul.f32 %v4259_v27, %v4259_v27  ;;  %v903_v28 = vadd.f32 %v4215_v35, %v4259_v27 }
 0x131   :  { %v911_v29 = vadd.f32 %v910_v25, %v909_v31  ;;  %1084 = vmatpush.msra.mxu3 %v1083_v23  ;;  %1221 = vmatpush.msrb.mxu2 %v1081_v43  ;;  %v953_v31 = vld [vmem:[%s5169_s1 + $0x139] sm:$0x1] }
 0x132   :  { %v928_v33 = vsel %vm904_vm8, %v922_v2, 0.0  ;;  %1955 = vrot.lane.b32.xlu1 %v903_v28, %s4005_s25 }
 0x133   :  { %v912_v45 = vrot.slane %v911_v29, 4  ;;  %v929_v32 = vadd.f32 %v928_v33, %v927_v20  ;;  %1090 = vmatpush.msra.mxu3 %v1089_v13  ;;  %1225 = vmatpush.msrb.mxu2 %v1087_v6 }
 0x135   :  { %v913_v48 = vadd.f32 %v912_v45, %v911_v29  ;;  %v930_v30 = vrot.slane %v929_v32, 4  ;;  %1256 = vmatpush.msrb.mxu3 %v1014_v56 }
 0x137   :  { %v914_v7 = vrot.slane %v913_v48, 2  ;;  %v931_v24 = vadd.f32 %v930_v30, %v929_v32  ;;  %1258 = vmatpush.msrb.mxu3 %v1016_v36 }
 0x139   :  { %v915_v50 = vadd.f32 %v914_v7, %v913_v48  ;;  %v932_v1 = vrot.slane %v931_v24, 2  ;;  %1260 = vmatpush.msrb.mxu3 %v1018_v40  ;;  %v973_v48 = vld [vmem:[%s5169_s1 + $0x70] sm:$0xff] }
 0x13a   :  { %1951 = vrot.lane.b32.xlu1 %v901_v49, %s4005_s25  ;;  %v4302_v30 = vand.u32 4294901760, %v973_v48 }
 0x13b   :  { %v916_v38 = vrot.slane %v915_v50, 1  ;;  %v933_v53 = vadd.f32 %v932_v1, %v931_v24  ;;  %1262 = vmatpush.msrb.mxu3 %v1020_v8 }
 0x13c   :  { %1305 = vmatpush.msra.mxu0 %v4302_v30 }
 0x13d   :  { %v917_v41 = vadd.f32 %v916_v38, %v915_v50  ;;  %v934_v55 = vrot.slane %v933_v53, 1 }
 0x13f   :  { %v4278_v34 = vmul.f32 0.03125, %v917_v41  ;;  %v935_v35 = vadd.f32 %v934_v55, %v933_v53  ;;  %v4326_v55 = vand.u32 4294901760, %v971_v54 }
 0x141   :  { %v936_v60 = vmul.f32 0.03125, %v935_v35  ;;  %v937_v61 = vmul.f32 %v4278_v34, %v4278_v34  ;;  %v1370_v3 = vsub.f32 %v971_v54, %v4326_v55 }
 0x143   :  { %v938_v47 = vsub.f32 %v936_v60, %v937_v61  ;;  %v4340_v60 = vand.u32 4294901760, %v970_v58  ;;  %v1371_v43 = vand.u32 4294901760, %v1370_v3 }
 0x145   :  { %v940_v46 = vmax.f32 %v938_v47, 0.0  ;;  %v1372_v19 = vsub.f32 %v1370_v3, %v1371_v43 }
 0x147   :  { %v941_v5 = vadd.f32 1e-05, %v940_v46 }
 0x149   :  { %3970 = vrsqrt.f32 %v941_v5  ;;  %vm948_vm10 = vweird.f32 %v941_v5 }
 0x14f   :  { %v3971_v22 = vpop.eup %3970 }
 0x150   :  { %v943_v14 = vmul.f32 %v3971_v22, %v941_v5  ;;  %vm949_vm9 = vweird.f32 %v3971_v22 }
 0x151   :  { %vm950_vm11 = vmor %vm948_vm10, %vm949_vm9 }
 0x152   :  { %v944_v9 = vmul.f32 %v3971_v22, %v943_v14 }
 0x154   :  { %v945_v16 = vmul.f32 0.5, %v944_v9  ;;  %v1373_v9 = vand.u32 4294901760, %v1372_v19 }
 0x156   :  { %v946_v10 = vsub.f32 1.5, %v945_v16 }
 0x158   :  { %v947_v17 = vmul.f32 %v3971_v22, %v946_v10 }
 0x15a   :  { %v951_v26 = vsel %vm950_vm11, %v3971_v22, %v947_v17  ;;  %v1376_v22 = vsub.f32 %v970_v58, %v4340_v60 }
 0x15b   :  { %v952_v18 = vmul.f32 %v951_v26, %v939_v15 }
 0x15c   :  { %v1377_v10 = vand.u32 4294901760, %v1376_v22 }
 0x15d   :  { %v954_v25 = vmul.f32 %v952_v18, %v4278_v34  ;;  %v956_v2 = vperm.slane %v952_v18, 0 }
 0x15f   :  { %v955_v28 = vsub.f32 %v953_v31, %v954_v25  ;;  %v960_v20 = vmul.f32 %v956_v2, %v4259_v27  ;;  %v957_v33 = vmul.f32 %v956_v2, %v4219_v39  ;;  %v958_v45 = vmul.f32 %v956_v2, %v4235_v21  ;;  %v972_v27 = vld [vmem:[%s5169_s1 + $0x68] sm:$0xff] }
 0x160   :  { %v959_v32 = vmul.f32 %v956_v2, %v4237_v52  ;;  %v4309_v39 = vsub.f32 %v973_v48, %v4302_v30  ;;  %v4311_v21 = vand.u32 4294901760, %v972_v27  ;;  %v1378_v31 = vsub.f32 %v1376_v22, %v1377_v10 }
 0x161   :  { %v961_v29 = vperm.slane %v955_v28, 0 }
 0x162   :  { %1307 = vmatpush.msra.mxu0 %v4311_v21  ;;  %v1359_v41 = vand.u32 4294901760, %v4309_v39  ;;  %v4329_v56 = vsub.f32 %v972_v27, %v4311_v21  ;;  %v1379_v2 = vand.u32 4294901760, %v1378_v31 }
 0x163   :  { %v965_v7 = vadd.f32 %v961_v29, %v960_v20  ;;  %v962_v24 = vadd.f32 %v961_v29, %v957_v33  ;;  %v963_v49 = vadd.f32 %v961_v29, %v958_v45  ;;  %v964_v50 = vadd.f32 %v961_v29, %v959_v32 }
 0x164   :  { %v1360_v59 = vsub.f32 %v4309_v39, %v1359_v41  ;;  %1309 = vmatpush.msra.mxu0 %v4326_v55  ;;  %v1365_v40 = vand.u32 4294901760, %v4329_v56 }
 0x165   :  { %v4313_v52 = vmax.f32 %v965_v7, 0.0  ;;  %v4315_v1 = vmax.f32 %v962_v24, 0.0  ;;  %v4317_v38 = vmax.f32 %v963_v49, 0.0  ;;  %v4319_v53 = vmax.f32 %v964_v50, 0.0 }
 0x166   :  { %1311 = vmatpush.msra.mxu0 %v4340_v60  ;;  %v1361_v42 = vand.u32 4294901760, %v1360_v59  ;;  %v1366_v63 = vsub.f32 %v4329_v56, %v1365_v40 }
 0x167   :  { %v974_v57 = vrot.slane %v4315_v1, 6  ;;  %v977_v34 = vrot.slane %v4313_v52, 6  ;;  %v975_v35 = vrot.slane %v4317_v38, 6  ;;  %v976_v36 = vrot.slane %v4319_v53, 6 }
 0x168   :  { %1362 = vmatpush.msra.mxu1 %v1361_v42  ;;  %v1367_v12 = vand.u32 4294901760, %v1366_v63  ;;  %v1573_v15 = vrot.slane %v4313_v52, 7  ;;  %v1570_v28 = vrot.slane %v4315_v1, 7  ;;  %v1571_v20 = vrot.slane %v4317_v38, 7  ;;  %v1585_v42 = vld [vmem:[%s5169_s1 + $0x50] sm:$0xff] }
 0x169   :  { %v981_v62 = vsel %vm86_vm1, %v977_v34, %v974_v57  ;;  %v980_v0 = vsel %vm86_vm1, %v974_v57, %v975_v35  ;;  %v979_v44 = vsel %vm86_vm1, %v975_v35, %v976_v36  ;;  %v978_v25 = vsel %vm86_vm1, %v976_v36, %v977_v34 }
 0x16a   :  { %v982_v51 = vsel %vm73_vm3, %v981_v62, 0.0  ;;  %v994_v37 = vsel %vm904_vm8, %v980_v0, 0  ;;  %v984_v6 = vsel %vm75_vm4, %v979_v44, 0.0  ;;  %1368 = vmatpush.msra.mxu1 %v1367_v12  ;;  %v1572_v29 = vrot.slane %v4319_v53, 7 }
 0x16b   :  { %v991_v8 = vsel %vm904_vm8, %v982_v51, 0  ;;  %v4357_v4 = vand.u32 4294901760, %v994_v37  ;;  %v997_v14 = vsel %vm904_vm8, %v984_v6, 0  ;;  %v4384_v32 = vsel %vm618_vm5, %v1573_v15, %v1570_v28 }
 0x16c   :  { %v4355_v46 = vand.u32 4294901760, %v991_v8  ;;  %1374 = vmatpush.msra.mxu1 %v1373_v9  ;;  %v4371_v18 = vand.u32 4294901760, %v997_v14  ;;  %v1000_v48 = vsel %vm904_vm8, %v978_v25, 0  ;;  %v4391_v7 = vsel %vm618_vm5, %v1570_v28, %v1571_v20  ;;  %v1582_v25 = vld [vmem:[%s5169_s1 + $0x38] sm:$0xff] }
 0x16d   :  { %v1031_v13 = vsub.f32 %v994_v37, %v4357_v4  ;;  %v4395_v24 = vsel %vm618_vm5, %v1571_v20, %v1572_v29  ;;  %v1281_v49 = vsel %vm904_vm8, %v4315_v1, 0  ;;  %v1610_v63 = vand.u32 4294901760, %v1585_v42 }
 0x16e   :  { %1092 = vmatmul.f32.vlgmr.msra.gmra.mxu3 %v4355_v46  ;;  %v1023_v5 = vsub.f32 %v991_v8, %v4355_v46  ;;  %v1039_v45 = vsub.f32 %v997_v14, %v4371_v18  ;;  %1380 = vmatpush.msra.mxu1 %v1379_v2  ;;  %v4408_v54 = vand.u32 4294901760, %v1281_v49  ;;  %v1616_v2 = vand.u32 4294901760, %v1582_v25 }
 0x16f   :  { %1456 = vmatpush.msra.mxu3 %v4302_v30  ;;  %v1032_v26 = vand.u32 4294901760, %v1031_v13 }
 0x170   :  { %1134 = vmatmul.f32.vlgmr.msrb.gmra.mxu0 %v1023_v5  ;;  %v1024_v23 = vand.u32 4294901760, %v1023_v5  ;;  %v1040_v27 = vand.u32 4294901760, %v1039_v45  ;;  %v1682_v20 = vsub.f32 %v1582_v25, %v1616_v2 }
 0x171   :  { %1458 = vmatpush.msra.mxu3 %v4311_v21  ;;  %1503 = vmatpush.msrb.mxu0 %v1359_v41  ;;  %v1033_v33 = vsub.f32 %v1031_v13, %v1032_v26  ;;  %v4413_v41 = vsub.f32 %v1281_v49, %v4408_v54  ;;  %v1578_v49 = vsel %vm69_vm6, %v4384_v32, 0.0 }
 0x172   :  { %1176 = vmatmul.f32.vlgmr.msrb.gmra.mxu1 %v1024_v23  ;;  %v1025_v16 = vsub.f32 %v1023_v5, %v1024_v23  ;;  %v1584_v23 = vld [vmem:[%s5169_s1 + $0x48] sm:$0xff] }
 0x173   :  { %1460 = vmatpush.msra.mxu3 %v4326_v55  ;;  %1507 = vmatpush.msrb.mxu0 %v1365_v40  ;;  %v1034_v50 = vand.u32 4294901760, %v1033_v33  ;;  %v1314_v34 = vand.u32 4294901760, %v4413_v41  ;;  %v1683_v33 = vand.u32 4294901760, %v1682_v20 }
 0x174   :  { %v1026_v17 = vand.u32 4294901760, %v1025_v16  ;;  %1546 = vmatpush.msrb.mxu1 %v4302_v30  ;;  %v4404_v30 = vsel %vm618_vm5, %v1572_v29, %v1573_v15  ;;  %v1583_v15 = vld [vmem:[%s5169_s1 + $0x40] sm:$0xff]  ;;  %vm3920_vm5 = vcmask 1040384  }
 0x175   :  { %1462 = vmatpush.msra.mxu3 %v4340_v60  ;;  %1511 = vmatpush.msrb.mxu0 %v1371_v43  ;;  %v1315_v36 = vsub.f32 %v4413_v41, %v1314_v34  ;;  %v1664_v43 = vsub.f32 %v1585_v42, %v1610_v63 }
 0x176   :  { %1027 = vmatmul.f32.vlgmr.msra.gmra.mxu2 %v1026_v17  ;;  %1096 = vmatmul.f32.gmra.mxu3 %v4357_v4 }
 0x177   :  { %1412 = vmatpush.msra.mxu2 %v4309_v39  ;;  %1515 = vmatpush.msrb.mxu0 %v1377_v10  ;;  %v4400_v39 = vand.u32 4294901760, %v1000_v48  ;;  %v1316_v62 = vand.u32 4294901760, %v1315_v36  ;;  %v1665_v5 = vand.u32 4294901760, %v1664_v43  ;;  %v1596_v36 = vsel %vm904_vm8, %v4404_v30, 0 }
 0x178   :  { %1139 = vmatmul.f32.gmra.mxu0 %v1031_v13  ;;  %1548 = vmatpush.msrb.mxu1 %v4311_v21  ;;  %v1041_v21 = vsub.f32 %v1039_v45, %v1040_v27 }
 0x179   :  { %1415 = vmatpush.msra.mxu2 %v4329_v56  ;;  %v1047_v1 = vsub.f32 %v1000_v48, %v4400_v39  ;;  %v1284_v56 = vsel %vm904_vm8, %v4317_v38, 0  ;;  %v1287_v38 = vsel %vm904_vm8, %v4319_v53, 0  ;;  %v1290_v53 = vsel %vm904_vm8, %v4313_v52, 0 }
 0x17a   :  { %1182 = vmatmul.f32.gmra.mxu1 %v1032_v26  ;;  %v1042_v57 = vand.u32 4294901760, %v1041_v21  ;;  %v4419_v35 = vand.u32 4294901760, %v1284_v56  ;;  %v4431_v40 = vand.u32 4294901760, %v1287_v38  ;;  %v4445_v44 = vand.u32 4294901760, %v1290_v53 }
 0x17b   :  { %1418 = vmatpush.msra.mxu2 %v1370_v3  ;;  %1550 = vmatpush.msrb.mxu1 %v4326_v55  ;;  %v1048_v55 = vand.u32 4294901760, %v1047_v1  ;;  %v1666_v6 = vsub.f32 %v1664_v43, %v1665_v5  ;;  %v1614_v26 = vand.u32 4294901760, %v1583_v15 }
 0x17c   :  { %v4425_v59 = vsub.f32 %v1284_v56, %v4419_v35  ;;  %v4438_v51 = vsub.f32 %v1287_v38, %v4431_v40  ;;  %v1642_v38 = vand.u32 4294901760, %v1596_v36 }
 0x17d   :  { %1421 = vmatpush.msra.mxu2 %v1376_v22  ;;  %1552 = vmatpush.msrb.mxu1 %v4340_v60  ;;  %v1049_v58 = vsub.f32 %v1047_v1, %v1048_v55  ;;  %v1667_v13 = vand.u32 4294901760, %v1666_v6  ;;  %v1612_v22 = vand.u32 4294901760, %v1584_v23  ;;  %v1676_v31 = vsub.f32 %v1583_v15, %v1614_v26 }
 0x17e   :  { %1035 = vmatmul.f32.gmra.mxu2 %v1034_v50  ;;  %1100 = vmatmul.f32.gmra.mxu3 %v4371_v18  ;;  %v1322_v0 = vand.u32 4294901760, %v4425_v59  ;;  %v1330_v8 = vand.u32 4294901760, %v4438_v51  ;;  %v1587_v50 = vsel %vm904_vm8, %v1578_v49, 0 }
 0x17f   :  { %v1050_v60 = vand.u32 4294901760, %v1049_v58  ;;  %v1670_v14 = vsub.f32 %v1584_v23, %v1612_v22 }
 0x180   :  { %1144 = vmatmul.f32.gmra.mxu0 %v1039_v45  ;;  %v1323_v3 = vsub.f32 %v4425_v59, %v1322_v0  ;;  %v1331_v52 = vsub.f32 %v4438_v51, %v1330_v8  ;;  %v1684_v45 = vsub.f32 %v1682_v20, %v1683_v33 }
 0x181   :  { %v1671_v9 = vand.u32 4294901760, %v1670_v14 }
 0x182   :  { %1188 = vmatmul.f32.gmra.mxu1 %v1040_v27  ;;  %v1324_v37 = vand.u32 4294901760, %v1323_v3  ;;  %v1332_v12 = vand.u32 4294901760, %v1331_v52  ;;  %v1685_v48 = vand.u32 4294901760, %v1684_v45  ;;  %v1618_v27 = vand.u32 4294901760, %v1587_v50 }
 0x183   :  { %v1672_v16 = vsub.f32 %v1670_v14, %v1671_v9 }
 0x185   :  { %v1673_v17 = vand.u32 4294901760, %v1672_v16 }
 0x186   :  { %1043 = vmatmul.f32.gmra.mxu2 %v1042_v57  ;;  %1104 = vmatmul.f32.gmra.mxu3 %v4400_v39 }
 0x188   :  { %1149 = vmatmul.f32.gmra.mxu0 %v1047_v1  ;;  %v1580_v1 = vsel %vm71_vm7, %v4395_v24, 0.0 }
 0x189   :  { %v1593_v57 = vsel %vm904_vm8, %v1580_v1, 0 }
 0x18a   :  { %1194 = vmatmul.f32.gmra.mxu1 %v1048_v55 }
 0x18e   :  { %1051 = vmatmul.f32.gmra.mxu2 %v1050_v60  ;;  %1264 = vmatmul.f32.vlgmr.msrb.gmra.mxu3 %v4355_v46 }
 0x18f   :  { %1668 = vmatpush.msrb.mxu3 %v1667_v13 }
 0x190   :  { %1317 = vmatmul.f32.vlgmr.msra.gmra.mxu0 %v1316_v62  ;;  %v1643_v62 = vsub.f32 %v1596_v36, %v1642_v38 }
 0x191   :  { %1718 = vmatpush.msra.mxu0 %v1664_v43  ;;  %1674 = vmatpush.msrb.mxu3 %v1673_v17 }
 0x192   :  { %1382 = vmatmul.f32.vlgmr.msra.gmra.mxu1 %v4408_v54 }
 0x193   :  { %1762 = vmatpush.msra.mxu1 %v1610_v63  ;;  %1721 = vmatpush.msra.mxu0 %v1670_v14 }
 0x195   :  { %1764 = vmatpush.msra.mxu1 %v1612_v22  ;;  %1724 = vmatpush.msra.mxu0 %v1676_v31 }
 0x196   :  { %1227 = vmatmul.f32.vlgmr.msrb.gmra.mxu2 %v4355_v46  ;;  %1268 = vmatmul.f32.gmra.mxu3 %v4357_v4  ;;  %v4455_v46 = vsub.f32 %v1290_v53, %v4445_v44 }
 0x197   :  { %1611 = vmatpush.msrb.mxu2 %v1610_v63  ;;  %1766 = vmatpush.msra.mxu1 %v1614_v26 }
 0x198   :  { %1325 = vmatmul.f32.gmra.mxu0 %v1324_v37  ;;  %v1338_v19 = vand.u32 4294901760, %v4455_v46 }
 0x199   :  { %1613 = vmatpush.msrb.mxu2 %v1612_v22  ;;  %1768 = vmatpush.msra.mxu1 %v1616_v2 }
 0x19a   :  { %1386 = vmatmul.f32.gmra.mxu1 %v4419_v35  ;;  %1727 = vmatpush.msra.mxu0 %v1682_v20 }
 0x19b   :  { %1615 = vmatpush.msrb.mxu2 %v1614_v26 }
 0x19d   :  { %1617 = vmatpush.msrb.mxu2 %v1616_v2 }
 0x19e   :  { %1231 = vmatmul.f32.gmra.mxu2 %v4357_v4  ;;  %1272 = vmatmul.f32.gmra.mxu3 %v4371_v18  ;;  %v1339_v4 = vsub.f32 %v4455_v46, %v1338_v19 }
 0x1a0   :  { %1333 = vmatmul.f32.gmra.mxu0 %v1332_v12  ;;  %v1340_v10 = vand.u32 4294901760, %v1339_v4 }
 0x1a2   :  { %1390 = vmatmul.f32.gmra.mxu1 %v4431_v40 }
 0x1a6   :  { %1235 = vmatmul.f32.gmra.mxu2 %v4371_v18  ;;  %1276 = vmatmul.f32.gmra.mxu3 %v4400_v39  ;;  %v1677_v18 = vand.u32 4294901760, %v1676_v31 }
 0x1a8   :  { %1341 = vmatmul.f32.gmra.mxu0 %v1340_v10  ;;  %v1678_v28 = vsub.f32 %v1676_v31, %v1677_v18 }
 0x1aa   :  { %1394 = vmatmul.f32.gmra.mxu1 %v4445_v44  ;;  %v1679_v29 = vand.u32 4294901760, %v1678_v28 }
 0x1ac   :  { %1680 = vmatpush.msrb.mxu3 %v1679_v29 }
 0x1ae   :  { %1239 = vmatmul.f32.gmra.mxu2 %v4400_v39  ;;  %1466 = vmatmul.f32.vlgmr.msra.gmra.mxu3 %v1314_v34  ;;  %v1619_v39 = vsub.f32 %v1587_v50, %v1618_v27 }
 0x1af   :  { %1686 = vmatpush.msrb.mxu3 %v1685_v48 }
 0x1b0   :  { %1517 = vmatmul.f32.vlgmr.msrb.gmra.mxu0 %v4408_v54  ;;  %v1620_v32 = vand.u32 4294901760, %v1619_v39 }
 0x1b1   :  { %1852 = vmatpush.msra.mxu3 %v1610_v63 }
 0x1b2   :  { %1554 = vmatmul.f32.vlgmr.msrb.gmra.mxu1 %v4408_v54  ;;  %v1590_v54 = vsel %vm904_vm8, %v4391_v7, 0  ;;  %v1634_v7 = vand.u32 4294901760, %v1593_v57 }
 0x1b3   :  { %1854 = vmatpush.msra.mxu3 %v1612_v22  ;;  %v1626_v21 = vand.u32 4294901760, %v1590_v54 }
 0x1b4   :  { %v1635_v58 = vsub.f32 %v1593_v57, %v1634_v7 }
 0x1b5   :  { %1856 = vmatpush.msra.mxu3 %v1614_v26  ;;  %v1627_v56 = vsub.f32 %v1590_v54, %v1626_v21 }
 0x1b6   :  { %1424 = vmatmul.f32.vlgmr.msra.gmra.mxu2 %v4413_v41  ;;  %1472 = vmatmul.f32.gmra.mxu3 %v1322_v0  ;;  %v1621_v41 = vsub.f32 %v1619_v39, %v1620_v32  ;;  %v1636_v24 = vand.u32 4294901760, %v1635_v58 }
 0x1b7   :  { %1809 = vmatpush.msra.mxu2 %v1665_v5  ;;  %1858 = vmatpush.msra.mxu3 %v1616_v2  ;;  %v1628_v34 = vand.u32 4294901760, %v1627_v56 }
 0x1b8   :  { %1521 = vmatmul.f32.gmra.mxu0 %v4419_v35  ;;  %v1622_v55 = vand.u32 4294901760, %v1621_v41  ;;  %v1637_v60 = vsub.f32 %v1635_v58, %v1636_v24 }
 0x1b9   :  { %1813 = vmatpush.msra.mxu2 %v1671_v9 }
 0x1ba   :  { %1558 = vmatmul.f32.gmra.mxu1 %v4419_v35  ;;  %v1629_v35 = vsub.f32 %v1627_v56, %v1628_v34  ;;  %v1638_v0 = vand.u32 4294901760, %v1637_v60 }
 0x1bb   :  { %1817 = vmatpush.msra.mxu2 %v1677_v18 }
 0x1bd   :  { %1821 = vmatpush.msra.mxu2 %v1683_v33 }
 0x1be   :  { %1429 = vmatmul.f32.gmra.mxu2 %v4425_v59  ;;  %1478 = vmatmul.f32.gmra.mxu3 %v1330_v8  ;;  %v1630_v59 = vand.u32 4294901760, %v1629_v35 }
 0x1c0   :  { %1525 = vmatmul.f32.gmra.mxu0 %v4431_v40 }
 0x1c2   :  { %1562 = vmatmul.f32.gmra.mxu1 %v4431_v40  ;;  %v1644_v40 = vand.u32 4294901760, %v1643_v62 }
 0x1c4   :  { %v1645_v3 = vsub.f32 %v1643_v62, %v1644_v40 }
 0x1c6   :  { %1434 = vmatmul.f32.gmra.mxu2 %v4438_v51  ;;  %1484 = vmatmul.f32.gmra.mxu3 %v1338_v19  ;;  %v1646_v51 = vand.u32 4294901760, %v1645_v3 }
 0x1c8   :  { %1529 = vmatmul.f32.gmra.mxu0 %v4445_v44 }
 0x1ca   :  { %1566 = vmatmul.f32.gmra.mxu1 %v4445_v44 }
 0x1ce   :  { %1439 = vmatmul.f32.gmra.mxu2 %v4455_v46  ;;  %1688 = vmatmul.f32.vlgmr.msrb.gmra.mxu3 %v1618_v27 }
 0x1d0   :  { %1730 = vmatmul.f32.vlgmr.msra.gmra.mxu0 %v1619_v39 }
 0x1d2   :  { %1772 = vmatmul.f32.vlgmr.msra.gmra.mxu1 %v1620_v32 }
 0x1d6   :  { %1623 = vmatmul.f32.vlgmr.msrb.gmra.mxu2 %v1622_v55  ;;  %1692 = vmatmul.f32.gmra.mxu3 %v1626_v21 }
 0x1d8   :  { %1735 = vmatmul.f32.gmra.mxu0 %v1627_v56 }
 0x1da   :  { %1778 = vmatmul.f32.gmra.mxu1 %v1628_v34 }
 0x1de   :  { %1631 = vmatmul.f32.gmra.mxu2 %v1630_v59  ;;  %1696 = vmatmul.f32.gmra.mxu3 %v1634_v7 }
 0x1e0   :  { %1740 = vmatmul.f32.gmra.mxu0 %v1635_v58 }
 0x1e2   :  { %1784 = vmatmul.f32.gmra.mxu1 %v1636_v24 }
 0x1e6   :  { %1639 = vmatmul.f32.gmra.mxu2 %v1638_v0  ;;  %1700 = vmatmul.f32.gmra.mxu3 %v1642_v38 }
 0x1e8   :  { %1745 = vmatmul.f32.gmra.mxu0 %v1643_v62 }
 0x1ea   :  { %1790 = vmatmul.f32.gmra.mxu1 %v1644_v40 }
 0x1ed   :  { %v4509_v53 = vpop.f32.mrf.mxu0 }
 0x1ee   :  { %1647 = vmatmul.f32.gmra.mxu2 %v1646_v51  ;;  %1860 = vmatmul.f32.vlgmr.msra.gmra.mxu3 %v1618_v27 }
 0x1ef   :  { %v4511_v37 = vpop.f32.mrf.mxu1 }
 0x1f1   :  { %v1093_v30 = vpop.f32.mrf.mxu3 }
 0x1f5   :  { %v1140_v42 = vpop.f32.mrf.mxu0 }
 0x1f6   :  { %1823 = vmatmul.f32.vlgmr.msra.gmra.mxu2 %v1618_v27  ;;  %1864 = vmatmul.f32.gmra.mxu3 %v1626_v21 }
 0x1f7   :  { %v1183_v52 = vpop.f32.mrf.mxu1 }
 0x1f9   :  { %v1028_v8 = vpop.f32.mrf.mxu2  ;;  %v1097_v44 = vpop.f32.mrf.mxu3 }
 0x1fa   :  { %v1094_v24 = vadd.f32 %v1093_v30, %v1028_v8 }
 0x1fc   :  { %v1136_v40 = vadd.f32 %v4509_v53, %v1094_v24 }
 0x1fd   :  { %v1145_v46 = vpop.f32.mrf.mxu0 }
 0x1fe   :  { %1827 = vmatmul.f32.gmra.mxu2 %v1626_v21  ;;  %1868 = vmatmul.f32.gmra.mxu3 %v1634_v7 }
 0x1ff   :  { %v1189_v12 = vpop.f32.mrf.mxu1 }
 0x201   :  { %v1036_v63 = vpop.f32.mrf.mxu2  ;;  %v1101_v43 = vpop.f32.mrf.mxu3 }
 0x202   :  { %v1098_v59 = vadd.f32 %v1097_v44, %v1036_v63 }
 0x204   :  { %v1141_v0 = vadd.f32 %v1140_v42, %v1098_v59 }
 0x205   :  { %v1150_v13 = vpop.f32.mrf.mxu0 }
 0x206   :  { %1831 = vmatmul.f32.gmra.mxu2 %v1634_v7  ;;  %1872 = vmatmul.f32.gmra.mxu3 %v1642_v38  ;;  %v1184_v61 = vadd.f32 %v1183_v52, %v1141_v0 }
 0x207   :  { %v1195_v22 = vpop.f32.mrf.mxu1 }
 0x209   :  { %v1044_v5 = vpop.f32.mrf.mxu2  ;;  %v1105_v6 = vpop.f32.mrf.mxu3 }
 0x20a   :  { %v1102_v60 = vadd.f32 %v1101_v43, %v1044_v5 }
 0x20c   :  { %v1146_v51 = vadd.f32 %v1145_v46, %v1102_v60 }
 0x20d   :  { %v1318_v9 = vpop.f32.mrf.mxu0 }
 0x20e   :  { %1835 = vmatmul.f32.gmra.mxu2 %v1642_v38 }
 0x20f   :  { %v4513_v16 = vpop.f32.mrf.mxu1 }
 0x211   :  { %v1052_v19 = vpop.f32.mrf.mxu2  ;;  %v1265_v23 = vpop.f32.mrf.mxu3 }
 0x212   :  { %v1106_v47 = vadd.f32 %v1105_v6, %v1052_v19 }
 0x214   :  { %v1151_v8 = vadd.f32 %v1150_v13, %v1106_v47 }
 0x215   :  { %v1326_v17 = vpop.f32.mrf.mxu0 }
 0x216   :  { %v1196_v59 = vadd.f32 %v1195_v22, %v1151_v8 }
 0x217   :  { %v1387_v25 = vpop.f32.mrf.mxu1 }
 0x219   :  { %v1228_v14 = vpop.f32.mrf.mxu2  ;;  %v1269_v4 = vpop.f32.mrf.mxu3 }
 0x21d   :  { %v1334_v18 = vpop.f32.mrf.mxu0 }
 0x21f   :  { %v1391_v20 = vpop.f32.mrf.mxu1 }
 0x221   :  { %v1232_v10 = vpop.f32.mrf.mxu2  ;;  %v1273_v15 = vpop.f32.mrf.mxu3 }
 0x225   :  { %v4519_v45 = vpop.f32.mrf.mxu0 }
 0x227   :  { %v4521_v48 = vpop.f32.mrf.mxu1 }
 0x229   :  { %v1236_v26 = vpop.f32.mrf.mxu2  ;;  %v1277_v31 = vpop.f32.mrf.mxu3 }
 0x22d   :  { %v4525_v27 = vpop.f32.mrf.mxu0 }
 0x22f   :  { %v4527_v39 = vpop.f32.mrf.mxu1 }
 0x230   :  { %5197 = vst [vmem:[#allocation8_spill] sm:$0xff] %v4527_v39  ;;  %v1233_v39 = vadd.f32 %v1232_v10, %v1184_v61 }
 0x231   :  { %v1240_v2 = vpop.f32.mrf.mxu2  ;;  %v4515_v28 = vpop.f32.mrf.mxu3 }
 0x232   :  { %v1270_v63 = vadd.f32 %v1269_v4, %v1233_v39  ;;  %v1241_v46 = vadd.f32 %v1240_v2, %v1196_v59 }
 0x234   :  { %v1327_v24 = vadd.f32 %v1326_v17, %v1270_v63 }
 0x235   :  { %v4531_v21 = vpop.f32.mrf.mxu0 }
 0x236   :  { %v1388_v61 = vadd.f32 %v1387_v25, %v1327_v24 }
 0x237   :  { %v4535_v56 = vpop.f32.mrf.mxu1 }
 0x238   :  { %5199 = vst [vmem:[#allocation10_spill] sm:$0xff] %v4535_v56 }
 0x239   :  { %v1425_v29 = vpop.f32.mrf.mxu2  ;;  %v4517_v33 = vpop.f32.mrf.mxu3 }
 0x23d   :  { %v4537_v57 = vpop.f32.mrf.mxu0 }
 0x23f   :  { %v4539_v7 = vpop.f32.mrf.mxu1 }
 0x240   :  { %5200 = vst [vmem:[#allocation11_spill] sm:$0xff] %v4539_v7  ;;  %v1178_v7 = vadd.f32 %v4511_v37, %v1136_v40 }
 0x241   :  { %v1430_v49 = vpop.f32.mrf.mxu2  ;;  %v4523_v50 = vpop.f32.mrf.mxu3 }
 0x242   :  { %v1229_v56 = vadd.f32 %v1228_v14, %v1178_v7  ;;  %v1278_v14 = vadd.f32 %v1277_v31, %v1241_v46 }
 0x244   :  { %v1266_v43 = vadd.f32 %v1265_v23, %v1229_v56  ;;  %v1343_v17 = vadd.f32 %v4519_v45, %v1278_v14 }
 0x245   :  { %v4541_v36 = vpop.f32.mrf.mxu0 }
 0x246   :  { %5201 = vst [vmem:[#allocation12_spill] sm:$0xff] %v4541_v36  ;;  %v1319_v60 = vadd.f32 %v1318_v9, %v1266_v43 }
 0x247   :  { %v4543_v38 = vpop.f32.mrf.mxu1 }
 0x248   :  { %v1384_v10 = vadd.f32 %v4513_v16, %v1319_v60 }
 0x249   :  { %v1435_v54 = vpop.f32.mrf.mxu2  ;;  %v4529_v32 = vpop.f32.mrf.mxu3 }
 0x24a   :  { %5198 = vst [vmem:[#allocation9_spill] sm:$0xff] %v4529_v32  ;;  %v1190_v32 = vadd.f32 %v1189_v12, %v1146_v51  ;;  %v1426_v23 = vadd.f32 %v1425_v29, %v1384_v10  ;;  %v1396_v29 = vadd.f32 %v4521_v48, %v1343_v17 }
 0x24c   :  { %v1237_v30 = vadd.f32 %v1236_v26, %v1190_v32  ;;  %v1431_v26 = vadd.f32 %v1430_v49, %v1388_v61  ;;  %v1468_v25 = vadd.f32 %v4515_v28, %v1426_v23 }
 0x24d   :  { %v1731_v11 = vpop.f32.mrf.mxu0  ;;  %v5206_v63 = vld [vmem:[#allocation12_spill] sm:$0xff] }
 0x24e   :  { %v1274_v42 = vadd.f32 %v1273_v15, %v1237_v30  ;;  %v1519_v45 = vadd.f32 %v4525_v27, %v1468_v25 }
 0x24f   :  { %v1773_v36 = vpop.f32.mrf.mxu1 }
 0x250   :  { %v1335_v6 = vadd.f32 %v1334_v18, %v1274_v42  ;;  %v1474_v18 = vadd.f32 %v4517_v33, %v1431_v26 }
 0x251   :  { %v4533_v1 = vpop.f32.mrf.mxu2  ;;  %v1689_v41 = vpop.f32.mrf.mxu3  ;;  %v5203_v48 = vld [vmem:[#allocation9_spill] sm:$0xff] }
 0x252   :  { %v1392_v47 = vadd.f32 %v1391_v20, %v1335_v6  ;;  %v1441_v56 = vadd.f32 %v4533_v1, %v1396_v29  ;;  %v5205_v1 = vld [vmem:[#allocation11_spill] sm:$0xff] }
 0x254   :  { %v1436_v15 = vadd.f32 %v1435_v54, %v1392_v47  ;;  %v1486_v0 = vadd.f32 %v5203_v48, %v1441_v56  ;;  %v1994_v48 = vld [vmem:[%s5169_s1 + $0x78] sm:$0xff] }
 0x255   :  { %v1736_v53 = vpop.f32.mrf.mxu0 }
 0x256   :  { %v1480_v31 = vadd.f32 %v4523_v50, %v1436_v15  ;;  %v1531_v43 = vadd.f32 %v5206_v63, %v1486_v0  ;;  %v2028_v0 = vand.u32 4294901760, %v1994_v48 }
 0x257   :  { %v1779_v37 = vpop.f32.mrf.mxu1 }
 0x258   :  { %v1527_v33 = vadd.f32 %v4537_v57, %v1480_v31 }
 0x259   :  { %v1624_v55 = vpop.f32.mrf.mxu2  ;;  %v1693_v34 = vpop.f32.mrf.mxu3 }
 0x25a   :  { %v1690_v12 = vadd.f32 %v1689_v41, %v1624_v55  ;;  %v1564_v8 = vadd.f32 %v5205_v1, %v1527_v33 }
 0x25c   :  { %v1732_v22 = vadd.f32 %v1731_v11, %v1690_v12  ;;  %v1523_v11 = vadd.f32 %v4531_v21, %v1474_v18  ;;  %v5204_v21 = vld [vmem:[#allocation8_spill] sm:$0xff] }
 0x25d   :  { %v1741_v9 = vpop.f32.mrf.mxu0  ;;  %v1556_v51 = vadd.f32 %v5204_v21, %v1519_v45 }
 0x25e   :  { %v1774_v49 = vadd.f32 %v1773_v36, %v1732_v22 }
 0x25f   :  { %v1785_v41 = vpop.f32.mrf.mxu1 }
 0x261   :  { %v1632_v35 = vpop.f32.mrf.mxu2  ;;  %v1697_v58 = vpop.f32.mrf.mxu3 }
 0x262   :  { %v1694_v19 = vadd.f32 %v1693_v34, %v1632_v35 }
 0x264   :  { %v1737_v13 = vadd.f32 %v1736_v53, %v1694_v19  ;;  %v1568_v19 = vadd.f32 %v4543_v38, %v1531_v43 }
 0x265   :  { %v1746_v40 = vpop.f32.mrf.mxu0 }
 0x266   :  { %v1780_v32 = vadd.f32 %v1779_v37, %v1737_v13 }
 0x269   :  { %v1640_v62 = vpop.f32.mrf.mxu2  ;;  %v1701_v3 = vpop.f32.mrf.mxu3 }
 0x26a   :  { %v1698_v39 = vadd.f32 %v1697_v58, %v1640_v62  ;;  %v5202_v58 = vld [vmem:[#allocation10_spill] sm:$0xff] }
 0x26b   :  { %v1560_v36 = vadd.f32 %v5202_v58, %v1523_v11 }
 0x26c   :  { %v1742_v16 = vadd.f32 %v1741_v9, %v1698_v39 }
 0x26e   :  { %v1786_v28 = vadd.f32 %v1785_v41, %v1742_v16 }
 0x271   :  { %v1648_v44 = vpop.f32.mrf.mxu2  ;;  %v1861_v5 = vpop.f32.mrf.mxu3 }
 0x272   :  { %v1702_v55 = vadd.f32 %v1701_v3, %v1648_v44 }
 0x274   :  { %v1747_v30 = vadd.f32 %v1746_v40, %v1702_v55 }
 0x279   :  { %v1824_v52 = vpop.f32.mrf.mxu2  ;;  %v1865_v4 = vpop.f32.mrf.mxu3 }
 0x27a   :  { %v1825_v54 = vadd.f32 %v1824_v52, %v1774_v49 }
 0x27c   :  { %v1862_v35 = vadd.f32 %v1861_v5, %v1825_v54  ;;  %v1791_v5 = vpop.f32.mrf.mxu1 }
 0x27d   :  { %v1792_v59 = vadd.f32 %v1791_v5, %v1747_v30  ;;  %v2094_v30 = vsub.f32 %v1994_v48, %v2028_v0 }
 0x27e   :  { %v4563_v3 = vadd.f32 %v1862_v35, %v1556_v51  ;;  %v1995_v35 = vld [vmem:[%s5169_s1 + $0x80] sm:$0xff] }
 0x27f   :  { %v2095_v43 = vand.u32 4294901760, %v2094_v30 }
 0x280   :  { %v1894_v24 = vmul.f32 %v4563_v3, %v4563_v3  ;;  %v1880_v37 = vsel %vm904_vm8, %v4563_v3, 0.0 }
 0x281   :  { %v1828_v2 = vpop.f32.mrf.mxu2  ;;  %v1869_v7 = vpop.f32.mrf.mxu3 }
 0x282   :  { %v1829_v20 = vadd.f32 %v1828_v2, %v1780_v32  ;;  %v1898_v26 = vsel %vm904_vm8, %v1894_v24, 0.0 }
 0x284   :  { %v1866_v34 = vadd.f32 %v1865_v4, %v1829_v20 }
 0x286   :  { %v4560_v27 = vadd.f32 %v1866_v34, %v1560_v36 }
 0x288   :  { %v1895_v42 = vmul.f32 %v4560_v27, %v4560_v27  ;;  %v1881_v46 = vsel %vm904_vm8, %v4560_v27, 0.0 }
 0x289   :  { %v1832_v50 = vpop.f32.mrf.mxu2  ;;  %v1873_v6 = vpop.f32.mrf.mxu3  ;;  %v1882_v10 = vadd.f32 %v1881_v46, %v1880_v37 }
 0x28a   :  { %v1833_v62 = vadd.f32 %v1832_v50, %v1786_v28  ;;  %v1899_v61 = vsel %vm904_vm8, %v1895_v42, 0.0  ;;  %v1996_v50 = vld [vmem:[%s5169_s1 + $0x88] sm:$0xff] }
 0x28b   :  { %v1900_v23 = vadd.f32 %v1899_v61, %v1898_v26  ;;  %v2024_v36 = vand.u32 4294901760, %v1996_v50 }
 0x28c   :  { %v1870_v57 = vadd.f32 %v1869_v7, %v1833_v62  ;;  %v1997_v7 = vld [vmem:[%s5169_s1 + $0x90] sm:$0xff]  ;;  %v2026_v62 = vand.u32 4294901760, %v1995_v35 }
 0x28d   :  { %v2022_v58 = vand.u32 4294901760, %v1997_v7  ;;  %v2082_v21 = vsub.f32 %v1996_v50, %v2024_v36 }
 0x28e   :  { %v4565_v44 = vadd.f32 %v1870_v57, %v1564_v8  ;;  %v2088_v51 = vsub.f32 %v1995_v35, %v2026_v62 }
 0x28f   :  { %2023 = vmatpush.msrb.mxu0 %v2022_v58  ;;  %v2076_v40 = vsub.f32 %v1997_v7, %v2022_v58  ;;  %2174 = vmatpush.msrb.mxu3 %v2022_v58  ;;  %v2083_v8 = vand.u32 4294901760, %v2082_v21 }
 0x290   :  { %v1896_v60 = vmul.f32 %v4565_v44, %v4565_v44  ;;  %v1883_v12 = vsel %vm904_vm8, %v4565_v44, 0.0  ;;  %v2089_v57 = vand.u32 4294901760, %v2088_v51 }
 0x291   :  { %v1836_v53 = vpop.f32.mrf.mxu2  ;;  %v1884_v4 = vadd.f32 %v1883_v12, %v1882_v10  ;;  %v2077_v1 = vand.u32 4294901760, %v2076_v40  ;;  %2025 = vmatpush.msrb.mxu0 %v2024_v36  ;;  %2130 = vmatpush.msrb.mxu2 %v2076_v40  ;;  %v1914_v12 = vld [vmem:[%s5169_s1 + $0x13a] sm:$0x1] }
 0x292   :  { %v1837_v52 = vadd.f32 %v1836_v53, %v1792_v59  ;;  %v1901_v47 = vsel %vm904_vm8, %v1896_v60, 0.0  ;;  %2176 = vmatpush.msrb.mxu3 %v2024_v36  ;;  %v2084_v59 = vsub.f32 %v2082_v21, %v2083_v8  ;;  %v2090_v53 = vsub.f32 %v2088_v51, %v2089_v57 }
 0x293   :  { %v1902_v22 = vadd.f32 %v1901_v47, %v1900_v23  ;;  %v2078_v42 = vsub.f32 %v2076_v40, %v2077_v1  ;;  %2027 = vmatpush.msrb.mxu0 %v2026_v62  ;;  %2133 = vmatpush.msrb.mxu2 %v2082_v21  ;;  %v1956_v47 = vpop.permute.xlu1 %1955  ;;  %v1928_v23 = vld [vmem:[%s5169_s1 + $0x13b] sm:$0x1]  ;;  %v1972_v40 = vld [vmem:[%s5169_s1 + $0xd0] sm:$0xff] }
 0x294   :  { %v1874_v14 = vadd.f32 %v1873_v6, %v1837_v52  ;;  %2178 = vmatpush.msrb.mxu3 %v2026_v62  ;;  %v2085_v60 = vand.u32 4294901760, %v2084_v59  ;;  %v2096_v52 = vsub.f32 %v2094_v30, %v2095_v43 }
 0x295   :  { %v2079_v46 = vand.u32 4294901760, %v2078_v42  ;;  %2136 = vmatpush.msrb.mxu2 %v2088_v51  ;;  %2029 = vmatpush.msrb.mxu0 %v2028_v0 }
 0x296   :  { %v4584_v13 = vadd.f32 %v1874_v14, %v1568_v19  ;;  %2180 = vmatpush.msrb.mxu3 %v2028_v0  ;;  %v2091_v19 = vand.u32 4294901760, %v2090_v53  ;;  %v2097_v61 = vand.u32 4294901760, %v2096_v52 }
 0x297   :  { %2221 = vmatpush.msra.mxu0 %v2077_v1  ;;  %2080 = vmatpush.msrb.mxu1 %v2079_v46  ;;  %v1970_v1 = vld [vmem:[%s5169_s1 + $0xc0] sm:$0xff]  ;;  %v1969_v46 = vld [vmem:[%s5169_s1 + $0xb8] sm:$0xff] }
 0x298   :  { %v1885_v38 = vsel %vm904_vm8, %v4584_v13, 0.0  ;;  %v1897_v15 = vmul.f32 %v4584_v13, %v4584_v13  ;;  %2139 = vmatpush.msrb.mxu2 %v2094_v30  ;;  %v1971_v30 = vld [vmem:[%s5169_s1 + $0xc8] sm:$0xff]  ;;  %v4662_v59 = vand.u32 4294901760, %v1970_v1 }
 0x299   :  { %v1886_v39 = vadd.f32 %v1885_v38, %v1884_v4  ;;  %2225 = vmatpush.msra.mxu0 %v2083_v8  ;;  %2086 = vmatpush.msrb.mxu1 %v2085_v60  ;;  %v4660_v42 = vand.u32 4294901760, %v1971_v30 }
 0x29a   :  { %v1903_v17 = vsel %vm904_vm8, %v1897_v15, 0.0 }
 0x29b   :  { %v1887_v9 = vrot.slane %v1886_v39, 4  ;;  %v1904_v2 = vadd.f32 %v1903_v17, %v1902_v22  ;;  %2229 = vmatpush.msra.mxu0 %v2089_v57  ;;  %2092 = vmatpush.msrb.mxu1 %v2091_v19  ;;  %v2372_v52 = vsub.f32 %v1971_v30, %v4660_v42 }
 0x29d   :  { %v1888_v18 = vadd.f32 %v1887_v9, %v1886_v39  ;;  %v1905_v32 = vrot.slane %v1904_v2, 4  ;;  %2233 = vmatpush.msra.mxu0 %v2095_v43  ;;  %2098 = vmatpush.msrb.mxu1 %v2097_v61  ;;  %v2378_v61 = vsub.f32 %v1970_v1, %v4662_v59 }
 0x29f   :  { %v1889_v25 = vrot.slane %v1888_v18, 2  ;;  %v1906_v31 = vadd.f32 %v1905_v32, %v1904_v2  ;;  %2264 = vmatpush.msra.mxu1 %v2022_v58 }
 0x2a1   :  { %v1890_v16 = vadd.f32 %v1889_v25, %v1888_v18  ;;  %v1907_v49 = vrot.slane %v1906_v31, 2  ;;  %2266 = vmatpush.msra.mxu1 %v2024_v36  ;;  %v5209_v36 = vld [vmem:[#allocation7_spill] sm:$0xff] }
 0x2a2   :  { %vm79_vm2 = vcmp.ge.s32.totalorder %v5209_v36, 4 }
 0x2a3   :  { %v1891_v20 = vrot.slane %v1890_v16, 1  ;;  %v1908_v29 = vadd.f32 %v1907_v49, %v1906_v31  ;;  %2268 = vmatpush.msra.mxu1 %v2026_v62 }
 0x2a5   :  { %v1892_v41 = vadd.f32 %v1891_v20, %v1890_v16  ;;  %v1909_v11 = vrot.slane %v1908_v29, 1  ;;  %2270 = vmatpush.msra.mxu1 %v2028_v0  ;;  %v1954_v16 = vpop.permute.xlu2 %1953 }
 0x2a7   :  { %v4591_v54 = vmul.f32 0.03125, %v1892_v41  ;;  %v1910_v45 = vadd.f32 %v1909_v11, %v1908_v29  ;;  %v1950_v11 = vpop.permute.xlu0 %1949 }
 0x2a9   :  { %v1911_v56 = vmul.f32 0.03125, %v1910_v45  ;;  %v1912_v33 = vmul.f32 %v4591_v54, %v4591_v54 }
 0x2ab   :  { %v1913_v55 = vsub.f32 %v1911_v56, %v1912_v33 }
 0x2ad   :  { %v1915_v34 = vmax.f32 %v1913_v55, 0.0 }
 0x2af   :  { %v1916_v28 = vadd.f32 1e-05, %v1915_v34  ;;  %v5207_v34 = vld [vmem:[#allocation6_spill] sm:$0xff] }
 0x2b0   :  { %vm77_vm15 = vcmp.ge.s32.totalorder %v5207_v34, 4 }
 0x2b1   :  { %3972 = vrsqrt.f32 %v1916_v28  ;;  %vm1923_vm13 = vweird.f32 %v1916_v28 }
 0x2b7   :  { %v3973_v63 = vpop.eup %3972 }
 0x2b8   :  { %v1918_v5 = vmul.f32 %v3973_v63, %v1916_v28  ;;  %vm1924_vm12 = vweird.f32 %v3973_v63  ;;  %v5208_v28 = vld [vmem:[#allocation5_spill] sm:$0xff] }
 0x2b9   :  { %vm1925_vm14 = vmor %vm1923_vm13, %vm1924_vm12  ;;  %vm1977_vm0 = vcmp.lt.s32.totalorder %v5208_v28, 4 }
 0x2ba   :  { %v1919_v24 = vmul.f32 %v3973_v63, %v1918_v5  ;;  %v4658_v5 = vand.u32 4294901760, %v1972_v40 }
 0x2bc   :  { %v1920_v6 = vmul.f32 0.5, %v1919_v24  ;;  %2313 = vmatpush.msra.mxu2 %v4658_v5  ;;  %v2366_v24 = vsub.f32 %v1972_v40, %v4658_v5 }
 0x2be   :  { %v1921_v37 = vsub.f32 1.5, %v1920_v6  ;;  %2315 = vmatpush.msra.mxu2 %v4660_v42 }
 0x2c0   :  { %v1922_v14 = vmul.f32 %v3973_v63, %v1921_v37  ;;  %v2367_v37 = vand.u32 4294901760, %v2366_v24  ;;  %2317 = vmatpush.msra.mxu2 %v4662_v59 }
 0x2c2   :  { %v1926_v10 = vsel %vm1925_vm14, %v3973_v63, %v1922_v14  ;;  %v4677_v14 = vand.u32 4294901760, %v1969_v46 }
 0x2c3   :  { %v1927_v26 = vmul.f32 %v1926_v10, %v1914_v12  ;;  %v2373_v12 = vand.u32 4294901760, %v2372_v52 }
 0x2c4   :  { %2319 = vmatpush.msra.mxu2 %v4677_v14 }
 0x2c5   :  { %v1929_v4 = vmul.f32 %v1927_v26, %v4591_v54  ;;  %v1931_v38 = vperm.slane %v1927_v26, 0  ;;  %v1952_v54 = vpop.permute.xlu1 %1951  ;;  %v2368_v26 = vsub.f32 %v2366_v24, %v2367_v37 }
 0x2c7   :  { %v1930_v15 = vsub.f32 %v1928_v23, %v1929_v4  ;;  %v1932_v22 = vmul.f32 %v1931_v38, %v4563_v3  ;;  %v1935_v39 = vmul.f32 %v1931_v38, %v4584_v13  ;;  %v1933_v9 = vmul.f32 %v1931_v38, %v4560_v27 }
 0x2c8   :  { %v1934_v2 = vmul.f32 %v1931_v38, %v4565_v44  ;;  %v2374_v4 = vsub.f32 %v2372_v52, %v2373_v12 }
 0x2c9   :  { %v1936_v17 = vperm.slane %v1930_v15, 0 }
 0x2cb   :  { %v1940_v18 = vadd.f32 %v1936_v17, %v1935_v39  ;;  %v1937_v32 = vadd.f32 %v1936_v17, %v1932_v22  ;;  %v1938_v25 = vadd.f32 %v1936_v17, %v1933_v9  ;;  %v1939_v31 = vadd.f32 %v1936_v17, %v1934_v2 }
 0x2cc   :  { %v2369_v22 = vand.u32 4294901760, %v2368_v26  ;;  %v2375_v17 = vand.u32 4294901760, %v2374_v4  ;;  %v2384_v9 = vsub.f32 %v1969_v46, %v4677_v14  ;;  %v2592_v4 = vld [vmem:[%s5169_s1 + $0xa8] sm:$0xff] }
 0x2cd   :  { %v1944_v49 = vmax.f32 %v1940_v18, 0.0  ;;  %v1941_v20 = vmax.f32 %v1937_v32, 0.0  ;;  %v1942_v29 = vmax.f32 %v1938_v25, 0.0  ;;  %v1943_v41 = vmax.f32 %v1939_v31, 0.0 }
 0x2ce   :  { %2370 = vmatpush.msra.mxu3 %v2369_v22  ;;  %v2385_v25 = vand.u32 4294901760, %v2384_v9 }
 0x2cf   :  { %v1964_v3 = vadd.f32 %v1956_v47, %v1944_v49  ;;  %v1961_v45 = vadd.f32 %v1950_v11, %v1941_v20  ;;  %v1962_v13 = vadd.f32 %v1952_v54, %v1942_v29  ;;  %v1963_v56 = vadd.f32 %v1954_v16, %v1943_v41 }
 0x2d0   :  { %v2379_v47 = vand.u32 4294901760, %v2378_v61  ;;  %2376 = vmatpush.msra.mxu3 %v2375_v17  ;;  %v2386_v41 = vsub.f32 %v2384_v9, %v2385_v25 }
 0x2d1   :  { %v4618_v33 = vmax.f32 %v1964_v3, 0.0  ;;  %v4620_v27 = vmax.f32 %v1961_v45, 0.0  ;;  %v4622_v44 = vmax.f32 %v1962_v13, 0.0  ;;  %v4624_v55 = vmax.f32 %v1963_v56, 0.0 }
 0x2d2   :  { %v2380_v39 = vsub.f32 %v2378_v61, %v2379_v47  ;;  %v2387_v13 = vand.u32 4294901760, %v2386_v41 }
 0x2d3   :  { %v1973_v7 = vrot.slane %v4620_v27, 4  ;;  %v1976_v50 = vrot.slane %v4618_v33, 4  ;;  %v1974_v35 = vrot.slane %v4622_v44, 4  ;;  %v1975_v58 = vrot.slane %v4624_v55, 4 }
 0x2d4   :  { %v2578_v18 = vrot.slane %v4620_v27, 6  ;;  %v2381_v32 = vand.u32 4294901760, %v2380_v39  ;;  %v2581_v31 = vrot.slane %v4618_v33, 6  ;;  %v2579_v20 = vrot.slane %v4622_v44, 6 }
 0x2d5   :  { %v1981_v62 = vsel %vm1977_vm0, %v1976_v50, %v1973_v7  ;;  %v1980_v48 = vsel %vm1977_vm0, %v1973_v7, %v1974_v35  ;;  %v1979_v0 = vsel %vm1977_vm0, %v1974_v35, %v1975_v58  ;;  %v1978_v2 = vsel %vm1977_vm0, %v1975_v58, %v1976_v50 }
 0x2d6   :  { %v1990_v21 = vsel %vm77_vm15, %v1981_v62, 0.0  ;;  %v2002_v51 = vsel %vm904_vm8, %v1980_v48, 0  ;;  %v1992_v57 = vsel %vm79_vm2, %v1979_v0, 0.0  ;;  %v2008_v29 = vsel %vm904_vm8, %v1978_v2, 0  ;;  %2382 = vmatpush.msra.mxu3 %v2381_v32  ;;  %v2591_v2 = vld [vmem:[%s5169_s1 + $0xa0] sm:$0xff] }
 0x2d7   :  { %v1999_v8 = vsel %vm904_vm8, %v1990_v21, 0  ;;  %v4656_v43 = vand.u32 4294901760, %v2002_v51  ;;  %v2005_v60 = vsel %vm904_vm8, %v1992_v57, 0  ;;  %v4697_v11 = vsel %vm86_vm1, %v2581_v31, %v2578_v18 }
 0x2d8   :  { %v4654_v63 = vand.u32 4294901760, %v1999_v8  ;;  %v4680_v23 = vand.u32 4294901760, %v2005_v60  ;;  %v2580_v54 = vrot.slane %v4624_v55, 6  ;;  %v4702_v3 = vsel %vm86_vm1, %v2578_v18, %v2579_v20  ;;  %2388 = vmatpush.msra.mxu3 %v2387_v13 }
 0x2d9   :  { %v2039_v19 = vsub.f32 %v2002_v51, %v4656_v43  ;;  %v2289_v45 = vsel %vm904_vm8, %v4620_v27, 0  ;;  %v4706_v50 = vand.u32 4294901760, %v2008_v29  ;;  %v2292_v40 = vsel %vm904_vm8, %v4622_v44, 0 }
 0x2da   :  { %2100 = vmatmul.f32.vlgmr.msrb.gmra.mxu1 %v4654_v63  ;;  %v2031_v53 = vsub.f32 %v1999_v8, %v4654_v63  ;;  %v2047_v49 = vsub.f32 %v2005_v60, %v4680_v23  ;;  %v4710_v35 = vsel %vm86_vm1, %v2579_v20, %v2580_v54  ;;  %v4714_v58 = vsel %vm86_vm1, %v2580_v54, %v2581_v31  ;;  %v2590_v31 = vld [vmem:[%s5169_s1 + $0x98] sm:$0xff] }
 0x2db   :  { %2464 = vmatpush.msrb.mxu1 %v4658_v5  ;;  %v2040_v15 = vand.u32 4294901760, %v2039_v19  ;;  %v4717_v27 = vand.u32 4294901760, %v2289_v45  ;;  %v2055_v48 = vsub.f32 %v2008_v29, %v4706_v50  ;;  %v4731_v1 = vand.u32 4294901760, %v2292_v40 }
 0x2dc   :  { %2142 = vmatmul.f32.vlgmr.msrb.gmra.mxu2 %v2031_v53  ;;  %v2032_v6 = vand.u32 4294901760, %v2031_v53  ;;  %v2048_v7 = vand.u32 4294901760, %v2047_v49  ;;  %v2622_v32 = vand.u32 4294901760, %v2591_v2  ;;  %v2586_v13 = vsel %vm73_vm3, %v4697_v11, 0.0 }
 0x2dd   :  { %2466 = vmatpush.msrb.mxu1 %v4660_v42  ;;  %v2041_v16 = vsub.f32 %v2039_v19, %v2040_v15  ;;  %2511 = vmatpush.msrb.mxu2 %v2367_v37  ;;  %v4723_v0 = vsub.f32 %v2289_v45, %v4717_v27  ;;  %v2056_v51 = vand.u32 4294901760, %v2055_v48  ;;  %v4737_v57 = vsub.f32 %v2292_v40, %v4731_v1  ;;  %v2593_v37 = vld [vmem:[%s5169_s1 + $0xb0] sm:$0xff] }
 0x2de   :  { %2184 = vmatmul.f32.vlgmr.msrb.gmra.mxu3 %v2032_v6  ;;  %v2033_v10 = vsub.f32 %v2031_v53, %v2032_v6  ;;  %v2049_v62 = vsub.f32 %v2047_v49, %v2048_v7 }
 0x2df   :  { %2468 = vmatpush.msrb.mxu1 %v4662_v59  ;;  %v2042_v56 = vand.u32 4294901760, %v2041_v16  ;;  %2515 = vmatpush.msrb.mxu2 %v2373_v12  ;;  %v2322_v30 = vand.u32 4294901760, %v4723_v0  ;;  %v2057_v8 = vsub.f32 %v2055_v48, %v2056_v51  ;;  %v2330_v53 = vand.u32 4294901760, %v4737_v57 }
 0x2e0   :  { %v2034_v38 = vand.u32 4294901760, %v2033_v10  ;;  %2554 = vmatpush.msrb.mxu3 %v4658_v5  ;;  %v2050_v21 = vand.u32 4294901760, %v2049_v62  ;;  %v2295_v5 = vsel %vm904_vm8, %v4624_v55, 0  ;;  %v2298_v55 = vsel %vm904_vm8, %v4618_v33, 0 }
 0x2e1   :  { %2470 = vmatpush.msrb.mxu1 %v4677_v14  ;;  %2519 = vmatpush.msrb.mxu2 %v2379_v47  ;;  %v2323_v44 = vsub.f32 %v4723_v0, %v2322_v30  ;;  %v2331_v46 = vsub.f32 %v4737_v57, %v2330_v53  ;;  %v2624_v16 = vand.u32 4294901760, %v2590_v31 }
 0x2e2   :  { %2035 = vmatmul.f32.vlgmr.msrb.gmra.mxu0 %v2034_v38  ;;  %2104 = vmatmul.f32.gmra.mxu1 %v4656_v43 }
 0x2e3   :  { %2420 = vmatpush.msrb.mxu0 %v2366_v24  ;;  %2556 = vmatpush.msrb.mxu3 %v4660_v42  ;;  %v2058_v42 = vand.u32 4294901760, %v2057_v8  ;;  %v4743_v24 = vand.u32 4294901760, %v2295_v5  ;;  %v2690_v20 = vsub.f32 %v2590_v31, %v2624_v16 }
 0x2e4   :  { %2147 = vmatmul.f32.gmra.mxu2 %v2039_v19  ;;  %v4757_v19 = vand.u32 4294901760, %v2298_v55 }
 0x2e5   :  { %2423 = vmatpush.msrb.mxu0 %v2372_v52  ;;  %2523 = vmatpush.msrb.mxu2 %v2385_v25  ;;  %v4750_v60 = vsub.f32 %v2295_v5, %v4743_v24  ;;  %v2332_v52 = vand.u32 4294901760, %v2331_v46  ;;  %v2684_v25 = vsub.f32 %v2591_v2, %v2622_v32  ;;  %v2691_v41 = vand.u32 4294901760, %v2690_v20 }
 0x2e6   :  { %2190 = vmatmul.f32.gmra.mxu3 %v2040_v15  ;;  %v2620_v15 = vand.u32 4294901760, %v2592_v4 }
 0x2e7   :  { %2426 = vmatpush.msrb.mxu0 %v2378_v61  ;;  %2558 = vmatpush.msrb.mxu3 %v4662_v59  ;;  %v2324_v59 = vand.u32 4294901760, %v2323_v44  ;;  %v2338_v6 = vand.u32 4294901760, %v4750_v60  ;;  %v2618_v61 = vand.u32 4294901760, %v2593_v37  ;;  %v2692_v54 = vsub.f32 %v2690_v20, %v2691_v41 }
 0x2e8   :  { %v2678_v22 = vsub.f32 %v2592_v4, %v2620_v15  ;;  %v2604_v44 = vsel %vm904_vm8, %v4714_v58, 0 }
 0x2e9   :  { %2429 = vmatpush.msrb.mxu0 %v2384_v9  ;;  %2560 = vmatpush.msrb.mxu3 %v4677_v14  ;;  %v2672_v12 = vsub.f32 %v2593_v37, %v2618_v61  ;;  %v2339_v33 = vsub.f32 %v4750_v60, %v2338_v6  ;;  %v2693_v45 = vand.u32 4294901760, %v2692_v54  ;;  %v2650_v5 = vand.u32 4294901760, %v2604_v44 }
 0x2ea   :  { %2043 = vmatmul.f32.gmra.mxu0 %v2042_v56  ;;  %2108 = vmatmul.f32.gmra.mxu1 %v4680_v23  ;;  %v2679_v39 = vand.u32 4294901760, %v2678_v22  ;;  %v2595_v56 = vsel %vm904_vm8, %v2586_v13, 0 }
 0x2eb   :  { %v2673_v14 = vand.u32 4294901760, %v2672_v12  ;;  %v2340_v26 = vand.u32 4294901760, %v2339_v33 }
 0x2ec   :  { %2152 = vmatmul.f32.gmra.mxu2 %v2047_v49  ;;  %v2680_v17 = vsub.f32 %v2678_v22, %v2679_v39 }
 0x2ed   :  { %v2674_v10 = vsub.f32 %v2672_v12, %v2673_v14 }
 0x2ee   :  { %2196 = vmatmul.f32.gmra.mxu3 %v2048_v7  ;;  %v2681_v18 = vand.u32 4294901760, %v2680_v17  ;;  %v2626_v7 = vand.u32 4294901760, %v2595_v56 }
 0x2ef   :  { %v2675_v38 = vand.u32 4294901760, %v2674_v10 }
 0x2f2   :  { %2051 = vmatmul.f32.gmra.mxu0 %v2050_v21  ;;  %2112 = vmatmul.f32.gmra.mxu1 %v4706_v50 }
 0x2f4   :  { %2157 = vmatmul.f32.gmra.mxu2 %v2055_v48  ;;  %v2588_v48 = vsel %vm75_vm4, %v4710_v35, 0.0 }
 0x2f5   :  { %v2601_v21 = vsel %vm904_vm8, %v2588_v48, 0 }
 0x2f6   :  { %2202 = vmatmul.f32.gmra.mxu3 %v2056_v51 }
 0x2fa   :  { %2059 = vmatmul.f32.gmra.mxu0 %v2058_v42  ;;  %2272 = vmatmul.f32.vlgmr.msra.gmra.mxu1 %v4654_v63 }
 0x2fb   :  { %2676 = vmatpush.msra.mxu1 %v2675_v38 }
 0x2fc   :  { %2325 = vmatmul.f32.vlgmr.msra.gmra.mxu2 %v2324_v59  ;;  %v2651_v59 = vsub.f32 %v2604_v44, %v2650_v5 }
 0x2fd   :  { %2726 = vmatpush.msra.mxu2 %v2672_v12  ;;  %2682 = vmatpush.msra.mxu1 %v2681_v18 }
 0x2fe   :  { %2390 = vmatmul.f32.vlgmr.msra.gmra.mxu3 %v4717_v27 }
 0x2ff   :  { %2770 = vmatpush.msra.mxu3 %v2618_v61  ;;  %2729 = vmatpush.msra.mxu2 %v2678_v22 }
 0x301   :  { %2772 = vmatpush.msra.mxu3 %v2620_v15  ;;  %2732 = vmatpush.msra.mxu2 %v2684_v25 }
 0x302   :  { %2235 = vmatmul.f32.vlgmr.msra.gmra.mxu0 %v4654_v63  ;;  %2276 = vmatmul.f32.gmra.mxu1 %v4656_v43  ;;  %v4767_v63 = vsub.f32 %v2298_v55, %v4757_v19 }
 0x303   :  { %2619 = vmatpush.msra.mxu0 %v2618_v61  ;;  %2774 = vmatpush.msra.mxu3 %v2622_v32 }
 0x304   :  { %2333 = vmatmul.f32.gmra.mxu2 %v2332_v52  ;;  %v2346_v47 = vand.u32 4294901760, %v4767_v63 }
 0x305   :  { %2621 = vmatpush.msra.mxu0 %v2620_v15  ;;  %2776 = vmatpush.msra.mxu3 %v2624_v16 }
 0x306   :  { %2394 = vmatmul.f32.gmra.mxu3 %v4731_v1  ;;  %2735 = vmatpush.msra.mxu2 %v2690_v20 }
 0x307   :  { %2623 = vmatpush.msra.mxu0 %v2622_v32 }
 0x309   :  { %2625 = vmatpush.msra.mxu0 %v2624_v16 }
 0x30a   :  { %2239 = vmatmul.f32.gmra.mxu0 %v4656_v43  ;;  %2280 = vmatmul.f32.gmra.mxu1 %v4680_v23  ;;  %v2347_v43 = vsub.f32 %v4767_v63, %v2346_v47 }
 0x30c   :  { %2341 = vmatmul.f32.gmra.mxu2 %v2340_v26  ;;  %v2348_v9 = vand.u32 4294901760, %v2347_v43 }
 0x30e   :  { %2398 = vmatmul.f32.gmra.mxu3 %v4743_v24 }
 0x312   :  { %2243 = vmatmul.f32.gmra.mxu0 %v4680_v23  ;;  %2284 = vmatmul.f32.gmra.mxu1 %v4706_v50  ;;  %v2685_v23 = vand.u32 4294901760, %v2684_v25 }
 0x314   :  { %2349 = vmatmul.f32.gmra.mxu2 %v2348_v9  ;;  %v2686_v49 = vsub.f32 %v2684_v25, %v2685_v23  ;;  %v3969_v9 = vld [vmem:[%s5169_s1 + $0x141] ss:$0 sm:$0xff] }
 0x315   :  { %3937 = vrot.lane.b32.xlu2 %v3969_v9, %s4004_s24 }
 0x316   :  { %2402 = vmatmul.f32.gmra.mxu3 %v4757_v19  ;;  %v2687_v29 = vand.u32 4294901760, %v2686_v49 }
 0x318   :  { %2688 = vmatpush.msra.mxu1 %v2687_v29 }
 0x31a   :  { %2247 = vmatmul.f32.gmra.mxu0 %v4706_v50  ;;  %2474 = vmatmul.f32.vlgmr.msrb.gmra.mxu1 %v2322_v30  ;;  %v2627_v50 = vsub.f32 %v2595_v56, %v2626_v7 }
 0x31b   :  { %2694 = vmatpush.msra.mxu1 %v2693_v45 }
 0x31c   :  { %2525 = vmatmul.f32.vlgmr.msrb.gmra.mxu2 %v4717_v27  ;;  %v2628_v11 = vand.u32 4294901760, %v2627_v50 }
 0x31d   :  { %2860 = vmatpush.msrb.mxu1 %v2618_v61 }
 0x31e   :  { %2562 = vmatmul.f32.vlgmr.msrb.gmra.mxu3 %v4717_v27  ;;  %v2598_v27 = vsel %vm904_vm8, %v4702_v3, 0  ;;  %v2642_v3 = vand.u32 4294901760, %v2601_v21 }
 0x31f   :  { %2862 = vmatpush.msrb.mxu1 %v2620_v15  ;;  %v2634_v62 = vand.u32 4294901760, %v2598_v27 }
 0x320   :  { %v2643_v8 = vsub.f32 %v2601_v21, %v2642_v3 }
 0x321   :  { %2864 = vmatpush.msrb.mxu1 %v2622_v32  ;;  %v2635_v40 = vsub.f32 %v2598_v27, %v2634_v62 }
 0x322   :  { %2432 = vmatmul.f32.vlgmr.msrb.gmra.mxu0 %v4723_v0  ;;  %2480 = vmatmul.f32.gmra.mxu1 %v2330_v53  ;;  %v2629_v0 = vsub.f32 %v2627_v50, %v2628_v11  ;;  %v2644_v35 = vand.u32 4294901760, %v2643_v8 }
 0x323   :  { %2817 = vmatpush.msrb.mxu0 %v2673_v14  ;;  %2866 = vmatpush.msrb.mxu1 %v2624_v16  ;;  %v2636_v30 = vand.u32 4294901760, %v2635_v40 }
 0x324   :  { %2529 = vmatmul.f32.gmra.mxu2 %v4731_v1  ;;  %v2630_v51 = vand.u32 4294901760, %v2629_v0  ;;  %v2645_v42 = vsub.f32 %v2643_v8, %v2644_v35 }
 0x325   :  { %2821 = vmatpush.msrb.mxu0 %v2679_v39 }
 0x326   :  { %2566 = vmatmul.f32.gmra.mxu3 %v4731_v1  ;;  %v2637_v1 = vsub.f32 %v2635_v40, %v2636_v30  ;;  %v2646_v53 = vand.u32 4294901760, %v2645_v42 }
 0x327   :  { %2825 = vmatpush.msrb.mxu0 %v2685_v23 }
 0x329   :  { %2829 = vmatpush.msrb.mxu0 %v2691_v41 }
 0x32a   :  { %2437 = vmatmul.f32.gmra.mxu0 %v4737_v57  ;;  %2486 = vmatmul.f32.gmra.mxu1 %v2338_v6  ;;  %v2638_v57 = vand.u32 4294901760, %v2637_v1 }
 0x32c   :  { %2533 = vmatmul.f32.gmra.mxu2 %v4743_v24 }
 0x32e   :  { %2570 = vmatmul.f32.gmra.mxu3 %v4743_v24  ;;  %v2652_v24 = vand.u32 4294901760, %v2651_v59 }
 0x330   :  { %v2653_v46 = vsub.f32 %v2651_v59, %v2652_v24 }
 0x332   :  { %2442 = vmatmul.f32.gmra.mxu0 %v4750_v60  ;;  %2492 = vmatmul.f32.gmra.mxu1 %v2346_v47  ;;  %v2654_v58 = vand.u32 4294901760, %v2653_v46 }
 0x334   :  { %2537 = vmatmul.f32.gmra.mxu2 %v4757_v19 }
 0x336   :  { %2574 = vmatmul.f32.gmra.mxu3 %v4757_v19 }
 0x33a   :  { %2447 = vmatmul.f32.gmra.mxu0 %v4767_v63  ;;  %2696 = vmatmul.f32.vlgmr.msra.gmra.mxu1 %v2626_v7 }
 0x33c   :  { %2738 = vmatmul.f32.vlgmr.msra.gmra.mxu2 %v2627_v50 }
 0x33e   :  { %2780 = vmatmul.f32.vlgmr.msra.gmra.mxu3 %v2628_v11 }
 0x342   :  { %2631 = vmatmul.f32.vlgmr.msra.gmra.mxu0 %v2630_v51  ;;  %2700 = vmatmul.f32.gmra.mxu1 %v2634_v62 }
 0x344   :  { %2743 = vmatmul.f32.gmra.mxu2 %v2635_v40 }
 0x346   :  { %2786 = vmatmul.f32.gmra.mxu3 %v2636_v30 }
 0x34a   :  { %2639 = vmatmul.f32.gmra.mxu0 %v2638_v57  ;;  %2704 = vmatmul.f32.gmra.mxu1 %v2642_v3 }
 0x34c   :  { %2748 = vmatmul.f32.gmra.mxu2 %v2643_v8 }
 0x34e   :  { %2792 = vmatmul.f32.gmra.mxu3 %v2644_v35 }
 0x352   :  { %2647 = vmatmul.f32.gmra.mxu0 %v2646_v53  ;;  %2708 = vmatmul.f32.gmra.mxu1 %v2650_v5 }
 0x354   :  { %2753 = vmatmul.f32.gmra.mxu2 %v2651_v59 }
 0x356   :  { %2798 = vmatmul.f32.gmra.mxu3 %v2652_v24 }
 0x357   :  { %v4821_v60 = vpop.f32.mrf.mxu1 }
 0x35a   :  { %2655 = vmatmul.f32.gmra.mxu0 %v2654_v58  ;;  %2868 = vmatmul.f32.vlgmr.msrb.gmra.mxu1 %v2626_v7 }
 0x35f   :  { %v2036_v55 = vpop.f32.mrf.mxu0  ;;  %v2105_v52 = vpop.f32.mrf.mxu1 }
 0x360   :  { %v4823_v6 = vpop.f32.mrf.mxu2 }
 0x361   :  { %v4825_v19 = vpop.f32.mrf.mxu3 }
 0x362   :  { %2831 = vmatmul.f32.vlgmr.msrb.gmra.mxu0 %v2626_v7  ;;  %2872 = vmatmul.f32.gmra.mxu1 %v2634_v62 }
 0x367   :  { %v2044_v37 = vpop.f32.mrf.mxu0  ;;  %v2109_v61 = vpop.f32.mrf.mxu1 }
 0x368   :  { %v2148_v12 = vpop.f32.mrf.mxu2  ;;  %v2106_v35 = vadd.f32 %v2105_v52, %v2044_v37 }
 0x369   :  { %v2191_v33 = vpop.f32.mrf.mxu3 }
 0x36a   :  { %2835 = vmatmul.f32.gmra.mxu0 %v2634_v62  ;;  %2876 = vmatmul.f32.gmra.mxu1 %v2642_v3  ;;  %v2149_v24 = vadd.f32 %v2148_v12, %v2106_v35 }
 0x36c   :  { %v2192_v34 = vadd.f32 %v2191_v33, %v2149_v24 }
 0x36f   :  { %v2052_v63 = vpop.f32.mrf.mxu0  ;;  %v2113_v14 = vpop.f32.mrf.mxu1 }
 0x370   :  { %v2153_v10 = vpop.f32.mrf.mxu2  ;;  %v2110_v59 = vadd.f32 %v2109_v61, %v2052_v63 }
 0x371   :  { %v2197_v26 = vpop.f32.mrf.mxu3 }
 0x372   :  { %2839 = vmatmul.f32.gmra.mxu0 %v2642_v3  ;;  %2880 = vmatmul.f32.gmra.mxu1 %v2650_v5  ;;  %v2154_v9 = vadd.f32 %v2153_v10, %v2110_v59 }
 0x377   :  { %v2060_v47 = vpop.f32.mrf.mxu0  ;;  %v2273_v4 = vpop.f32.mrf.mxu1 }
 0x378   :  { %v2158_v38 = vpop.f32.mrf.mxu2 }
 0x379   :  { %v2203_v15 = vpop.f32.mrf.mxu3 }
 0x37a   :  { %2843 = vmatmul.f32.gmra.mxu0 %v2650_v5  ;;  %v2102_v5 = vadd.f32 %v4821_v60, %v2036_v55 }
 0x37c   :  { %v2144_v46 = vadd.f32 %v4823_v6, %v2102_v5 }
 0x37e   :  { %v2186_v28 = vadd.f32 %v4825_v19, %v2144_v46 }
 0x37f   :  { %v2236_v22 = vpop.f32.mrf.mxu0  ;;  %v2277_v43 = vpop.f32.mrf.mxu1 }
 0x380   :  { %v2326_v39 = vpop.f32.mrf.mxu2 }
 0x381   :  { %v4827_v17 = vpop.f32.mrf.mxu3 }
 0x387   :  { %v2240_v2 = vpop.f32.mrf.mxu0  ;;  %v2281_v18 = vpop.f32.mrf.mxu1 }
 0x388   :  { %v2334_v32 = vpop.f32.mrf.mxu2 }
 0x389   :  { %v2395_v23 = vpop.f32.mrf.mxu3 }
 0x38f   :  { %v2244_v25 = vpop.f32.mrf.mxu0  ;;  %v4833_v31 = vpop.f32.mrf.mxu1 }
 0x390   :  { %v2342_v16 = vpop.f32.mrf.mxu2 }
 0x391   :  { %v2399_v29 = vpop.f32.mrf.mxu3 }
 0x397   :  { %v2248_v49 = vpop.f32.mrf.mxu0  ;;  %v4835_v20 = vpop.f32.mrf.mxu1 }
 0x398   :  { %v4839_v45 = vpop.f32.mrf.mxu2 }
 0x399   :  { %v4841_v13 = vpop.f32.mrf.mxu3 }
 0x39f   :  { %v2433_v41 = vpop.f32.mrf.mxu0  ;;  %v4837_v54 = vpop.f32.mrf.mxu1 }
 0x3a0   :  { %v4845_v50 = vpop.f32.mrf.mxu2 }
 0x3a1   :  { %v4847_v27 = vpop.f32.mrf.mxu3 }
 0x3a2   :  { %5210 = vst [vmem:[#allocation10_spill] sm:$0xff] %v4847_v27  ;;  %v2241_v27 = vadd.f32 %v2240_v2, %v2192_v34 }
 0x3a7   :  { %v2438_v56 = vpop.f32.mrf.mxu0  ;;  %v4843_v7 = vpop.f32.mrf.mxu1 }
 0x3a8   :  { %v4851_v48 = vpop.f32.mrf.mxu2 }
 0x3a9   :  { %v4855_v21 = vpop.f32.mrf.mxu3 }
 0x3af   :  { %v2443_v11 = vpop.f32.mrf.mxu0  ;;  %v4849_v62 = vpop.f32.mrf.mxu1 }
 0x3b0   :  { %5211 = vst [vmem:[#allocation9_spill] sm:$0xff] %v4849_v62  ;;  %v4857_v51 = vpop.f32.mrf.mxu2  ;;  %v2198_v62 = vadd.f32 %v2197_v26, %v2154_v9 }
 0x3b1   :  { %v4859_v1 = vpop.f32.mrf.mxu3 }
 0x3b2   :  { %5212 = vst [vmem:[#allocation8_spill] sm:$0xff] %v4859_v1  ;;  %v2114_v1 = vadd.f32 %v2113_v14, %v2060_v47  ;;  %v2245_v60 = vadd.f32 %v2244_v25, %v2198_v62 }
 0x3b4   :  { %v2159_v55 = vadd.f32 %v2158_v38, %v2114_v1  ;;  %v2282_v12 = vadd.f32 %v2281_v18, %v2245_v60 }
 0x3b6   :  { %v2204_v35 = vadd.f32 %v2203_v15, %v2159_v55  ;;  %v2343_v24 = vadd.f32 %v2342_v16, %v2282_v12 }
 0x3b7   :  { %v4853_v0 = vpop.f32.mrf.mxu0  ;;  %v2697_v40 = vpop.f32.mrf.mxu1 }
 0x3b8   :  { %v4861_v57 = vpop.f32.mrf.mxu2  ;;  %v2249_v59 = vadd.f32 %v2248_v49, %v2204_v35  ;;  %v2400_v38 = vadd.f32 %v2399_v29, %v2343_v24 }
 0x3b9   :  { %5213 = vst [vmem:[#allocation11_spill] sm:$0xff] %v4861_v57  ;;  %v4864_v42 = vpop.f32.mrf.mxu3  ;;  %v2237_v57 = vadd.f32 %v2236_v22, %v2186_v28  ;;  %v5217_v9 = vld [vmem:[#allocation8_spill] sm:$0xff] }
 0x3ba   :  { %5214 = vst [vmem:[#allocation12_spill] sm:$0xff] %v4864_v42  ;;  %v2278_v42 = vadd.f32 %v2277_v43, %v2241_v27  ;;  %v2286_v47 = vadd.f32 %v4833_v31, %v2249_v59  ;;  %v2444_v15 = vadd.f32 %v2443_v11, %v2400_v38 }
 0x3bb   :  { %v2274_v61 = vadd.f32 %v2273_v4, %v2237_v57 }
 0x3bc   :  { %v2335_v5 = vadd.f32 %v2334_v32, %v2278_v42 }
 0x3bd   :  { %v2327_v10 = vadd.f32 %v2326_v39, %v2274_v61  ;;  %v2351_v39 = vadd.f32 %v4839_v45, %v2286_v47 }
 0x3be   :  { %v2396_v26 = vadd.f32 %v2395_v23, %v2335_v5 }
 0x3bf   :  { %v2632_v30 = vpop.f32.mrf.mxu0  ;;  %v2701_v3 = vpop.f32.mrf.mxu1  ;;  %v2392_v28 = vadd.f32 %v4827_v17, %v2327_v10  ;;  %v2488_v17 = vadd.f32 %v4843_v7, %v2444_v15 }
 0x3c0   :  { %v2739_v36 = vpop.f32.mrf.mxu2  ;;  %v2698_v34 = vadd.f32 %v2697_v40, %v2632_v30  ;;  %v2439_v22 = vadd.f32 %v2438_v56, %v2396_v26 }
 0x3c1   :  { %v2781_v52 = vpop.f32.mrf.mxu3  ;;  %v2434_v43 = vadd.f32 %v2433_v41, %v2392_v28  ;;  %v2404_v41 = vadd.f32 %v4841_v13, %v2351_v39  ;;  %v5215_v13 = vld [vmem:[#allocation10_spill] sm:$0xff]  ;;  %v5219_v59 = vld [vmem:[#allocation12_spill] sm:$0xff] }
 0x3c2   :  { %v2740_v18 = vadd.f32 %v2739_v36, %v2698_v34  ;;  %v2482_v49 = vadd.f32 %v4837_v54, %v2439_v22  ;;  %v2535_v54 = vadd.f32 %v4857_v51, %v2488_v17 }
 0x3c3   :  { %v2476_v27 = vadd.f32 %v4835_v20, %v2434_v43  ;;  %v2449_v40 = vadd.f32 %v4853_v0, %v2404_v41 }
 0x3c4   :  { %v2782_v31 = vadd.f32 %v2781_v52, %v2740_v18  ;;  %v2531_v36 = vadd.f32 %v4851_v48, %v2482_v49  ;;  %v3938_v18 = vpop.permute.xlu2 %3937 }
 0x3c5   :  { %v2527_v45 = vadd.f32 %v4845_v50, %v2476_v27  ;;  %v2572_v50 = vadd.f32 %v5217_v9, %v2535_v54  ;;  %v2969_v9 = vld [vmem:[%s5169_s1 + $0xd8] sm:$0xff] }
 0x3c7   :  { %v2640_v8 = vpop.f32.mrf.mxu0  ;;  %v2705_v44 = vpop.f32.mrf.mxu1  ;;  %v2564_v42 = vadd.f32 %v5215_v13, %v2527_v45  ;;  %v2971_v13 = vld [vmem:[%s5169_s1 + $0xe8] sm:$0xff] }
 0x3c8   :  { %v2744_v6 = vpop.f32.mrf.mxu2  ;;  %v2702_v19 = vadd.f32 %v2701_v3, %v2640_v8  ;;  %v2568_v8 = vadd.f32 %v4855_v21, %v2531_v36 }
 0x3c9   :  { %v2787_v14 = vpop.f32.mrf.mxu3 }
 0x3ca   :  { %v2745_v4 = vadd.f32 %v2744_v6, %v2702_v19 }
 0x3cc   :  { %v2788_v23 = vadd.f32 %v2787_v14, %v2745_v4 }
 0x3cf   :  { %v2648_v53 = vpop.f32.mrf.mxu0  ;;  %v2709_v58 = vpop.f32.mrf.mxu1 }
 0x3d0   :  { %v2706_v32 = vadd.f32 %v2705_v44, %v2648_v53  ;;  %v2749_v25 = vpop.f32.mrf.mxu2  ;;  %v5216_v53 = vld [vmem:[#allocation9_spill] sm:$0xff] }
 0x3d1   :  { %v2793_v62 = vpop.f32.mrf.mxu3  ;;  %v2494_v48 = vadd.f32 %v5216_v53, %v2449_v40 }
 0x3d2   :  { %v2750_v29 = vadd.f32 %v2749_v25, %v2706_v32 }
 0x3d4   :  { %v2794_v30 = vadd.f32 %v2793_v62, %v2750_v29 }
 0x3d7   :  { %v2656_v37 = vpop.f32.mrf.mxu0  ;;  %v2869_v63 = vpop.f32.mrf.mxu1 }
 0x3d8   :  { %v2710_v3 = vadd.f32 %v2709_v58, %v2656_v37  ;;  %v2754_v46 = vpop.f32.mrf.mxu2  ;;  %v5218_v37 = vld [vmem:[#allocation11_spill] sm:$0xff] }
 0x3d9   :  { %v2539_v55 = vadd.f32 %v5218_v37, %v2494_v48  ;;  %v2799_v21 = vpop.f32.mrf.mxu3  ;;  %v2999_v48 = vand.u32 4294901760, %v2971_v13 }
 0x3da   :  { %v2755_v52 = vadd.f32 %v2754_v46, %v2710_v3 }
 0x3db   :  { %v3057_v37 = vsub.f32 %v2971_v13, %v2999_v48 }
 0x3dc   :  { %v2800_v61 = vadd.f32 %v2799_v21, %v2755_v52  ;;  %v3003_v52 = vand.u32 4294901760, %v2969_v9 }
 0x3de   :  { %v3069_v21 = vsub.f32 %v2969_v9, %v3003_v52 }
 0x3df   :  { %v2832_v33 = vpop.f32.mrf.mxu0  ;;  %v2873_v2 = vpop.f32.mrf.mxu1 }
 0x3e0   :  { %v2833_v11 = vadd.f32 %v2832_v33, %v2782_v31  ;;  %v2576_v33 = vadd.f32 %v5219_v59, %v2539_v55 }
 0x3e2   :  { %v2870_v44 = vadd.f32 %v2869_v63, %v2833_v11 }
 0x3e4   :  { %v4885_v60 = vadd.f32 %v2870_v44, %v2564_v42  ;;  %v2970_v42 = vld [vmem:[%s5169_s1 + $0xe0] sm:$0xff] }
 0x3e5   :  { %v3001_v46 = vand.u32 4294901760, %v2970_v42 }
 0x3e6   :  { %v2902_v35 = vmul.f32 %v4885_v60, %v4885_v60  ;;  %v2888_v19 = vsel %vm904_vm8, %v4885_v60, 0.0 }
 0x3e7   :  { %v2836_v16 = vpop.f32.mrf.mxu0  ;;  %v2877_v1 = vpop.f32.mrf.mxu1  ;;  %v3063_v55 = vsub.f32 %v2970_v42, %v3001_v46 }
 0x3e8   :  { %v2837_v56 = vadd.f32 %v2836_v16, %v2788_v23  ;;  %v2906_v47 = vsel %vm904_vm8, %v2902_v35, 0.0  ;;  %v3070_v35 = vand.u32 4294901760, %v3069_v21 }
 0x3ea   :  { %v2874_v20 = vadd.f32 %v2873_v2, %v2837_v56 }
 0x3ec   :  { %v4883_v0 = vadd.f32 %v2874_v20, %v2568_v8 }
 0x3ee   :  { %v2903_v63 = vmul.f32 %v4883_v0, %v4883_v0  ;;  %v2889_v6 = vsel %vm904_vm8, %v4883_v0, 0.0  ;;  %v3928_v32 = vrot.slane %v4883_v0, 7 }
 0x3ef   :  { %v2840_v7 = vpop.f32.mrf.mxu0  ;;  %v2881_v24 = vpop.f32.mrf.mxu1  ;;  %v2890_v28 = vadd.f32 %v2889_v6, %v2888_v19 }
 0x3f0   :  { %v2841_v57 = vadd.f32 %v2840_v7, %v2794_v30  ;;  %v2907_v14 = vsel %vm904_vm8, %v2903_v63, 0.0  ;;  %v3058_v63 = vand.u32 4294901760, %v3057_v37 }
 0x3f1   :  { %v2908_v43 = vadd.f32 %v2907_v14, %v2906_v47 }
 0x3f2   :  { %v2878_v51 = vadd.f32 %v2877_v1, %v2841_v57  ;;  %v2972_v57 = vld [vmem:[%s5169_s1 + $0xf0] sm:$0xff] }
 0x3f3   :  { %v2997_v53 = vand.u32 4294901760, %v2972_v57 }
 0x3f4   :  { %v4887_v58 = vadd.f32 %v2878_v51, %v2572_v50 }
 0x3f5   :  { %2998 = vmatpush.msrb.mxu2 %v2997_v53  ;;  %v3051_v51 = vsub.f32 %v2972_v57, %v2997_v53  ;;  %3149 = vmatpush.msra.mxu1 %v2997_v53  ;;  %v2954_v57 = vld [vmem:[%s5169_s1 + $0x120] sm:$0xff] }
 0x3f6   :  { %v2904_v5 = vmul.f32 %v4887_v58, %v4887_v58  ;;  %v2891_v26 = vsel %vm904_vm8, %v4887_v58, 0.0 }
 0x3f7   :  { %v2844_v12 = vpop.f32.mrf.mxu0  ;;  %v2892_v4 = vadd.f32 %v2891_v26, %v2890_v28  ;;  %3000 = vmatpush.msrb.mxu2 %v2999_v48  ;;  %3105 = vmatpush.msra.mxu0 %v3051_v51 }
 0x3f8   :  { %v2845_v10 = vadd.f32 %v2844_v12, %v2800_v61  ;;  %v2909_v38 = vsel %vm904_vm8, %v2904_v5, 0.0  ;;  %v3052_v61 = vand.u32 4294901760, %v3051_v51  ;;  %v3064_v12 = vand.u32 4294901760, %v3063_v55  ;;  %3151 = vmatpush.msra.mxu1 %v2999_v48 }
 0x3f9   :  { %v2910_v25 = vadd.f32 %v2909_v38, %v2908_v43  ;;  %v3059_v5 = vsub.f32 %v3057_v37, %v3058_v63  ;;  %3002 = vmatpush.msrb.mxu2 %v3001_v46  ;;  %3108 = vmatpush.msra.mxu0 %v3057_v37 }
 0x3fa   :  { %v2882_v34 = vadd.f32 %v2881_v24, %v2845_v10  ;;  %v3053_v6 = vsub.f32 %v3051_v51, %v3052_v61  ;;  %v3065_v10 = vsub.f32 %v3063_v55, %v3064_v12  ;;  %3153 = vmatpush.msra.mxu1 %v3001_v46  ;;  %v3071_v24 = vsub.f32 %v3069_v21, %v3070_v35 }
 0x3fb   :  { %3111 = vmatpush.msra.mxu0 %v3063_v55  ;;  %3004 = vmatpush.msrb.mxu2 %v3003_v52  ;;  %v2953_v55 = vld [vmem:[%s5169_s1 + $0x118] sm:$0xff] }
 0x3fc   :  { %v4906_v22 = vadd.f32 %v2882_v34, %v2576_v33  ;;  %v3054_v59 = vand.u32 4294901760, %v3053_v6  ;;  %v3060_v33 = vand.u32 4294901760, %v3059_v5  ;;  %3155 = vmatpush.msra.mxu1 %v3003_v52  ;;  %v3066_v26 = vand.u32 4294901760, %v3065_v10 }
 0x3fd   :  { %3196 = vmatpush.msra.mxu2 %v3052_v61  ;;  %3114 = vmatpush.msra.mxu0 %v3069_v21  ;;  %v3072_v28 = vand.u32 4294901760, %v3071_v24  ;;  %v5000_v10 = vand.u32 4294901760, %v2953_v55 }
 0x3fe   :  { %v2893_v2 = vsel %vm904_vm8, %v4906_v22, 0.0  ;;  %v2905_v15 = vmul.f32 %v4906_v22, %v4906_v22  ;;  %v3931_v39 = vrot.slane %v4906_v22, 6  ;;  %3055 = vmatpush.msrb.mxu3 %v3054_v59 }
 0x3ff   :  { %v2894_v16 = vadd.f32 %v2893_v2, %v2892_v4  ;;  %3200 = vmatpush.msra.mxu2 %v3058_v63  ;;  %v2922_v4 = vld [vmem:[%s5169_s1 + $0x13d] sm:$0x1] }
 0x400   :  { %v2911_v49 = vsel %vm904_vm8, %v2905_v15, 0.0  ;;  %v3933_v23 = vsel %vm3920_vm5, %v3928_v32, %v3931_v39  ;;  %3061 = vmatpush.msrb.mxu3 %v3060_v33 }
 0x401   :  { %v2895_v27 = vrot.slane %v2894_v16, 4  ;;  %v2912_v17 = vadd.f32 %v2911_v49, %v2910_v25  ;;  %v3940_v31 = vadd.f32 %v3938_v18, %v3933_v23  ;;  %3204 = vmatpush.msra.mxu2 %v3064_v12  ;;  %v2936_v18 = vld [vmem:[%s5169_s1 + $0x13e] sm:$0x1] }
 0x402   :  { %3067 = vmatpush.msrb.mxu3 %v3066_v26 }
 0x403   :  { %v2896_v29 = vadd.f32 %v2895_v27, %v2894_v16  ;;  %v2913_v56 = vrot.slane %v2912_v17, 4  ;;  %3942 = vrot.lane.b32.xlu0 %v3940_v31, %s4005_s25  ;;  %3208 = vmatpush.msra.mxu2 %v3070_v35 }
 0x404   :  { %3073 = vmatpush.msrb.mxu3 %v3072_v28 }
 0x405   :  { %v2897_v41 = vrot.slane %v2896_v29, 2  ;;  %v2914_v62 = vadd.f32 %v2913_v56, %v2912_v17 }
 0x406   :  { %3239 = vmatpush.msra.mxu3 %v2997_v53 }
 0x407   :  { %v2898_v36 = vadd.f32 %v2897_v41, %v2896_v29  ;;  %v2915_v11 = vrot.slane %v2914_v62, 2 }
 0x408   :  { %3241 = vmatpush.msra.mxu3 %v2999_v48 }
 0x409   :  { %v2899_v45 = vrot.slane %v2898_v36, 1  ;;  %v2916_v40 = vadd.f32 %v2915_v11, %v2914_v62 }
 0x40a   :  { %3243 = vmatpush.msra.mxu3 %v3001_v46 }
 0x40b   :  { %v2900_v54 = vadd.f32 %v2899_v45, %v2898_v36  ;;  %v2917_v30 = vrot.slane %v2916_v40, 1 }
 0x40c   :  { %3245 = vmatpush.msra.mxu3 %v3003_v52  ;;  %v4985_v52 = vand.u32 4294901760, %v2954_v57 }
 0x40d   :  { %v4917_v3 = vmul.f32 0.03125, %v2900_v54  ;;  %v2918_v20 = vadd.f32 %v2917_v30, %v2916_v40 }
 0x40e   :  { %v3353_v6 = vsub.f32 %v2954_v57, %v4985_v52 }
 0x40f   :  { %v2919_v1 = vmul.f32 0.03125, %v2918_v20  ;;  %v2920_v7 = vmul.f32 %v4917_v3, %v4917_v3  ;;  %v2956_v20 = vld [vmem:[%s5169_s1 + $0x130] sm:$0xff] }
 0x410   :  { %v4981_v9 = vand.u32 4294901760, %v2956_v20  ;;  %v3354_v24 = vand.u32 4294901760, %v3353_v6 }
 0x411   :  { %v2921_v8 = vsub.f32 %v2919_v1, %v2920_v7 }
 0x412   :  { %3288 = vmatpush.msrb.mxu0 %v4981_v9  ;;  %v3341_v37 = vsub.f32 %v2956_v20, %v4981_v9 }
 0x413   :  { %v2923_v44 = vmax.f32 %v2921_v8, 0.0 }
 0x414   :  { %v3342_v35 = vand.u32 4294901760, %v3341_v37 }
 0x415   :  { %v2924_v50 = vadd.f32 1e-05, %v2923_v44  ;;  %v2955_v44 = vld [vmem:[%s5169_s1 + $0x128] sm:$0xff] }
 0x416   :  { %v3343_v33 = vsub.f32 %v3341_v37, %v3342_v35 }
 0x417   :  { %3974 = vrsqrt.f32 %v2924_v50  ;;  %vm2931_vm7 = vweird.f32 %v2924_v50 }
 0x418   :  { %v3344_v28 = vand.u32 4294901760, %v3343_v33 }
 0x41a   :  { %3345 = vmatpush.msrb.mxu1 %v3344_v28 }
 0x41d   :  { %v3975_v19 = vpop.eup %3974 }
 0x41e   :  { %v2926_v14 = vmul.f32 %v3975_v19, %v2924_v50  ;;  %vm2932_vm6 = vweird.f32 %v3975_v19  ;;  %v4983_v50 = vand.u32 4294901760, %v2955_v44 }
 0x41f   :  { %vm2933_vm9 = vmor %vm2931_vm7, %vm2932_vm6 }
 0x420   :  { %v2927_v34 = vmul.f32 %v3975_v19, %v2926_v14  ;;  %v3347_v61 = vsub.f32 %v2955_v44, %v4983_v50  ;;  %3290 = vmatpush.msrb.mxu0 %v4983_v50 }
 0x422   :  { %v2928_v47 = vmul.f32 0.5, %v2927_v34  ;;  %v3348_v5 = vand.u32 4294901760, %v3347_v61  ;;  %3292 = vmatpush.msrb.mxu0 %v4985_v52 }
 0x424   :  { %v2929_v38 = vsub.f32 1.5, %v2928_v47  ;;  %v3349_v14 = vsub.f32 %v3347_v61, %v3348_v5  ;;  %v3355_v47 = vsub.f32 %v3353_v6, %v3354_v24  ;;  %3294 = vmatpush.msrb.mxu0 %v5000_v10 }
 0x426   :  { %v2930_v43 = vmul.f32 %v3975_v19, %v2929_v38  ;;  %v3350_v38 = vand.u32 4294901760, %v3349_v14 }
 0x428   :  { %v2934_v2 = vsel %vm2933_vm9, %v3975_v19, %v2930_v43  ;;  %3351 = vmatpush.msrb.mxu1 %v3350_v38 }
 0x429   :  { %v2935_v15 = vmul.f32 %v2934_v2, %v2922_v4  ;;  %v3359_v4 = vsub.f32 %v2953_v55, %v5000_v10 }
 0x42b   :  { %v2937_v32 = vmul.f32 %v2935_v15, %v4917_v3  ;;  %v2939_v39 = vperm.slane %v2935_v15, 0  ;;  %v3356_v15 = vand.u32 4294901760, %v3355_v47 }
 0x42d   :  { %v2938_v25 = vsub.f32 %v2936_v18, %v2937_v32  ;;  %v2943_v16 = vmul.f32 %v2939_v39, %v4906_v22  ;;  %v2940_v23 = vmul.f32 %v2939_v39, %v4885_v60  ;;  %v2941_v27 = vmul.f32 %v2939_v39, %v4883_v0  ;;  %3357 = vmatpush.msrb.mxu1 %v3356_v15 }
 0x42e   :  { %v2942_v17 = vmul.f32 %v2939_v39, %v4887_v58  ;;  %v3360_v18 = vand.u32 4294901760, %v3359_v4 }
 0x42f   :  { %v2944_v49 = vperm.slane %v2938_v25, 0 }
 0x431   :  { %v2948_v31 = vadd.f32 %v2944_v49, %v2943_v16  ;;  %v2945_v29 = vadd.f32 %v2944_v49, %v2940_v23  ;;  %v2946_v56 = vadd.f32 %v2944_v49, %v2941_v27  ;;  %v2947_v41 = vadd.f32 %v2944_v49, %v2942_v17 }
 0x432   :  { %v3361_v23 = vsub.f32 %v3359_v4, %v3360_v18 }
 0x433   :  { %v4944_v62 = vmax.f32 %v2948_v31, 0.0  ;;  %v4946_v36 = vmax.f32 %v2945_v29, 0.0  ;;  %v4948_v11 = vmax.f32 %v2946_v56, 0.0  ;;  %v4950_v45 = vmax.f32 %v2947_v41, 0.0 }
 0x434   :  { %v3362_v56 = vand.u32 4294901760, %v3361_v23 }
 0x435   :  { %v2957_v22 = vrot.slane %v4946_v36, 4  ;;  %v2960_v60 = vrot.slane %v4944_v62, 4  ;;  %v2958_v0 = vrot.slane %v4948_v11, 4  ;;  %v2959_v58 = vrot.slane %v4950_v45, 4 }
 0x436   :  { %v3553_v2 = vrot.slane %v4946_v36, 6  ;;  %v3556_v32 = vrot.slane %v4944_v62, 6  ;;  %v3554_v16 = vrot.slane %v4948_v11, 6  ;;  %v3555_v17 = vrot.slane %v4950_v45, 6  ;;  %3363 = vmatpush.msrb.mxu1 %v3362_v56 }
 0x437   :  { %v2964_v54 = vsel %vm1977_vm0, %v2960_v60, %v2957_v22  ;;  %v2963_v30 = vsel %vm1977_vm0, %v2957_v22, %v2958_v0  ;;  %v2962_v3 = vsel %vm1977_vm0, %v2958_v0, %v2959_v58  ;;  %v2961_v43 = vsel %vm1977_vm0, %v2959_v58, %v2960_v60 }
 0x438   :  { %v2965_v7 = vsel %vm77_vm15, %v2964_v54, 0.0  ;;  %v2977_v8 = vsel %vm904_vm8, %v2963_v30, 0  ;;  %v2967_v53 = vsel %vm79_vm2, %v2962_v3, 0.0  ;;  %v2983_v49 = vsel %vm904_vm8, %v2961_v43, 0 }
 0x439   :  { %v2974_v13 = vsel %vm904_vm8, %v2965_v7, 0  ;;  %v4979_v46 = vand.u32 4294901760, %v2977_v8  ;;  %v2980_v21 = vsel %vm904_vm8, %v2967_v53, 0  ;;  %v5020_v27 = vsel %vm86_vm1, %v3556_v32, %v3553_v2 }
 0x43a   :  { %v4977_v48 = vand.u32 4294901760, %v2974_v13  ;;  %v5003_v19 = vand.u32 4294901760, %v2980_v21  ;;  %v5025_v31 = vsel %vm86_vm1, %v3553_v2, %v3554_v16  ;;  %v3264_v29 = vsel %vm904_vm8, %v4946_v36, 0 }
 0x43b   :  { %v3014_v12 = vsub.f32 %v2977_v8, %v4979_v46  ;;  %v5029_v60 = vand.u32 4294901760, %v2983_v49  ;;  %v5033_v0 = vsel %vm86_vm1, %v3554_v16, %v3555_v17  ;;  %v5037_v58 = vsel %vm86_vm1, %v3555_v17, %v3556_v32 }
 0x43c   :  { %3075 = vmatmul.f32.vlgmr.msrb.gmra.mxu3 %v4977_v48  ;;  %v3006_v51 = vsub.f32 %v2974_v13, %v4977_v48  ;;  %v3022_v25 = vsub.f32 %v2980_v21, %v5003_v19  ;;  %v5040_v36 = vand.u32 4294901760, %v3264_v29  ;;  %v3267_v3 = vsel %vm904_vm8, %v4948_v11, 0 }
 0x43d   :  { %3439 = vmatpush.msrb.mxu3 %v4981_v9  ;;  %v3015_v34 = vand.u32 4294901760, %v3014_v12  ;;  %v3030_v30 = vsub.f32 %v2983_v49, %v5029_v60  ;;  %v5054_v44 = vand.u32 4294901760, %v3267_v3  ;;  %v3270_v53 = vsel %vm904_vm8, %v4950_v45, 0 }
 0x43e   :  { %3117 = vmatmul.f32.vlgmr.msra.gmra.mxu0 %v3006_v51  ;;  %v3007_v63 = vand.u32 4294901760, %v3006_v51  ;;  %v3023_v22 = vand.u32 4294901760, %v3022_v25  ;;  %v5046_v40 = vsub.f32 %v3264_v29, %v5040_v36  ;;  %v3273_v45 = vsel %vm904_vm8, %v4944_v62, 0 }
 0x43f   :  { %3441 = vmatpush.msrb.mxu3 %v4983_v50  ;;  %v3016_v39 = vsub.f32 %v3014_v12, %v3015_v34  ;;  %3486 = vmatpush.msra.mxu0 %v3342_v35  ;;  %v3031_v7 = vand.u32 4294901760, %v3030_v30  ;;  %v5060_v13 = vsub.f32 %v3267_v3, %v5054_v44  ;;  %v3561_v29 = vsel %vm73_vm3, %v5020_v27, 0.0 }
 0x440   :  { %3159 = vmatmul.f32.vlgmr.msra.gmra.mxu1 %v3007_v63  ;;  %v3008_v59 = vsub.f32 %v3006_v51, %v3007_v63  ;;  %v3024_v54 = vsub.f32 %v3022_v25, %v3023_v22  ;;  %v3297_v8 = vand.u32 4294901760, %v5046_v40  ;;  %v5066_v51 = vand.u32 4294901760, %v3270_v53 }
 0x441   :  { %3443 = vmatpush.msrb.mxu3 %v4985_v52  ;;  %v3017_v41 = vand.u32 4294901760, %v3016_v39  ;;  %3490 = vmatpush.msra.mxu0 %v3348_v5  ;;  %v3032_v57 = vsub.f32 %v3030_v30, %v3031_v7  ;;  %v5080_v63 = vand.u32 4294901760, %v3273_v45  ;;  %v3570_v56 = vsel %vm904_vm8, %v3561_v29, 0 }
 0x442   :  { %v3009_v26 = vand.u32 4294901760, %v3008_v59  ;;  %3529 = vmatpush.msra.mxu1 %v4981_v9  ;;  %v3025_v20 = vand.u32 4294901760, %v3024_v54  ;;  %v3298_v11 = vsub.f32 %v5046_v40, %v3297_v8  ;;  %v5073_v55 = vsub.f32 %v3270_v53, %v5066_v51 }
 0x443   :  { %3445 = vmatpush.msrb.mxu3 %v5000_v10  ;;  %3494 = vmatpush.msra.mxu0 %v3354_v24  ;;  %v3033_v9 = vand.u32 4294901760, %v3032_v57  ;;  %v3567_v24 = vld [vmem:[%s5169_s1 + $0x108] sm:$0xff] }
 0x444   :  { %3010 = vmatmul.f32.vlgmr.msrb.gmra.mxu2 %v3009_v26  ;;  %3079 = vmatmul.f32.gmra.mxu3 %v4979_v46  ;;  %v3595_v26 = vand.u32 4294901760, %v3567_v24 }
 0x445   :  { %3395 = vmatpush.msrb.mxu2 %v3341_v37  ;;  %3531 = vmatpush.msra.mxu1 %v4983_v50  ;;  %v3299_v50 = vand.u32 4294901760, %v3298_v11 }
 0x446   :  { %3122 = vmatmul.f32.gmra.mxu0 %v3014_v12  ;;  %v3568_v12 = vld [vmem:[%s5169_s1 + $0x110] sm:$0xff] }
 0x447   :  { %3398 = vmatpush.msrb.mxu2 %v3347_v61  ;;  %3498 = vmatpush.msra.mxu0 %v3360_v18  ;;  %v3313_v61 = vand.u32 4294901760, %v5073_v55  ;;  %v3593_v35 = vand.u32 4294901760, %v3568_v12  ;;  %v3565_v18 = vld [vmem:[%s5169_s1 + $0xf8] sm:$0xff] }
 0x448   :  { %3165 = vmatmul.f32.gmra.mxu1 %v3015_v34  ;;  %v3653_v34 = vsub.f32 %v3567_v24, %v3595_v26  ;;  %v3599_v32 = vand.u32 4294901760, %v3565_v18 }
 0x449   :  { %3401 = vmatpush.msrb.mxu2 %v3353_v6  ;;  %3533 = vmatpush.msra.mxu1 %v4985_v52  ;;  %v3305_v52 = vand.u32 4294901760, %v5060_v13  ;;  %v3647_v6 = vsub.f32 %v3568_v12, %v3593_v35  ;;  %v3314_v62 = vsub.f32 %v5073_v55, %v3313_v61 }
 0x44a   :  { %v3654_v28 = vand.u32 4294901760, %v3653_v34 }
 0x44b   :  { %3404 = vmatpush.msrb.mxu2 %v3359_v4  ;;  %3535 = vmatpush.msra.mxu1 %v5000_v10  ;;  %v3306_v37 = vsub.f32 %v5060_v13, %v3305_v52  ;;  %v3648_v5 = vand.u32 4294901760, %v3647_v6  ;;  %v3315_v59 = vand.u32 4294901760, %v3314_v62  ;;  %v3566_v4 = vld [vmem:[%s5169_s1 + $0x100] sm:$0xff] }
 0x44c   :  { %3018 = vmatmul.f32.gmra.mxu2 %v3017_v41  ;;  %3083 = vmatmul.f32.gmra.mxu3 %v5003_v19  ;;  %v3655_v47 = vsub.f32 %v3653_v34, %v3654_v28  ;;  %v3597_v2 = vand.u32 4294901760, %v3566_v4  ;;  %v3601_v41 = vand.u32 4294901760, %v3570_v56 }
 0x44d   :  { %v3307_v21 = vand.u32 4294901760, %v3306_v37  ;;  %v3649_v10 = vsub.f32 %v3647_v6, %v3648_v5 }
 0x44e   :  { %3127 = vmatmul.f32.gmra.mxu0 %v3022_v25  ;;  %v3656_v43 = vand.u32 4294901760, %v3655_v47  ;;  %v3659_v15 = vsub.f32 %v3566_v4, %v3597_v2  ;;  %v3665_v25 = vsub.f32 %v3565_v18, %v3599_v32 }
 0x44f   :  { %v3650_v14 = vand.u32 4294901760, %v3649_v10 }
 0x450   :  { %3171 = vmatmul.f32.gmra.mxu1 %v3023_v22  ;;  %v3666_v49 = vand.u32 4294901760, %v3665_v25  ;;  %v3602_v22 = vsub.f32 %v3570_v56, %v3601_v41 }
 0x452   :  { %v3667_v23 = vsub.f32 %v3665_v25, %v3666_v49  ;;  %v3603_v1 = vand.u32 4294901760, %v3602_v22 }
 0x454   :  { %3026 = vmatmul.f32.gmra.mxu2 %v3025_v20  ;;  %3087 = vmatmul.f32.gmra.mxu3 %v5029_v60  ;;  %v3668_v17 = vand.u32 4294901760, %v3667_v23  ;;  %v3604_v54 = vsub.f32 %v3602_v22, %v3603_v1 }
 0x456   :  { %3132 = vmatmul.f32.gmra.mxu0 %v3030_v30  ;;  %v3605_v3 = vand.u32 4294901760, %v3604_v54 }
 0x458   :  { %3177 = vmatmul.f32.gmra.mxu1 %v3031_v7 }
 0x45c   :  { %3034 = vmatmul.f32.gmra.mxu2 %v3033_v9  ;;  %3247 = vmatmul.f32.vlgmr.msra.gmra.mxu3 %v4977_v48 }
 0x45d   :  { %3651 = vmatpush.msra.mxu3 %v3650_v14 }
 0x45e   :  { %3300 = vmatmul.f32.vlgmr.msrb.gmra.mxu0 %v3299_v50 }
 0x45f   :  { %3701 = vmatpush.msrb.mxu0 %v3647_v6  ;;  %3657 = vmatpush.msra.mxu3 %v3656_v43 }
 0x460   :  { %3365 = vmatmul.f32.vlgmr.msrb.gmra.mxu1 %v5040_v36 }
 0x461   :  { %3745 = vmatpush.msrb.mxu1 %v3593_v35  ;;  %3704 = vmatpush.msrb.mxu0 %v3653_v34 }
 0x463   :  { %3747 = vmatpush.msrb.mxu1 %v3595_v26  ;;  %3707 = vmatpush.msrb.mxu0 %v3659_v15 }
 0x464   :  { %3210 = vmatmul.f32.vlgmr.msra.gmra.mxu2 %v4977_v48  ;;  %3251 = vmatmul.f32.gmra.mxu3 %v4979_v46  ;;  %v5090_v48 = vsub.f32 %v3273_v45, %v5080_v63 }
 0x465   :  { %3594 = vmatpush.msra.mxu2 %v3593_v35  ;;  %3749 = vmatpush.msrb.mxu1 %v3597_v2 }
 0x466   :  { %3308 = vmatmul.f32.gmra.mxu0 %v3307_v21  ;;  %v3321_v33 = vand.u32 4294901760, %v5090_v48 }
 0x467   :  { %3596 = vmatpush.msra.mxu2 %v3595_v26  ;;  %3751 = vmatpush.msrb.mxu1 %v3599_v32 }
 0x468   :  { %3369 = vmatmul.f32.gmra.mxu1 %v5054_v44  ;;  %3710 = vmatpush.msrb.mxu0 %v3665_v25 }
 0x469   :  { %3598 = vmatpush.msra.mxu2 %v3597_v2 }
 0x46b   :  { %3600 = vmatpush.msra.mxu2 %v3599_v32 }
 0x46c   :  { %3214 = vmatmul.f32.gmra.mxu2 %v4979_v46  ;;  %3255 = vmatmul.f32.gmra.mxu3 %v5003_v19  ;;  %v3322_v46 = vsub.f32 %v5090_v48, %v3321_v33 }
 0x46e   :  { %3316 = vmatmul.f32.gmra.mxu0 %v3315_v59  ;;  %v3323_v38 = vand.u32 4294901760, %v3322_v46 }
 0x470   :  { %3373 = vmatmul.f32.gmra.mxu1 %v5066_v51 }
 0x474   :  { %3218 = vmatmul.f32.gmra.mxu2 %v5003_v19  ;;  %3259 = vmatmul.f32.gmra.mxu3 %v5029_v60  ;;  %v3660_v19 = vand.u32 4294901760, %v3659_v15 }
 0x476   :  { %3324 = vmatmul.f32.gmra.mxu0 %v3323_v38  ;;  %v3661_v39 = vsub.f32 %v3659_v15, %v3660_v19 }
 0x478   :  { %3377 = vmatmul.f32.gmra.mxu1 %v5080_v63  ;;  %v3662_v16 = vand.u32 4294901760, %v3661_v39 }
 0x47a   :  { %3663 = vmatpush.msra.mxu3 %v3662_v16 }
 0x47c   :  { %3222 = vmatmul.f32.gmra.mxu2 %v5029_v60  ;;  %3449 = vmatmul.f32.vlgmr.msrb.gmra.mxu3 %v3297_v8  ;;  %v3573_v60 = vsel %vm904_vm8, %v5025_v31, 0 }
 0x47d   :  { %3669 = vmatpush.msra.mxu3 %v3668_v17  ;;  %v3609_v27 = vand.u32 4294901760, %v3573_v60 }
 0x47e   :  { %3500 = vmatmul.f32.vlgmr.msra.gmra.mxu0 %v5040_v36 }
 0x47f   :  { %3835 = vmatpush.msrb.mxu3 %v3593_v35  ;;  %v3610_v30 = vsub.f32 %v3573_v60, %v3609_v27 }
 0x480   :  { %3537 = vmatmul.f32.vlgmr.msra.gmra.mxu1 %v5040_v36  ;;  %v3563_v36 = vsel %vm75_vm4, %v5033_v0, 0.0 }
 0x481   :  { %3837 = vmatpush.msrb.mxu3 %v3595_v26  ;;  %v3611_v20 = vand.u32 4294901760, %v3610_v30 }
 0x483   :  { %3839 = vmatpush.msrb.mxu3 %v3597_v2  ;;  %v3612_v7 = vsub.f32 %v3610_v30, %v3611_v20 }
 0x484   :  { %3407 = vmatmul.f32.vlgmr.msrb.gmra.mxu2 %v5046_v40  ;;  %3455 = vmatmul.f32.gmra.mxu3 %v3305_v52  ;;  %v3576_v40 = vsel %vm904_vm8, %v3563_v36, 0 }
 0x485   :  { %3792 = vmatpush.msrb.mxu2 %v3648_v5  ;;  %3841 = vmatpush.msrb.mxu3 %v3599_v32  ;;  %v3617_v31 = vand.u32 4294901760, %v3576_v40  ;;  %v3613_v42 = vand.u32 4294901760, %v3612_v7 }
 0x486   :  { %3504 = vmatmul.f32.gmra.mxu0 %v5054_v44 }
 0x487   :  { %3796 = vmatpush.msrb.mxu2 %v3654_v28  ;;  %v3618_v8 = vsub.f32 %v3576_v40, %v3617_v31 }
 0x488   :  { %3541 = vmatmul.f32.gmra.mxu1 %v5054_v44  ;;  %v3579_v44 = vsel %vm904_vm8, %v5037_v58, 0 }
 0x489   :  { %3800 = vmatpush.msrb.mxu2 %v3660_v19  ;;  %v3619_v0 = vand.u32 4294901760, %v3618_v8  ;;  %v3625_v57 = vand.u32 4294901760, %v3579_v44 }
 0x48b   :  { %3804 = vmatpush.msrb.mxu2 %v3666_v49  ;;  %v3620_v11 = vsub.f32 %v3618_v8, %v3619_v0 }
 0x48c   :  { %3412 = vmatmul.f32.gmra.mxu2 %v5060_v13  ;;  %3461 = vmatmul.f32.gmra.mxu3 %v3313_v61  ;;  %v3626_v13 = vsub.f32 %v3579_v44, %v3625_v57 }
 0x48d   :  { %v3621_v53 = vand.u32 4294901760, %v3620_v11 }
 0x48e   :  { %3508 = vmatmul.f32.gmra.mxu0 %v5066_v51  ;;  %v3627_v9 = vand.u32 4294901760, %v3626_v13 }
 0x490   :  { %3545 = vmatmul.f32.gmra.mxu1 %v5066_v51  ;;  %v3628_v50 = vsub.f32 %v3626_v13, %v3627_v9 }
 0x492   :  { %v3629_v52 = vand.u32 4294901760, %v3628_v50 }
 0x494   :  { %3417 = vmatmul.f32.gmra.mxu2 %v5073_v55  ;;  %3467 = vmatmul.f32.gmra.mxu3 %v3321_v33 }
 0x496   :  { %3512 = vmatmul.f32.gmra.mxu0 %v5080_v63 }
 0x498   :  { %3549 = vmatmul.f32.gmra.mxu1 %v5080_v63 }
 0x49c   :  { %3422 = vmatmul.f32.gmra.mxu2 %v5090_v48  ;;  %3671 = vmatmul.f32.vlgmr.msra.gmra.mxu3 %v3601_v41 }
 0x49e   :  { %3713 = vmatmul.f32.vlgmr.msrb.gmra.mxu0 %v3602_v22 }
 0x4a0   :  { %3755 = vmatmul.f32.vlgmr.msrb.gmra.mxu1 %v3603_v1 }
 0x4a4   :  { %3606 = vmatmul.f32.vlgmr.msra.gmra.mxu2 %v3605_v3  ;;  %3675 = vmatmul.f32.gmra.mxu3 %v3609_v27 }
 0x4a6   :  { %3718 = vmatmul.f32.gmra.mxu0 %v3610_v30 }
 0x4a8   :  { %3761 = vmatmul.f32.gmra.mxu1 %v3611_v20 }
 0x4ac   :  { %3614 = vmatmul.f32.gmra.mxu2 %v3613_v42  ;;  %3679 = vmatmul.f32.gmra.mxu3 %v3617_v31 }
 0x4ae   :  { %3723 = vmatmul.f32.gmra.mxu0 %v3618_v8 }
 0x4b0   :  { %3767 = vmatmul.f32.gmra.mxu1 %v3619_v0 }
 0x4b4   :  { %3622 = vmatmul.f32.gmra.mxu2 %v3621_v53  ;;  %3683 = vmatmul.f32.gmra.mxu3 %v3625_v57 }
 0x4b6   :  { %3728 = vmatmul.f32.gmra.mxu0 %v3626_v13 }
 0x4b8   :  { %3773 = vmatmul.f32.gmra.mxu1 %v3627_v9 }
 0x4bb   :  { %v3118_v58 = vpop.f32.mrf.mxu0 }
 0x4bc   :  { %3630 = vmatmul.f32.gmra.mxu2 %v3629_v52  ;;  %3843 = vmatmul.f32.vlgmr.msrb.gmra.mxu3 %v3601_v41 }
 0x4bd   :  { %v3160_v37 = vpop.f32.mrf.mxu1 }
 0x4bf   :  { %v3076_v51 = vpop.f32.mrf.mxu3 }
 0x4c3   :  { %v3123_v21 = vpop.f32.mrf.mxu0 }
 0x4c4   :  { %3806 = vmatmul.f32.vlgmr.msrb.gmra.mxu2 %v3601_v41  ;;  %3847 = vmatmul.f32.gmra.mxu3 %v3609_v27 }
 0x4c5   :  { %v3166_v63 = vpop.f32.mrf.mxu1 }
 0x4c7   :  { %v3011_v55 = vpop.f32.mrf.mxu2  ;;  %v3080_v45 = vpop.f32.mrf.mxu3 }
 0x4c8   :  { %v3077_v61 = vadd.f32 %v3076_v51, %v3011_v55 }
 0x4ca   :  { %v3119_v12 = vadd.f32 %v3118_v58, %v3077_v61 }
 0x4cb   :  { %v3128_v5 = vpop.f32.mrf.mxu0 }
 0x4cc   :  { %3810 = vmatmul.f32.gmra.mxu2 %v3609_v27  ;;  %3851 = vmatmul.f32.gmra.mxu3 %v3617_v31  ;;  %v3161_v35 = vadd.f32 %v3160_v37, %v3119_v12 }
 0x4cd   :  { %v3172_v59 = vpop.f32.mrf.mxu1 }
 0x4cf   :  { %v3019_v6 = vpop.f32.mrf.mxu2  ;;  %v3084_v62 = vpop.f32.mrf.mxu3 }
 0x4d0   :  { %v3081_v48 = vadd.f32 %v3080_v45, %v3019_v6 }
 0x4d2   :  { %v3124_v10 = vadd.f32 %v3123_v21, %v3081_v48 }
 0x4d3   :  { %v3133_v46 = vpop.f32.mrf.mxu0 }
 0x4d4   :  { %3814 = vmatmul.f32.gmra.mxu2 %v3617_v31  ;;  %3855 = vmatmul.f32.gmra.mxu3 %v3625_v57  ;;  %v3167_v33 = vadd.f32 %v3166_v63, %v3124_v10 }
 0x4d5   :  { %v3178_v47 = vpop.f32.mrf.mxu1 }
 0x4d7   :  { %v3027_v24 = vpop.f32.mrf.mxu2  ;;  %v3088_v14 = vpop.f32.mrf.mxu3 }
 0x4d8   :  { %v3085_v26 = vadd.f32 %v3084_v62, %v3027_v24 }
 0x4da   :  { %v3129_v34 = vadd.f32 %v3128_v5, %v3085_v26 }
 0x4db   :  { %v3301_v18 = vpop.f32.mrf.mxu0 }
 0x4dc   :  { %3818 = vmatmul.f32.gmra.mxu2 %v3625_v57  ;;  %v3173_v28 = vadd.f32 %v3172_v59, %v3129_v34 }
 0x4dd   :  { %v3366_v25 = vpop.f32.mrf.mxu1 }
 0x4df   :  { %v3035_v38 = vpop.f32.mrf.mxu2  ;;  %v3248_v4 = vpop.f32.mrf.mxu3 }
 0x4e0   :  { %v3089_v43 = vadd.f32 %v3088_v14, %v3035_v38 }
 0x4e2   :  { %v3134_v2 = vadd.f32 %v3133_v46, %v3089_v43 }
 0x4e3   :  { %v3309_v41 = vpop.f32.mrf.mxu0 }
 0x4e4   :  { %v3179_v15 = vadd.f32 %v3178_v47, %v3134_v2 }
 0x4e5   :  { %v3370_v60 = vpop.f32.mrf.mxu1 }
 0x4e7   :  { %v3211_v19 = vpop.f32.mrf.mxu2  ;;  %v3252_v32 = vpop.f32.mrf.mxu3 }
 0x4e8   :  { %v3212_v39 = vadd.f32 %v3211_v19, %v3161_v35 }
 0x4ea   :  { %v3249_v16 = vadd.f32 %v3248_v4, %v3212_v39 }
 0x4eb   :  { %v3317_v3 = vpop.f32.mrf.mxu0 }
 0x4ec   :  { %v3302_v49 = vadd.f32 %v3301_v18, %v3249_v16 }
 0x4ed   :  { %v3374_v31 = vpop.f32.mrf.mxu1 }
 0x4ee   :  { %v3367_v23 = vadd.f32 %v3366_v25, %v3302_v49 }
 0x4ef   :  { %v3215_v17 = vpop.f32.mrf.mxu2  ;;  %v3256_v29 = vpop.f32.mrf.mxu3 }
 0x4f0   :  { %v3216_v56 = vadd.f32 %v3215_v17, %v3167_v33 }
 0x4f2   :  { %v3253_v22 = vadd.f32 %v3252_v32, %v3216_v56 }
 0x4f3   :  { %v3325_v13 = vpop.f32.mrf.mxu0 }
 0x4f4   :  { %v3310_v1 = vadd.f32 %v3309_v41, %v3253_v22 }
 0x4f5   :  { %v3378_v50 = vpop.f32.mrf.mxu1 }
 0x4f6   :  { %v3371_v27 = vadd.f32 %v3370_v60, %v3310_v1 }
 0x4f7   :  { %v3219_v36 = vpop.f32.mrf.mxu2  ;;  %v3260_v54 = vpop.f32.mrf.mxu3 }
 0x4f8   :  { %v3220_v30 = vadd.f32 %v3219_v36, %v3173_v28 }
 0x4fa   :  { %v3257_v40 = vadd.f32 %v3256_v29, %v3220_v30 }
 0x4fb   :  { %v3501_v37 = vpop.f32.mrf.mxu0 }
 0x4fc   :  { %v3318_v20 = vadd.f32 %v3317_v3, %v3257_v40 }
 0x4fd   :  { %v3538_v45 = vpop.f32.mrf.mxu1 }
 0x4fe   :  { %v3375_v7 = vadd.f32 %v3374_v31, %v3318_v20 }
 0x4ff   :  { %v3223_v8 = vpop.f32.mrf.mxu2  ;;  %v3450_v44 = vpop.f32.mrf.mxu3 }
 0x500   :  { %v3224_v42 = vadd.f32 %v3223_v8, %v3179_v15 }
 0x502   :  { %v3261_v0 = vadd.f32 %v3260_v54, %v3224_v42 }
 0x503   :  { %v3505_v35 = vpop.f32.mrf.mxu0 }
 0x504   :  { %v3326_v1 = vadd.f32 %v3325_v13, %v3261_v0 }
 0x505   :  { %v3542_v48 = vpop.f32.mrf.mxu1 }
 0x506   :  { %v3379_v31 = vadd.f32 %v3378_v50, %v3326_v1 }
 0x507   :  { %v3408_v57 = vpop.f32.mrf.mxu2  ;;  %v3456_v11 = vpop.f32.mrf.mxu3 }
 0x508   :  { %v3409_v53 = vadd.f32 %v3408_v57, %v3367_v23 }
 0x50a   :  { %v3451_v9 = vadd.f32 %v3450_v44, %v3409_v53 }
 0x50b   :  { %v3509_v5 = vpop.f32.mrf.mxu0 }
 0x50c   :  { %v3502_v49 = vadd.f32 %v3501_v37, %v3451_v9 }
 0x50d   :  { %v3546_v33 = vpop.f32.mrf.mxu1 }
 0x50e   :  { %v3539_v22 = vadd.f32 %v3538_v45, %v3502_v49 }
 0x50f   :  { %v3413_v52 = vpop.f32.mrf.mxu2  ;;  %v3462_v58 = vpop.f32.mrf.mxu3 }
 0x510   :  { %v3414_v51 = vadd.f32 %v3413_v52, %v3371_v27 }
 0x512   :  { %v3457_v55 = vadd.f32 %v3456_v11, %v3414_v51 }
 0x513   :  { %v3513_v26 = vpop.f32.mrf.mxu0 }
 0x514   :  { %v3506_v41 = vadd.f32 %v3505_v35, %v3457_v55 }
 0x515   :  { %v5146_v34 = vpop.f32.mrf.mxu1 }
 0x516   :  { %v3543_v3 = vadd.f32 %v3542_v48, %v3506_v41 }
 0x517   :  { %v3418_v21 = vpop.f32.mrf.mxu2  ;;  %v5144_v61 = vpop.f32.mrf.mxu3 }
 0x518   :  { %v3419_v63 = vadd.f32 %v3418_v21, %v3375_v7 }
 0x51a   :  { %v3463_v12 = vadd.f32 %v3462_v58, %v3419_v63 }
 0x51b   :  { %v3714_v47 = vpop.f32.mrf.mxu0 }
 0x51c   :  { %v3510_v42 = vadd.f32 %v3509_v5, %v3463_v12 }
 0x51d   :  { %v3756_v4 = vpop.f32.mrf.mxu1 }
 0x51e   :  { %v3547_v35 = vadd.f32 %v3546_v33, %v3510_v42 }
 0x51f   :  { %v3423_v6 = vpop.f32.mrf.mxu2  ;;  %v3672_v62 = vpop.f32.mrf.mxu3 }
 0x520   :  { %v3424_v57 = vadd.f32 %v3423_v6, %v3379_v31 }
 0x522   :  { %v3469_v63 = vadd.f32 %v5144_v61, %v3424_v57  ;;  %v3897_v57 = vld [vmem:[%s5169_s1 + $0x13f] sm:$0x1] }
 0x523   :  { %v3719_v18 = vpop.f32.mrf.mxu0 }
 0x524   :  { %v3514_v5 = vadd.f32 %v3513_v26, %v3469_v63 }
 0x525   :  { %v3762_v16 = vpop.f32.mrf.mxu1 }
 0x527   :  { %v3607_v10 = vpop.f32.mrf.mxu2  ;;  %v3676_v59 = vpop.f32.mrf.mxu3 }
 0x528   :  { %v3673_v38 = vadd.f32 %v3672_v62, %v3607_v10 }
 0x52a   :  { %v3715_v2 = vadd.f32 %v3714_v47, %v3673_v38 }
 0x52b   :  { %v3724_v27 = vpop.f32.mrf.mxu0 }
 0x52c   :  { %v3757_v32 = vadd.f32 %v3756_v4, %v3715_v2 }
 0x52d   :  { %v3768_v7 = vpop.f32.mrf.mxu1 }
 0x52f   :  { %v3615_v24 = vpop.f32.mrf.mxu2  ;;  %v3680_v14 = vpop.f32.mrf.mxu3 }
 0x530   :  { %v3677_v19 = vadd.f32 %v3676_v59, %v3615_v24 }
 0x532   :  { %v3720_v23 = vadd.f32 %v3719_v18, %v3677_v19 }
 0x533   :  { %v3729_v45 = vpop.f32.mrf.mxu0 }
 0x534   :  { %v3763_v60 = vadd.f32 %v3762_v16, %v3720_v23 }
 0x535   :  { %v3774_v48 = vpop.f32.mrf.mxu1 }
 0x537   :  { %v3623_v46 = vpop.f32.mrf.mxu2  ;;  %v3684_v28 = vpop.f32.mrf.mxu3 }
 0x538   :  { %v3681_v29 = vadd.f32 %v3680_v14, %v3623_v46 }
 0x53a   :  { %v3725_v40 = vadd.f32 %v3724_v27, %v3681_v29 }
 0x53c   :  { %v3769_v11 = vadd.f32 %v3768_v7, %v3725_v40 }
 0x53f   :  { %v3631_v43 = vpop.f32.mrf.mxu2  ;;  %v3844_v15 = vpop.f32.mrf.mxu3 }
 0x540   :  { %v3685_v53 = vadd.f32 %v3684_v28, %v3631_v43  ;;  %v3551_v43 = vadd.f32 %v5146_v34, %v3514_v5 }
 0x542   :  { %v3730_v12 = vadd.f32 %v3729_v45, %v3685_v53  ;;  %v3943_v45 = vpop.permute.xlu0 %3942 }
 0x544   :  { %v3775_v24 = vadd.f32 %v3774_v48, %v3730_v12 }
 0x547   :  { %v3807_v39 = vpop.f32.mrf.mxu2  ;;  %v3848_v56 = vpop.f32.mrf.mxu3 }
 0x548   :  { %v3808_v25 = vadd.f32 %v3807_v39, %v3757_v32 }
 0x54a   :  { %v3845_v17 = vadd.f32 %v3844_v15, %v3808_v25 }
 0x54c   :  { %v3859_v54 = vadd.f32 %v3845_v17, %v3539_v22 }
 0x54e   :  { %v3877_v8 = vmul.f32 %v3859_v54, %v3859_v54  ;;  %v3863_v9 = vsel %vm904_vm8, %v3859_v54, 0.0 }
 0x54f   :  { %v3811_v36 = vpop.f32.mrf.mxu2  ;;  %v3852_v13 = vpop.f32.mrf.mxu3 }
 0x550   :  { %v3812_v30 = vadd.f32 %v3811_v36, %v3763_v60  ;;  %v3881_v37 = vsel %vm904_vm8, %v3877_v8, 0.0 }
 0x552   :  { %v3849_v20 = vadd.f32 %v3848_v56, %v3812_v30 }
 0x554   :  { %v3860_v44 = vadd.f32 %v3849_v20, %v3543_v3 }
 0x556   :  { %v3864_v52 = vsel %vm904_vm8, %v3860_v44, 0.0  ;;  %v3878_v0 = vmul.f32 %v3860_v44, %v3860_v44  ;;  %v3915_v33 = vrot.slane %v3860_v44, 7 }
 0x557   :  { %v3815_v58 = vpop.f32.mrf.mxu2  ;;  %v3865_v51 = vadd.f32 %v3864_v52, %v3863_v9  ;;  %v3856_v4 = vpop.f32.mrf.mxu3  ;;  %v3911_v52 = vld [vmem:[%s5169_s1 + $0x140] sm:$0x1] }
 0x558   :  { %v3882_v55 = vsel %vm904_vm8, %v3878_v0, 0.0  ;;  %v3816_v50 = vadd.f32 %v3815_v58, %v3769_v11 }
 0x559   :  { %v3883_v21 = vadd.f32 %v3882_v55, %v3881_v37 }
 0x55a   :  { %v3853_v6 = vadd.f32 %v3852_v13, %v3816_v50 }
 0x55c   :  { %v3861_v62 = vadd.f32 %v3853_v6, %v3547_v35 }
 0x55e   :  { %v3866_v10 = vsel %vm904_vm8, %v3861_v62, 0.0  ;;  %v3879_v59 = vmul.f32 %v3861_v62, %v3861_v62 }
 0x55f   :  { %v3867_v14 = vadd.f32 %v3866_v10, %v3865_v51  ;;  %v3819_v46 = vpop.f32.mrf.mxu2 }
 0x560   :  { %v3884_v28 = vsel %vm904_vm8, %v3879_v59, 0.0  ;;  %v3820_v47 = vadd.f32 %v3819_v46, %v3775_v24 }
 0x561   :  { %v3885_v38 = vadd.f32 %v3884_v28, %v3883_v21 }
 0x562   :  { %v3857_v61 = vadd.f32 %v3856_v4, %v3820_v47 }
 0x564   :  { %v3862_v2 = vadd.f32 %v3857_v61, %v3551_v43 }
 0x566   :  { %v3868_v15 = vsel %vm904_vm8, %v3862_v2, 0.0  ;;  %v3880_v18 = vmul.f32 %v3862_v2, %v3862_v2  ;;  %v3918_v26 = vrot.slane %v3862_v2, 6 }
 0x567   :  { %v3869_v19 = vadd.f32 %v3868_v15, %v3867_v14 }
 0x568   :  { %v3886_v32 = vsel %vm904_vm8, %v3880_v18, 0.0  ;;  %v3921_v39 = vsel %vm3920_vm5, %v3915_v33, %v3918_v26  ;;  %vm3947_vm8 = vcmask 254976  }
 0x569   :  { %v3870_v25 = vrot.slane %v3869_v19, 4  ;;  %v3887_v16 = vadd.f32 %v3886_v32, %v3885_v38 }
 0x56b   :  { %v3871_v49 = vadd.f32 %v3870_v25, %v3869_v19  ;;  %v3888_v23 = vrot.slane %v3887_v16, 4 }
 0x56d   :  { %v3872_v17 = vrot.slane %v3871_v49, 2  ;;  %v3889_v29 = vadd.f32 %v3888_v23, %v3887_v16 }
 0x56f   :  { %v3873_v56 = vadd.f32 %v3872_v17, %v3871_v49  ;;  %v3890_v34 = vrot.slane %v3889_v29, 2 }
 0x571   :  { %v3874_v41 = vrot.slane %v3873_v56, 1  ;;  %v3891_v22 = vadd.f32 %v3890_v34, %v3889_v29 }
 0x573   :  { %v3892_v60 = vrot.slane %v3891_v22, 1  ;;  %v3875_v1 = vadd.f32 %v3874_v41, %v3873_v56 }
 0x575   :  { %v3893_v27 = vadd.f32 %v3892_v60, %v3891_v22  ;;  %v3876_v36 = vmul.f32 0.03125, %v3875_v1 }
 0x577   :  { %v3894_v54 = vmul.f32 0.03125, %v3893_v27  ;;  %v3895_v30 = vmul.f32 %v3876_v36, %v3876_v36 }
 0x579   :  { %v3896_v40 = vsub.f32 %v3894_v54, %v3895_v30 }
 0x57b   :  { %v3898_v3 = vmax.f32 %v3896_v40, 0.0 }
 0x57d   :  { %v3899_v20 = vadd.f32 1e-05, %v3898_v3 }
 0x57f   :  { %3976 = vrsqrt.f32 %v3899_v20  ;;  %vm3906_vm3 = vweird.f32 %v3899_v20 }
 0x585   :  { %v3977_v31 = vpop.eup %3976 }
 0x586   :  { %v3901_v7 = vmul.f32 %v3977_v31, %v3899_v20  ;;  %vm3907_vm1 = vweird.f32 %v3977_v31 }
 0x587   :  { %vm3908_vm4 = vmor %vm3906_vm3, %vm3907_vm1 }
 0x588   :  { %v3902_v8 = vmul.f32 %v3977_v31, %v3901_v7 }
 0x58a   :  { %v3903_v44 = vmul.f32 0.5, %v3902_v8 }
 0x58c   :  { %v3904_v42 = vsub.f32 1.5, %v3903_v44 }
 0x58e   :  { %v3905_v11 = vmul.f32 %v3977_v31, %v3904_v42 }
 0x590   :  { %v3909_v53 = vsel %vm3908_vm4, %v3977_v31, %v3905_v11 }
 0x591   :  { %v3910_v9 = vmul.f32 %v3909_v53, %v3897_v57 }
 0x593   :  { %v3912_v0 = vmul.f32 %v3910_v9, %v3876_v36  ;;  %v3922_v13 = vperm.slane %v3910_v9, 0 }
 0x595   :  { %v3913_v58 = vsub.f32 %v3911_v52, %v3912_v0  ;;  %v3923_v51 = vmul.f32 %v3922_v13, %v3921_v39 }
 0x597   :  { %v3924_v37 = vperm.slane %v3913_v58, 0 }
 0x599   :  { %v3925_v55 = vadd.f32 %v3924_v37, %v3923_v51 }
 0x59b   :  { %v3926_v50 = vmax.f32 %v3925_v55, 0.0 }
 0x59d   :  { %v3945_v21 = vadd.f32 %v3943_v45, %v3926_v50 }
 0x59f   :  { %v3946_v63 = vmax.f32 %v3945_v21, 0.0 }
 0x5a1   :  { %3948 = vst.msk [vmem:[#allocation2] sm:$0x3] %vm3947_vm8, %v3946_v63 }
 0x5a2   :  { %3959 = dma.vmem_to_hbm [thread:$0]  %s3955_s4, 32, %s3957_s7, [#allocation3]  }
 0x5a3   :  { %4002 = dma.done.wait [#allocation3], 32  }
 0x5a4   :  { %4003 = vsyncadd [#allocation3], 4294967264 }
 0x5a5   :  { %3964 = vsyncpa [#allocation3], 1 }

</bundles_post_ra>
